<compile_context>
chip_gen: v7x
topology: tpu7x:2x2x1
jax: 0.10.0
libtpu: 0.0.40
codegen_flags: <defaults>
</compile_context>

<pallas_src>
import functools

import jax
import jax.numpy as jnp
import numpy as np
from jax.experimental import pallas as pl
from jax.experimental.pallas import tpu as pltpu

K1, D1, P1 = 5, 2, 4   # first conv:  kernel, dilation, padding
K2, D2, P2 = 7, 2, 6   # second conv: kernel, dilation, padding
OFFS1 = tuple(D1 * k - P1 for k in range(K1))   # (-4, -2, 0, 2, 4)
OFFS2 = tuple(D2 * k - P2 for k in range(K2))   # (-6, -4, -2, 0, 2, 4, 6)


def _elu(x):
    # ELU(alpha=1); min() guards exp() overflow on the positive branch.
    return jnp.where(x > 0, x, jnp.exp(jnp.minimum(x, 0.0)) - 1.0)


def _make_kernel(L):
    """Kernel over a (C, Nb*L) lane-dense block (Nb batch samples per step)."""

    def kernel(x_ref, w1_ref, w2_ref, t1_ref, t2_ref, o_ref):
        C, NBL = x_ref.shape
        x = x_ref[...]                                          # (C, Nb*L) f32

        # Per-sample position along L for every lane of the flattened block.
        local = jax.lax.broadcasted_iota(jnp.int32, (C, NBL), 1) % L

        def stacked_rhs(v, offs):
            """K shifted / zero-padded copies of v stacked on the contraction axis."""
            parts = []
            for off in offs:
                if off == 0:
                    parts.append(v.astype(jnp.bfloat16))
                    continue
                # r[:, j] = v[:, (j + off) mod NBL]; cyclic wraps land only on
                # masked (out-of-sample) positions, so they never leak data.
                r = pltpu.roll(v, (-off) % NBL, axis=1)
                m = (local >= -off) if off < 0 else (local < L - off)
                parts.append(jnp.where(m, r, 0.0).astype(jnp.bfloat16))
            return jnp.concatenate(parts, axis=0)               # (K*C, Nb*L) bf16

        # ---- Conv1 (BN scale pre-folded into w1) + shift + ELU ----
        h = jnp.dot(w1_ref[...], stacked_rhs(x, OFFS1),
                    preferred_element_type=jnp.float32)
        h = _elu(h + t1_ref[...])
        # TODO(synk): Dropout(0.4) is identity at inference; train-time
        # stochastic masking is not implemented.

        # ---- Conv2 + shift + ELU ----
        y = jnp.dot(w2_ref[...], stacked_rhs(h, OFFS2),
                    preferred_element_type=jnp.float32)
        y = _elu(y + t2_ref[...])

        # Residual add (f32 path).
        o_ref[...] = (y + x).astype(o_ref.dtype)

    return kernel


@functools.partial(jax.jit, static_argnames=("block_n",))
def basic_block(x, w1s, w2s, t1, t2, *, block_n=8):
    """x: (N, C, L) f32.  w*s: (C, K*C) bf16 stacked weights with BN scale folded.
    t*: (C, 1) f32 fused conv-bias + BN shift.  Returns (N, C, L) f32."""
    N, C, L = x.shape
    nb = min(block_n, N)
    n_pad = (-N) % nb
    if n_pad:
        x = jnp.concatenate([x, jnp.zeros((n_pad, C, L), x.dtype)], axis=0)
    Np = N + n_pad
    # Lane-dense layout: sample n occupies columns [n*L, (n+1)*L).
    x2d = jnp.transpose(x, (1, 0, 2)).reshape(C, Np * L)
    nbl = nb * L

    out2d = pl.pallas_call(
        _make_kernel(L),
        out_shape=jax.ShapeDtypeStruct((C, Np * L), x.dtype),
        grid_spec=pltpu.PrefetchScalarGridSpec(
            num_scalar_prefetch=0,
            grid=(Np // nb,),
            in_specs=[
                pl.BlockSpec((C, nbl), lambda b: (0, b)),       # x: streamed blocks
                pl.BlockSpec(w1s.shape, lambda b: (0, 0)),      # weights: VMEM resident
                pl.BlockSpec(w2s.shape, lambda b: (0, 0)),
                pl.BlockSpec((C, 1), lambda b: (0, 0)),         # shifts: resident
                pl.BlockSpec((C, 1), lambda b: (0, 0)),
            ],
            out_specs=pl.BlockSpec((C, nbl), lambda b: (0, b)),
        ),
        compiler_params=pltpu.CompilerParams(
            dimension_semantics=("parallel",)),                 # v7x: 2 TCs split the batch blocks
    )(x2d, w1s, w2s, t1, t2)

    out = out2d.reshape(C, Np, L).transpose(1, 0, 2)
    return out[:N]


def fold_params(w, b, g, be, m, v, eps=1e-5):
    """Host-side prep: stack taps, fold BN scale into weights, fuse bias+BN shift."""
    C, _, K = w.shape
    s = g / jnp.sqrt(v + eps)
    # w_stk[co, k*C + ci] = s[co] * w[co, ci, k]   (matches RHS tap stacking order)
    w_stk = (jnp.transpose(w, (0, 2, 1)).reshape(C, K * C)
             * s[:, None]).astype(jnp.bfloat16)
    t = (be + s * (b - m)).reshape(C, 1).astype(jnp.float32)
    return w_stk, t


def basic_block_ref(x, w1, b1, bn1, w2, b2, bn2, eps=1e-5):
    """Pure-JAX reference mirroring the PyTorch eval-mode forward."""
    g1, be1, m1, v1 = bn1
    g2, be2, m2, v2 = bn2

    def conv(z, w, pad, dil):
        return jax.lax.conv_general_dilated(
            z, w, window_strides=(1,), padding=[(pad, pad)],
            rhs_dilation=(dil,), dimension_numbers=("NCH", "OIH", "NCH"),
            precision=jax.lax.Precision.HIGHEST)

    def bn(z, g, be, m, v):
        return (g[None, :, None] * (z - m[None, :, None])
                / jnp.sqrt(v[None, :, None] + eps) + be[None, :, None])

    h = _elu(bn(conv(x, w1, P1, D1) + b1[None, :, None], g1, be1, m1, v1))
    o = _elu(bn(conv(h, w2, P2, D2) + b2[None, :, None], g2, be2, m2, v2))
    return o + x


if __name__ == "__main__":
    N, C, L = 16, 32, 128   # input == output channels (required by the module)
    eps = 1e-5
    key = jax.random.PRNGKey(0)
    ks = jax.random.split(key, 13)
    x = jax.random.normal(ks[0], (N, C, L), jnp.float32)

    # Parameters in PyTorch layouts: conv weight (Cout, Cin, K), per-channel BN stats.
    w1 = 0.1 * jax.random.normal(ks[1], (C, C, K1), jnp.float32)
    b1 = 0.1 * jax.random.normal(ks[2], (C,), jnp.float32)
    g1 = 1.0 + 0.1 * jax.random.normal(ks[3], (C,), jnp.float32)
    be1 = 0.1 * jax.random.normal(ks[4], (C,), jnp.float32)
    m1 = 0.1 * jax.random.normal(ks[5], (C,), jnp.float32)
    v1 = 0.5 + jax.nn.softplus(jax.random.normal(ks[6], (C,), jnp.float32))

    w2 = 0.1 * jax.random.normal(ks[7], (C, C, K2), jnp.float32)
    b2 = 0.1 * jax.random.normal(ks[8], (C,), jnp.float32)
    g2 = 1.0 + 0.1 * jax.random.normal(ks[9], (C,), jnp.float32)
    be2 = 0.1 * jax.random.normal(ks[10], (C,), jnp.float32)
    m2 = 0.1 * jax.random.normal(ks[11], (C,), jnp.float32)
    v2 = 0.5 + jax.nn.softplus(jax.random.normal(ks[12], (C,), jnp.float32))

    w1s, t1 = fold_params(w1, b1, g1, be1, m1, v1, eps)
    w2s, t2 = fold_params(w2, b2, g2, be2, m2, v2, eps)

    # block_n=8 -> grid = (2,): keeps both v7x TensorCores busy.
    out = basic_block(x, w1s, w2s, t1, t2, block_n=8)
    jax.block_until_ready(out)

    ref = basic_block_ref(x, w1, b1, (g1, be1, m1, v1),
                          w2, b2, (g2, be2, m2, v2), eps=eps)
    # bf16 MXU operands with f32 accumulation give ~1e-2 worst-case deviation;
    # a wrong tap / shift / mask would be O(1) off, so 5e-2 still catches bugs.
    np.testing.assert_allclose(np.asarray(out), np.asarray(ref), rtol=5e-2, atol=5e-2)

    print("KERNEL_OK")
</pallas_src>

<mosaic_0001>
module attributes {stable_mosaic.version = 11 : i64} {
  func.func @kernel(%arg0: i32, %arg1: memref<32x1024xf32, #tpu.memory_space<vmem>>, %arg2: memref<32x160xbf16, #tpu.memory_space<vmem>>, %arg3: memref<32x224xbf16, #tpu.memory_space<vmem>>, %arg4: memref<32x1xf32, #tpu.memory_space<vmem>>, %arg5: memref<32x1xf32, #tpu.memory_space<vmem>>, %arg6: memref<32x1024xf32, #tpu.memory_space<vmem>>) attributes {dimension_semantics = [#tpu.dimension_semantics<parallel>], iteration_bounds = array<i64: 2>, scalar_prefetch = 0 : i64, scratch_operands = 0 : i64, tpu.core_type = #tpu.core_type<tc>, window_params = [{transform_indices = @transform_0, window_bounds = array<i64: 32, 1024>}, {pipeline_mode = #tpu.pipeline_mode<synchronous>, transform_indices = @transform_1, window_bounds = array<i64: 32, 160>}, {pipeline_mode = #tpu.pipeline_mode<synchronous>, transform_indices = @transform_2, window_bounds = array<i64: 32, 224>}, {pipeline_mode = #tpu.pipeline_mode<synchronous>, transform_indices = @transform_3, window_bounds = array<i64: 32, 1>}, {pipeline_mode = #tpu.pipeline_mode<synchronous>, transform_indices = @transform_4, window_bounds = array<i64: 32, 1>}, {transform_indices = @transform_5, window_bounds = array<i64: 32, 1024>}]} {
    %c0 = arith.constant 0 : index
    %c0_0 = arith.constant 0 : index
    %0 = vector.load %arg1[%c0, %c0_0] : memref<32x1024xf32, #tpu.memory_space<vmem>>, vector<32x1024xf32>
    %1 = tpu.iota {dimensions = array<i32: 1>} : vector<32x1024xi32>
    %c128_i32 = arith.constant 128 : i32
    %c0_i32 = arith.constant 0 : i32
    %2 = arith.cmpi eq, %c128_i32, %c0_i32 : i32
    %c1_i32 = arith.constant 1 : i32
    %3 = arith.select %2, %c1_i32, %c128_i32 : i32
    %4 = vector.broadcast %3 : i32 to vector<32x1024xi32>
    %5 = arith.remsi %1, %4 : vector<32x1024xi32>
    %c0_i32_1 = arith.constant 0 : i32
    %6 = vector.broadcast %c0_i32_1 : i32 to vector<32x1024xi32>
    %7 = arith.cmpi ne, %5, %6 : vector<32x1024xi32>
    %c0_i32_2 = arith.constant 0 : i32
    %8 = vector.broadcast %c0_i32_2 : i32 to vector<32x1024xi32>
    %9 = arith.cmpi slt, %5, %8 : vector<32x1024xi32>
    %c0_i32_3 = arith.constant 0 : i32
    %10 = arith.cmpi slt, %3, %c0_i32_3 : i32
    %11 = vector.broadcast %10 : i1 to vector<32x1024xi1>
    %12 = vector.broadcast %11 : vector<32x1024xi1> to vector<32x1024xi1>
    %13 = arith.xori %9, %12 : vector<32x1024xi1>
    %14 = arith.andi %13, %7 : vector<32x1024xi1>
    %15 = vector.broadcast %3 : i32 to vector<32x1024xi32>
    %16 = arith.addi %5, %15 : vector<32x1024xi32>
    %17 = arith.select %14, %16, %5 : vector<32x1024xi1>, vector<32x1024xi32>
    %c0_4 = arith.constant 0 : index
    %c0_5 = arith.constant 0 : index
    %18 = vector.load %arg2[%c0_4, %c0_5] : memref<32x160xbf16, #tpu.memory_space<vmem>>, vector<32x160xbf16>
    %c4_i32 = arith.constant 4 : i32
    %19 = tpu.dynamic_rotate %0 by %c4_i32 dim 1 : vector<32x1024xf32>, i32 -> vector<32x1024xf32>
    %c4_i32_6 = arith.constant 4 : i32
    %20 = vector.broadcast %c4_i32_6 : i32 to vector<32x1024xi32>
    %21 = arith.cmpi sge, %17, %20 : vector<32x1024xi32>
    %cst = arith.constant 0.000000e+00 : f32
    %22 = vector.broadcast %cst : f32 to vector<32x1024xf32>
    %23 = arith.select %21, %19, %22 : vector<32x1024xi1>, vector<32x1024xf32>
    %24 = arith.truncf %23 : vector<32x1024xf32> to vector<32x1024xbf16>
    %c2_i32 = arith.constant 2 : i32
    %25 = tpu.dynamic_rotate %0 by %c2_i32 dim 1 : vector<32x1024xf32>, i32 -> vector<32x1024xf32>
    %c2_i32_7 = arith.constant 2 : i32
    %26 = vector.broadcast %c2_i32_7 : i32 to vector<32x1024xi32>
    %27 = arith.cmpi sge, %17, %26 : vector<32x1024xi32>
    %cst_8 = arith.constant 0.000000e+00 : f32
    %28 = vector.broadcast %cst_8 : f32 to vector<32x1024xf32>
    %29 = arith.select %27, %25, %28 : vector<32x1024xi1>, vector<32x1024xf32>
    %30 = arith.truncf %29 : vector<32x1024xf32> to vector<32x1024xbf16>
    %31 = arith.truncf %0 : vector<32x1024xf32> to vector<32x1024xbf16>
    %c1022_i32 = arith.constant 1022 : i32
    %32 = tpu.dynamic_rotate %0 by %c1022_i32 dim 1 : vector<32x1024xf32>, i32 -> vector<32x1024xf32>
    %c126_i32 = arith.constant 126 : i32
    %33 = vector.broadcast %c126_i32 : i32 to vector<32x1024xi32>
    %34 = arith.cmpi slt, %17, %33 : vector<32x1024xi32>
    %cst_9 = arith.constant 0.000000e+00 : f32
    %35 = vector.broadcast %cst_9 : f32 to vector<32x1024xf32>
    %36 = arith.select %34, %32, %35 : vector<32x1024xi1>, vector<32x1024xf32>
    %37 = arith.truncf %36 : vector<32x1024xf32> to vector<32x1024xbf16>
    %c1020_i32 = arith.constant 1020 : i32
    %38 = tpu.dynamic_rotate %0 by %c1020_i32 dim 1 : vector<32x1024xf32>, i32 -> vector<32x1024xf32>
    %c124_i32 = arith.constant 124 : i32
    %39 = vector.broadcast %c124_i32 : i32 to vector<32x1024xi32>
    %40 = arith.cmpi slt, %17, %39 : vector<32x1024xi32>
    %cst_10 = arith.constant 0.000000e+00 : f32
    %41 = vector.broadcast %cst_10 : f32 to vector<32x1024xf32>
    %42 = arith.select %40, %38, %41 : vector<32x1024xi1>, vector<32x1024xf32>
    %43 = arith.truncf %42 : vector<32x1024xf32> to vector<32x1024xbf16>
    %44 = tpu.concatenate %24, %30, %31, %37, %43 in 0 : vector<32x1024xbf16>, vector<32x1024xbf16>, vector<32x1024xbf16>, vector<32x1024xbf16>, vector<32x1024xbf16> -> vector<160x1024xbf16>
    %cst_11 = arith.constant dense<0.000000e+00> : vector<32x1024xf32>
    %45 = tpu.matmul %18, %44, %cst_11 {dimension_numbers = #tpu.dot_dimension_numbers<[1], [0], [0], [1], [0, 0, 1, 1], [], []>} : vector<32x160xbf16>, vector<160x1024xbf16>, vector<32x1024xf32> -> vector<32x1024xf32>
    %c0_12 = arith.constant 0 : index
    %c0_13 = arith.constant 0 : index
    %46 = vector.load %arg4[%c0_12, %c0_13] : memref<32x1xf32, #tpu.memory_space<vmem>>, vector<32x1xf32>
    %47 = vector.broadcast %46 : vector<32x1xf32> to vector<32x1024xf32>
    %48 = arith.addf %45, %47 : vector<32x1024xf32>
    %cst_14 = arith.constant 0.000000e+00 : f32
    %49 = vector.broadcast %cst_14 : f32 to vector<32x1024xf32>
    %50 = arith.cmpf ogt, %48, %49 : vector<32x1024xf32>
    %cst_15 = arith.constant 0.000000e+00 : f32
    %51 = vector.broadcast %cst_15 : f32 to vector<32x1024xf32>
    %52 = arith.minimumf %48, %51 : vector<32x1024xf32>
    %53 = math.exp %52 : vector<32x1024xf32>
    %cst_16 = arith.constant 1.000000e+00 : f32
    %54 = vector.broadcast %cst_16 : f32 to vector<32x1024xf32>
    %55 = arith.subf %53, %54 : vector<32x1024xf32>
    %56 = arith.select %50, %48, %55 : vector<32x1024xi1>, vector<32x1024xf32>
    %c0_17 = arith.constant 0 : index
    %c0_18 = arith.constant 0 : index
    %57 = vector.load %arg3[%c0_17, %c0_18] : memref<32x224xbf16, #tpu.memory_space<vmem>>, vector<32x224xbf16>
    %c6_i32 = arith.constant 6 : i32
    %58 = tpu.dynamic_rotate %56 by %c6_i32 dim 1 : vector<32x1024xf32>, i32 -> vector<32x1024xf32>
    %c6_i32_19 = arith.constant 6 : i32
    %59 = vector.broadcast %c6_i32_19 : i32 to vector<32x1024xi32>
    %60 = arith.cmpi sge, %17, %59 : vector<32x1024xi32>
    %cst_20 = arith.constant 0.000000e+00 : f32
    %61 = vector.broadcast %cst_20 : f32 to vector<32x1024xf32>
    %62 = arith.select %60, %58, %61 : vector<32x1024xi1>, vector<32x1024xf32>
    %63 = arith.truncf %62 : vector<32x1024xf32> to vector<32x1024xbf16>
    %c4_i32_21 = arith.constant 4 : i32
    %64 = tpu.dynamic_rotate %56 by %c4_i32_21 dim 1 : vector<32x1024xf32>, i32 -> vector<32x1024xf32>
    %c4_i32_22 = arith.constant 4 : i32
    %65 = vector.broadcast %c4_i32_22 : i32 to vector<32x1024xi32>
    %66 = arith.cmpi sge, %17, %65 : vector<32x1024xi32>
    %cst_23 = arith.constant 0.000000e+00 : f32
    %67 = vector.broadcast %cst_23 : f32 to vector<32x1024xf32>
    %68 = arith.select %66, %64, %67 : vector<32x1024xi1>, vector<32x1024xf32>
    %69 = arith.truncf %68 : vector<32x1024xf32> to vector<32x1024xbf16>
    %c2_i32_24 = arith.constant 2 : i32
    %70 = tpu.dynamic_rotate %56 by %c2_i32_24 dim 1 : vector<32x1024xf32>, i32 -> vector<32x1024xf32>
    %c2_i32_25 = arith.constant 2 : i32
    %71 = vector.broadcast %c2_i32_25 : i32 to vector<32x1024xi32>
    %72 = arith.cmpi sge, %17, %71 : vector<32x1024xi32>
    %cst_26 = arith.constant 0.000000e+00 : f32
    %73 = vector.broadcast %cst_26 : f32 to vector<32x1024xf32>
    %74 = arith.select %72, %70, %73 : vector<32x1024xi1>, vector<32x1024xf32>
    %75 = arith.truncf %74 : vector<32x1024xf32> to vector<32x1024xbf16>
    %76 = arith.truncf %56 : vector<32x1024xf32> to vector<32x1024xbf16>
    %c1022_i32_27 = arith.constant 1022 : i32
    %77 = tpu.dynamic_rotate %56 by %c1022_i32_27 dim 1 : vector<32x1024xf32>, i32 -> vector<32x1024xf32>
    %c126_i32_28 = arith.constant 126 : i32
    %78 = vector.broadcast %c126_i32_28 : i32 to vector<32x1024xi32>
    %79 = arith.cmpi slt, %17, %78 : vector<32x1024xi32>
    %cst_29 = arith.constant 0.000000e+00 : f32
    %80 = vector.broadcast %cst_29 : f32 to vector<32x1024xf32>
    %81 = arith.select %79, %77, %80 : vector<32x1024xi1>, vector<32x1024xf32>
    %82 = arith.truncf %81 : vector<32x1024xf32> to vector<32x1024xbf16>
    %c1020_i32_30 = arith.constant 1020 : i32
    %83 = tpu.dynamic_rotate %56 by %c1020_i32_30 dim 1 : vector<32x1024xf32>, i32 -> vector<32x1024xf32>
    %c124_i32_31 = arith.constant 124 : i32
    %84 = vector.broadcast %c124_i32_31 : i32 to vector<32x1024xi32>
    %85 = arith.cmpi slt, %17, %84 : vector<32x1024xi32>
    %cst_32 = arith.constant 0.000000e+00 : f32
    %86 = vector.broadcast %cst_32 : f32 to vector<32x1024xf32>
    %87 = arith.select %85, %83, %86 : vector<32x1024xi1>, vector<32x1024xf32>
    %88 = arith.truncf %87 : vector<32x1024xf32> to vector<32x1024xbf16>
    %c1018_i32 = arith.constant 1018 : i32
    %89 = tpu.dynamic_rotate %56 by %c1018_i32 dim 1 : vector<32x1024xf32>, i32 -> vector<32x1024xf32>
    %c122_i32 = arith.constant 122 : i32
    %90 = vector.broadcast %c122_i32 : i32 to vector<32x1024xi32>
    %91 = arith.cmpi slt, %17, %90 : vector<32x1024xi32>
    %cst_33 = arith.constant 0.000000e+00 : f32
    %92 = vector.broadcast %cst_33 : f32 to vector<32x1024xf32>
    %93 = arith.select %91, %89, %92 : vector<32x1024xi1>, vector<32x1024xf32>
    %94 = arith.truncf %93 : vector<32x1024xf32> to vector<32x1024xbf16>
    %95 = tpu.concatenate %63, %69, %75, %76, %82, %88, %94 in 0 : vector<32x1024xbf16>, vector<32x1024xbf16>, vector<32x1024xbf16>, vector<32x1024xbf16>, vector<32x1024xbf16>, vector<32x1024xbf16>, vector<32x1024xbf16> -> vector<224x1024xbf16>
    %cst_34 = arith.constant dense<0.000000e+00> : vector<32x1024xf32>
    %96 = tpu.matmul %57, %95, %cst_34 {dimension_numbers = #tpu.dot_dimension_numbers<[1], [0], [0], [1], [0, 0, 1, 1], [], []>} : vector<32x224xbf16>, vector<224x1024xbf16>, vector<32x1024xf32> -> vector<32x1024xf32>
    %c0_35 = arith.constant 0 : index
    %c0_36 = arith.constant 0 : index
    %97 = vector.load %arg5[%c0_35, %c0_36] : memref<32x1xf32, #tpu.memory_space<vmem>>, vector<32x1xf32>
    %98 = vector.broadcast %97 : vector<32x1xf32> to vector<32x1024xf32>
    %99 = arith.addf %96, %98 : vector<32x1024xf32>
    %cst_37 = arith.constant 0.000000e+00 : f32
    %100 = vector.broadcast %cst_37 : f32 to vector<32x1024xf32>
    %101 = arith.cmpf ogt, %99, %100 : vector<32x1024xf32>
    %cst_38 = arith.constant 0.000000e+00 : f32
    %102 = vector.broadcast %cst_38 : f32 to vector<32x1024xf32>
    %103 = arith.minimumf %99, %102 : vector<32x1024xf32>
    %104 = math.exp %103 : vector<32x1024xf32>
    %cst_39 = arith.constant 1.000000e+00 : f32
    %105 = vector.broadcast %cst_39 : f32 to vector<32x1024xf32>
    %106 = arith.subf %104, %105 : vector<32x1024xf32>
    %107 = arith.select %101, %99, %106 : vector<32x1024xi1>, vector<32x1024xf32>
    %108 = arith.addf %107, %0 : vector<32x1024xf32>
    %c0_40 = arith.constant 0 : index
    %c0_41 = arith.constant 0 : index
    %109 = vector.load %arg6[%c0_40, %c0_41] : memref<32x1024xf32, #tpu.memory_space<vmem>>, vector<32x1024xf32>
    tpu.vector_store %arg6[%c0_40, %c0_41], %108 {strides = array<i32>} : memref<32x1024xf32, #tpu.memory_space<vmem>>, vector<32x1024xf32>,
    return
  }
  func.func @transform_0(%arg0: i32) -> (i32, i32) {
    %c0_i32 = arith.constant 0 : i32
    %c0_i32_0 = arith.constant 0 : i32
    return %c0_i32, %arg0 : i32, i32
  }
  func.func @transform_1(%arg0: i32) -> (i32, i32) {
    %c0_i32 = arith.constant 0 : i32
    %c0_i32_0 = arith.constant 0 : i32
    %c0_i32_1 = arith.constant 0 : i32
    return %c0_i32, %c0_i32_0 : i32, i32
  }
  func.func @transform_2(%arg0: i32) -> (i32, i32) {
    %c0_i32 = arith.constant 0 : i32
    %c0_i32_0 = arith.constant 0 : i32
    %c0_i32_1 = arith.constant 0 : i32
    return %c0_i32, %c0_i32_0 : i32, i32
  }
  func.func @transform_3(%arg0: i32) -> (i32, i32) {
    %c0_i32 = arith.constant 0 : i32
    %c0_i32_0 = arith.constant 0 : i32
    %c0_i32_1 = arith.constant 0 : i32
    return %c0_i32, %c0_i32_0 : i32, i32
  }
  func.func @transform_4(%arg0: i32) -> (i32, i32) {
    %c0_i32 = arith.constant 0 : i32
    %c0_i32_0 = arith.constant 0 : i32
    %c0_i32_1 = arith.constant 0 : i32
    return %c0_i32, %c0_i32_0 : i32, i32
  }
  func.func @transform_5(%arg0: i32) -> (i32, i32) {
    %c0_i32 = arith.constant 0 : i32
    %c0_i32_0 = arith.constant 0 : i32
    return %c0_i32, %arg0 : i32, i32
  }
}

</mosaic_0001>

<bundles_post_ra>
// kernel: basic_block.1
= control target key start
LH: loop header
LB: loop body
LE: loop exit
PB: predicated region body
PF: predicated region fallthrough
CT: control target
= control target key end

     0   :  { %s4751_s18 = smov 0   ;;  %s4753_s19 = smov 0   ;;  %s8454_s0 = inlined_call_operand.vmem [shape: f32[32,2048], index: 0, kind: input, shape index: {}]   ;;  %s8455_s1 = inlined_call_operand.vmem [shape: bf16[32,160], index: 1, kind: input, shape index: {}]   ;;  %s8456_s2 = inlined_call_operand.vmem [shape: bf16[32,224], index: 2, kind: input, shape index: {}]   ;;  %s8457_s3 = inlined_call_operand.vmem [shape: f32[32,1], index: 3, kind: input, shape index: {}]   ;;  %s8458_s4 = inlined_call_operand.vmem [shape: f32[32,1], index: 4, kind: input, shape index: {}]   ;;  %s8459_s5 = inlined_call_operand.vmem [shape: f32[32,2048], index: 5, kind: output, shape index: {}]  }
   0x1   :  { %s4755_s20 = smov 0  }
   0x2 LB: > { %s3090_s21 = sadd.s32 4294967295, %s4712_s20   ;;  %s4768_s22 = sadd.s32 1, %s4712_s20   ;;  %s4712_s20 = sphi %s4755_s20, %s9348_s20   ;;  %s4708_s19 = sphi %s4753_s19, %s9347_s19   ;;  %s4704_s18 = sphi %s4751_s18, %s9346_s18  }
   0x3   : > { %s19_s23 = ssub.s32 %s4712_s20, %s4768_s22  ;;  %s22_s24 = sadd.s32 1, %s4708_s19 }
   0x4   : > { %p20_p0 = scmp.eq.s32.totalorder %s19_s23, 0  ;;  %p29_p1 = scmp.ne.s32.totalorder %s4708_s19, %s4704_s18 }
   0x5   : > { %p30_p2 = scmp.eq.s32.totalorder %s4712_s20, 0  ;;  %p143_p3 = scmp.eq.s32.totalorder %s3090_s21, 1 }
   0x6   : > { %s4779_s25 = scalar_select %p20_p0, %s4708_s19, %s22_s24  }
   0x7   : > { %p31_p4 = por %p30_p2, %p29_p1  ;;  %p4781_p5 = por %p143_p3, %p29_p1 }
   0x8   : > { %p3093_p6 = scmp.ge.s32.totalorder %s4712_s20, 2 }
   0xa   : > { %177 = sbr.rel (%p3093_p6) target bundleno = 37 (0x25), region = 32 }
  0x11   : > { %180 = sbr.rel (!%p31_p4) target bundleno = 37 (0x25), region = 36  ;;  %s182_s27 = sand.u32 (%p31_p4), 1, %s4708_s19  }
  0x12   : > { %s3673_s28 = sshll.u32 (%p31_p4), %s4712_s20, 6  ;;  %s3094_s29 = sshll.u32 (%p31_p4), %s182_s27, 8 }
  0x13   : > { %s4791_s7 = scalar_lea.vmem (%p31_p4), %s8454_s0, %s3673_s28  ;;  %s4796_s8 = scalar_lea.vmem (%p31_p4), [#allocation2], %s3094_s29 }
  0x14   : > { %v200_v0 = vld [vmem:[%s4791_s7] sm:$0xff] (%p31_p4)  ;;  %v202_v1 = vld [vmem:[%s4791_s7 + $0x8] sm:$0xff] (%p31_p4)  ;;  %v204_v2 = vld [vmem:[%s4791_s7 + $0x10] sm:$0xff] (%p31_p4) }
  0x15   : > { %201 = vst [vmem:[%s4796_s8] sm:$0xff] (%p31_p4), %v200_v0  ;;  %203 = vst [vmem:[%s4796_s8 + $0x8] sm:$0xff] (%p31_p4), %v202_v1  ;;  %v206_v3 = vld [vmem:[%s4791_s7 + $0x18] sm:$0xff] (%p31_p4)  ;;  %v208_v4 = vld [vmem:[%s4791_s7 + $0x20] sm:$0xff] (%p31_p4) }
  0x16   : > { %205 = vst [vmem:[%s4796_s8 + $0x10] sm:$0xff] (%p31_p4), %v204_v2  ;;  %v210_v5 = vld [vmem:[%s4791_s7 + $0x28] sm:$0xff] (%p31_p4)  ;;  %207 = vst [vmem:[%s4796_s8 + $0x18] sm:$0xff] (%p31_p4), %v206_v3  ;;  %v212_v6 = vld [vmem:[%s4791_s7 + $0x30] sm:$0xff] (%p31_p4) }
  0x17   : > { %209 = vst [vmem:[%s4796_s8 + $0x20] sm:$0xff] (%p31_p4), %v208_v4  ;;  %211 = vst [vmem:[%s4796_s8 + $0x28] sm:$0xff] (%p31_p4), %v210_v5  ;;  %v214_v7 = vld [vmem:[%s4791_s7 + $0x38] sm:$0xff] (%p31_p4)  ;;  %v216_v8 = vld [vmem:[%s4791_s7 + $0x80] sm:$0xff] (%p31_p4) }
  0x18   : > { %213 = vst [vmem:[%s4796_s8 + $0x30] sm:$0xff] %v212_v6  ;;  %215 = vst [vmem:[%s4796_s8 + $0x38] sm:$0xff] %v214_v7  ;;  %v218_v9 = vld [vmem:[%s4791_s7 + $0x88] sm:$0xff]  ;;  %v220_v10 = vld [vmem:[%s4791_s7 + $0x90] sm:$0xff] }
  0x19   : > { %217 = vst [vmem:[%s4796_s8 + $0x40] sm:$0xff] %v216_v8  ;;  %v222_v11 = vld [vmem:[%s4791_s7 + $0x98] sm:$0xff]  ;;  %219 = vst [vmem:[%s4796_s8 + $0x48] sm:$0xff] %v218_v9  ;;  %v224_v12 = vld [vmem:[%s4791_s7 + $0xa0] sm:$0xff] }
  0x1a   : > { %221 = vst [vmem:[%s4796_s8 + $0x50] sm:$0xff] %v220_v10  ;;  %223 = vst [vmem:[%s4796_s8 + $0x58] sm:$0xff] %v222_v11  ;;  %v226_v13 = vld [vmem:[%s4791_s7 + $0xa8] sm:$0xff]  ;;  %v228_v14 = vld [vmem:[%s4791_s7 + $0xb0] sm:$0xff] }
  0x1b   : > { %225 = vst [vmem:[%s4796_s8 + $0x60] sm:$0xff] %v224_v12  ;;  %227 = vst [vmem:[%s4796_s8 + $0x68] sm:$0xff] %v226_v13  ;;  %v230_v15 = vld [vmem:[%s4791_s7 + $0xb8] sm:$0xff]  ;;  %v232_v16 = vld [vmem:[%s4791_s7 + $0x100] sm:$0xff] }
  0x1c   : > { %229 = vst [vmem:[%s4796_s8 + $0x70] sm:$0xff] %v228_v14  ;;  %v234_v17 = vld [vmem:[%s4791_s7 + $0x108] sm:$0xff]  ;;  %231 = vst [vmem:[%s4796_s8 + $0x78] sm:$0xff] %v230_v15  ;;  %v236_v18 = vld [vmem:[%s4791_s7 + $0x110] sm:$0xff] }
  0x1d   : > { %233 = vst [vmem:[%s4796_s8 + $0x80] sm:$0xff] %v232_v16  ;;  %235 = vst [vmem:[%s4796_s8 + $0x88] sm:$0xff] %v234_v17  ;;  %v238_v19 = vld [vmem:[%s4791_s7 + $0x118] sm:$0xff]  ;;  %v240_v20 = vld [vmem:[%s4791_s7 + $0x120] sm:$0xff] }
  0x1e   : > { %237 = vst [vmem:[%s4796_s8 + $0x90] sm:$0xff] %v236_v18  ;;  %239 = vst [vmem:[%s4796_s8 + $0x98] sm:$0xff] %v238_v19  ;;  %v242_v21 = vld [vmem:[%s4791_s7 + $0x128] sm:$0xff]  ;;  %v244_v22 = vld [vmem:[%s4791_s7 + $0x130] sm:$0xff] }
  0x1f   : > { %241 = vst [vmem:[%s4796_s8 + $0xa0] sm:$0xff] %v240_v20  ;;  %v246_v23 = vld [vmem:[%s4791_s7 + $0x138] sm:$0xff]  ;;  %243 = vst [vmem:[%s4796_s8 + $0xa8] sm:$0xff] %v242_v21  ;;  %v248_v24 = vld [vmem:[%s4791_s7 + $0x180] sm:$0xff] }
  0x20   : > { %245 = vst [vmem:[%s4796_s8 + $0xb0] sm:$0xff] %v244_v22  ;;  %247 = vst [vmem:[%s4796_s8 + $0xb8] sm:$0xff] %v246_v23  ;;  %v250_v25 = vld [vmem:[%s4791_s7 + $0x188] sm:$0xff]  ;;  %v252_v26 = vld [vmem:[%s4791_s7 + $0x190] sm:$0xff] }
  0x21   : > { %249 = vst [vmem:[%s4796_s8 + $0xc0] sm:$0xff] %v248_v24  ;;  %251 = vst [vmem:[%s4796_s8 + $0xc8] sm:$0xff] %v250_v25  ;;  %v254_v27 = vld [vmem:[%s4791_s7 + $0x198] sm:$0xff]  ;;  %v256_v28 = vld [vmem:[%s4791_s7 + $0x1a0] sm:$0xff] }
  0x22   : > { %253 = vst [vmem:[%s4796_s8 + $0xd0] sm:$0xff] %v252_v26  ;;  %v258_v29 = vld [vmem:[%s4791_s7 + $0x1a8] sm:$0xff]  ;;  %255 = vst [vmem:[%s4796_s8 + $0xd8] sm:$0xff] %v254_v27  ;;  %v260_v30 = vld [vmem:[%s4791_s7 + $0x1b0] sm:$0xff] }
  0x23   : > { %257 = vst [vmem:[%s4796_s8 + $0xe0] sm:$0xff] %v256_v28  ;;  %259 = vst [vmem:[%s4796_s8 + $0xe8] sm:$0xff] %v258_v29  ;;  %v262_v31 = vld [vmem:[%s4791_s7 + $0x1b8] sm:$0xff] }
  0x24   : > { %261 = vst [vmem:[%s4796_s8 + $0xf0] sm:$0xff] %v260_v30  ;;  %263 = vst [vmem:[%s4796_s8 + $0xf8] sm:$0xff] %v262_v31 }
  0x25 PF: > { %p3097_p7 = scmp.ge.s32.totalorder %s4712_s20, 1  ;;  %p268_p8 = scmp.lt.s32.totalorder %s4712_s20, 3 }
  0x27   : > { %p269_p9 = pnand %p3097_p7, %p268_p8 }
  0x29   : > { %272 = sbr.rel (%p269_p9) target bundleno = 1112 (0x458), region = 59 }
  0x30   : > { %s275_s9 = sand.u32 1, %s4704_s18   ;;  %s4714_s12 = smov 4   ;;  %v5008_v9 = vld [vmem:[%s8455_s1 + $0x4] ss:$8 sps:$4 sm:$0xff]   ;;  %vm8497_vm0 = vcmask 261120   ;;  %v336_v17 = vlaneseq }
  0x31   : > { %s4862_s10 = sshll.u32 %s275_s9, 8  ;;  %s4715_s13 = smov 2   ;;  %3202 = vmatprep.mubr.msk.bf16.mxu1 %vm8497_vm0, %v5008_v9  ;;  %3152 = vmatprep.mubr.msk.bf16.mxu0 %vm8497_vm0, %v5008_v9 }
  0x32   : > { %s4865_s11 = scalar_lea.vmem [#allocation2], %s4862_s10  ;;  %s4716_s14 = smov 126   ;;  %v5064_v18 = vand.u32 127, %v336_v17 }
  0x33   : > { %v4868_v32 = vld [vmem:[%s4865_s11 + $0x10] sm:$0xff]  ;;  %v4874_v34 = vld [vmem:[%s4865_s11 + $0x8] sm:$0xff]  ;;  %v4882_v37 = vld [vmem:[%s4865_s11 + $0x18] sm:$0xff]  ;;  %s4717_s15 = smov 124   ;;  %s4719_s27 = smov 6  }
  0x34   : > { %v4871_v33 = vld [vmem:[%s4865_s11 + $0x50] sm:$0xff]  ;;  %v4879_v36 = vld [vmem:[%s4865_s11 + $0x48] sm:$0xff]  ;;  %v4885_v38 = vld [vmem:[%s4865_s11 + $0x58] sm:$0xff]  ;;  %v340_v19 = vadd.s32 384, %v5064_v18  ;;  %v339_v20 = vadd.s32 256, %v5064_v18  ;;  %vm8502_vm1 = vcmp.lt.s32.totalorder %v5064_v18, 4 }
  0x35   : > { %v3706_v35 = vpack.i.bf16 %v4871_v33, %v4868_v32  ;;  %v4889_v39 = vpack.i.bf16 %v4879_v36, %v4874_v34  ;;  %v4892_v40 = vld [vmem:[%s4865_s11 + $0x90] sm:$0xff]  ;;  %v3711_v42 = vpack.i.bf16 %v4885_v38, %v4882_v37  ;;  %v4905_v44 = vld [vmem:[%s4865_s11 + $0x98] sm:$0xff]  ;;  %v4911_v46 = vld [vmem:[%s4865_s11 + $0x88] sm:$0xff]  ;;  %vm8503_vm6 = vcmp.lt.s32.totalorder %v5064_v18, 2  ;;  %s4720_s28 = smov 122   ;;  %s8154_s30 = scalar_lea.vmem [#allocation3], %s4862_s10 }
  0x36   : > { %v4895_v41 = vld [vmem:[%s4865_s11 + $0xd0] sm:$0xff]  ;;  %v4908_v45 = vld [vmem:[%s4865_s11 + $0xd8] sm:$0xff]  ;;  %v4914_v47 = vld [vmem:[%s4865_s11 + $0xc8] sm:$0xff]  ;;  %v5072_v22 = vand.u32 127, %v340_v19  ;;  %v5074_v23 = vand.u32 127, %v339_v20  ;;  %vm8491_vm11 = vcmp.lt.s32.totalorder %v5064_v18, 126 }
  0x37   : > { %3707 = vrot.lane.b32.xlu0 %v3706_v35, %s4714_s12  ;;  %3717 = vrot.lane.b32.xlu1 %v4889_v39, %s4714_s12  ;;  %v3721_v43 = vpack.i.bf16 %v4895_v41, %v4892_v40  ;;  %v3726_v48 = vpack.i.bf16 %v4908_v45, %v4905_v44  ;;  %v4922_v49 = vpack.i.bf16 %v4914_v47, %v4911_v46  ;;  %v308_v50 = vld [vmem:[%s4865_s11 + $0x20] sm:$0xff]  ;;  %v4960_v59 = vld [vmem:[%s4865_s11 + $0x38] sm:$0xff]  ;;  %s3674_s10 = sshll.u32 (%p4781_p5), %s3090_s21, 6 }
  0x38   : > { %v316_v51 = vld [vmem:[%s4865_s11 + $0x60] sm:$0xff]  ;;  %v4963_v60 = vld [vmem:[%s4865_s11 + $0x78] sm:$0xff]  ;;  %v4994_v4 = vld [vmem:[%s4865_s11 + $0x30] sm:$0xff]  ;;  %vm545_vm2 = vcmp.ge.s32.totalorder %v5072_v22, 4  ;;  %vm544_vm3 = vcmp.ge.s32.totalorder %v5074_v23, 4  ;;  %vm698_vm7 = vcmp.ge.s32.totalorder %v5072_v22, 2  ;;  %s8381_s26 = scalar_lea.vmem (%p4781_p5), %s8459_s5, %s3674_s10 }
  0x39   : > { %v4937_v52 = vpack.i.bf16 %v316_v51, %v308_v50  ;;  %v324_v53 = vld [vmem:[%s4865_s11 + $0xa0] sm:$0xff]  ;;  %v3811_v61 = vpack.i.bf16 %v4963_v60, %v4960_v59  ;;  %v4983_v1 = vld [vmem:[%s4865_s11 + $0xb8] sm:$0xff]  ;;  %v4997_v5 = vld [vmem:[%s4865_s11 + $0x70] sm:$0xff]  ;;  %vm697_vm9 = vcmp.ge.s32.totalorder %v5074_v23, 2  ;;  %vm867_vm12 = vcmp.lt.s32.totalorder %v5072_v22, 126 }
  0x3a   : > { %v332_v54 = vld [vmem:[%s4865_s11 + $0xe0] sm:$0xff]  ;;  %v4986_v2 = vld [vmem:[%s4865_s11 + $0xf8] sm:$0xff]  ;;  %v3846_v6 = vpack.i.bf16 %v4997_v5, %v4994_v4  ;;  %v309_v7 = vld [vmem:[%s4865_s11 + $0x28] sm:$0xff]  ;;  %vm866_vm13 = vcmp.lt.s32.totalorder %v5074_v23, 126 }
  0x3b   : > { %3712 = vrot.lane.b32.xlu0 %v3711_v42, %s4714_s12  ;;  %3722 = vrot.lane.b32.xlu1 %v3721_v43, %s4714_s12  ;;  %v4945_v55 = vpack.i.bf16 %v332_v54, %v324_v53  ;;  %v4949_v56 = vld [vmem:[%s4865_s11] sm:$0xff]  ;;  %v3836_v3 = vpack.i.bf16 %v4986_v2, %v4983_v1  ;;  %v317_v8 = vld [vmem:[%s4865_s11 + $0x68] sm:$0xff]  ;;  %vm5111_vm4 = vmpackc.low %vm545_vm2, %vm545_vm2 }
  0x3c   : > { %v4952_v57 = vld [vmem:[%s4865_s11 + $0x40] sm:$0xff]  ;;  %v5015_v10 = vpack.i.bf16 %v317_v8, %v309_v7  ;;  %v5019_v11 = vld [vmem:[%s4865_s11 + $0xb0] sm:$0xff]  ;;  %v325_v14 = vld [vmem:[%s4865_s11 + $0xa8] sm:$0xff] }
  0x3d   : > { %v3796_v58 = vpack.i.bf16 %v4952_v57, %v4949_v56  ;;  %v4970_v62 = vld [vmem:[%s4865_s11 + $0x80] sm:$0xff]  ;;  %v5022_v12 = vld [vmem:[%s4865_s11 + $0xf0] sm:$0xff]  ;;  %v333_v15 = vld [vmem:[%s4865_s11 + $0xe8] sm:$0xff] }
  0x3e   : > { %v4973_v63 = vld [vmem:[%s4865_s11 + $0xc0] sm:$0xff]  ;;  %v3866_v13 = vpack.i.bf16 %v5022_v12, %v5019_v11  ;;  %v5032_v16 = vpack.i.bf16 %v333_v15, %v325_v14  ;;  %vm5117_vm5 = vmpackc.low %vm544_vm3, %vm544_vm3  ;;  %vm8496_vm3 = vcmp.lt.s32.totalorder %v5064_v18, 124 }
  0x3f   : > { %3727 = vrot.lane.b32.xlu0 %v3726_v48, %s4714_s12  ;;  %3732 = vrot.lane.b32.xlu1 %v4922_v49, %s4714_s12  ;;  %v3821_v0 = vpack.i.bf16 %v4973_v63, %v4970_v62  ;;  %vm5171_vm8 = vmpackc.low %vm698_vm7, %vm698_vm7 }
  0x40   : > { %vm5188_vm10 = vmpackc.low %vm697_vm9, %vm697_vm9  ;;  %vm542_vm9 = vcmp.ge.s32.totalorder %v5064_v18, 4 }
  0x41   : > { %vm5269_vm14 = vmpackc.low %vm867_vm12, %vm867_vm12  ;;  %vm1020_vm12 = vcmp.lt.s32.totalorder %v5072_v22, 124 }
  0x42   : > { %vm5288_vm15 = vmpackc.low %vm866_vm13, %vm866_vm13 }
  0x43   : > { %3737 = vrot.lane.b32.xlu0 %v3706_v35, %s4715_s13  ;;  %3742 = vrot.lane.b32.xlu1 %v3711_v42, %s4715_s13  ;;  %vm5355_vm13 = vmpackc.low %vm1020_vm12, %vm1020_vm12  ;;  %vm1019_vm12 = vcmp.lt.s32.totalorder %v5074_v23, 124 }
  0x47   : > { %3747 = vrot.lane.b32.xlu0 %v4889_v39, %s4715_s13  ;;  %3752 = vrot.lane.b32.xlu1 %v3721_v43, %s4715_s13 }
  0x4b   : > { %3757 = vrot.lane.b32.xlu0 %v3726_v48, %s4715_s13  ;;  %3762 = vrot.lane.b32.xlu1 %v4922_v49, %s4715_s13 }
  0x4f   : > { %3767 = vrot.lane.b32.xlu0 %v3711_v42, %s4716_s14  ;;  %3772 = vrot.lane.b32.xlu1 %v4937_v52, %s4716_s14 }
  0x53   : > { %3777 = vrot.lane.b32.xlu0 %v3706_v35, %s4716_s14  ;;  %3782 = vrot.lane.b32.xlu1 %v3726_v48, %s4716_s14 }
  0x57   : > { %3787 = vrot.lane.b32.xlu0 %v4945_v55, %s4716_s14  ;;  %3792 = vrot.lane.b32.xlu1 %v3721_v43, %s4716_s14 }
  0x5b   : > { %3797 = vrot.lane.b32.xlu0 %v3796_v58, %s4714_s12  ;;  %3802 = vrot.lane.b32.xlu1 %v3711_v42, %s4717_s15 }
  0x5f   : > { %3807 = vrot.lane.b32.xlu0 %v4937_v52, %s4717_s15  ;;  %3812 = vrot.lane.b32.xlu1 %v3811_v61, %s4714_s12 }
  0x63   : > { %3817 = vrot.lane.b32.xlu0 %v3706_v35, %s4717_s15  ;;  %3822 = vrot.lane.b32.xlu1 %v3821_v0, %s4714_s12 }
  0x67   : > { %3827 = vrot.lane.b32.xlu0 %v3726_v48, %s4717_s15  ;;  %3832 = vrot.lane.b32.xlu1 %v4945_v55, %s4717_s15 }
  0x6b   : > { %3837 = vrot.lane.b32.xlu0 %v3836_v3, %s4714_s12  ;;  %3842 = vrot.lane.b32.xlu1 %v3721_v43, %s4717_s15 }
  0x6f   : > { %3847 = vrot.lane.b32.xlu0 %v3846_v6, %s4714_s12  ;;  %3852 = vrot.lane.b32.xlu1 %v3796_v58, %s4715_s13 }
  0x73   : > { %3857 = vrot.lane.b32.xlu0 %v5015_v10, %s4714_s12  ;;  %3862 = vrot.lane.b32.xlu1 %v3811_v61, %s4715_s13 }
  0x77   : > { %3867 = vrot.lane.b32.xlu0 %v3866_v13, %s4714_s12  ;;  %3872 = vrot.lane.b32.xlu1 %v3821_v0, %s4715_s13 }
  0x7b   : > { %3877 = vrot.lane.b32.xlu0 %v5032_v16, %s4714_s12  ;;  %3882 = vrot.lane.b32.xlu1 %v3836_v3, %s4715_s13 }
  0x7f   : > { %3887 = vrot.lane.b32.xlu0 %v3846_v6, %s4715_s13  ;;  %3892 = vrot.lane.b32.xlu1 %v5015_v10, %s4715_s13 }
  0x83   : > { %3897 = vrot.lane.b32.xlu0 %v3866_v13, %s4715_s13  ;;  %3902 = vrot.lane.b32.xlu1 %v5032_v16, %s4715_s13 }
  0x87   : > { %3907 = vrot.lane.b32.xlu0 %v4889_v39, %s4716_s14  ;;  %3912 = vrot.lane.b32.xlu1 %v3796_v58, %s4716_s14 }
  0x8b   : > { %3917 = vrot.lane.b32.xlu0 %v4922_v49, %s4716_s14  ;;  %3922 = vrot.lane.b32.xlu1 %v3821_v0, %s4716_s14 }
  0x8f   : > { %3927 = vrot.lane.b32.xlu0 %v3811_v61, %s4716_s14  ;;  %3932 = vrot.lane.b32.xlu1 %v4889_v39, %s4717_s15 }
  0x93   : > { %3937 = vrot.lane.b32.xlu0 %v3846_v6, %s4716_s14  ;;  %3942 = vrot.lane.b32.xlu1 %v3796_v58, %s4717_s15 }
  0x97   : > { %3947 = vrot.lane.b32.xlu0 %v3836_v3, %s4716_s14  ;;  %3952 = vrot.lane.b32.xlu1 %v4922_v49, %s4717_s15  ;;  %v8714_v49 = vmov 0 }
  0x98   : > { %v8715_v49 = vsel %vm5111_vm4, 4294967295, %v8714_v49 }
  0x99   : > { %8716 = vst [vmem:[#allocation4_spill] sm:$0xff] %v8715_v49 }
  0x9b   : > { %3957 = vrot.lane.b32.xlu0 %v3866_v13, %s4716_s14  ;;  %3962 = vrot.lane.b32.xlu1 %v3821_v0, %s4717_s15 }
  0x9f   : > { %3967 = vrot.lane.b32.xlu0 %v4937_v52, %s4714_s12  ;;  %3972 = vrot.lane.b32.xlu1 %v3811_v61, %s4717_s15 }
  0xa3   : > { %3977 = vrot.lane.b32.xlu0 %v3846_v6, %s4717_s15  ;;  %3982 = vrot.lane.b32.xlu1 %v4945_v55, %s4714_s12 }
  0xa7   : > { %3987 = vrot.lane.b32.xlu0 %v3836_v3, %s4717_s15  ;;  %3992 = vrot.lane.b32.xlu1 %v3866_v13, %s4717_s15 }
  0xa9   : > { %v3708_v21 = vpop.permute.xlu0 %3707  ;;  %v5076_v26 = vpop.permute.xlu1 %3717 }
  0xaa   : > { %v3710_v24 = vunpack.i.h.bf16 %v3708_v21  ;;  %v3709_v25 = vunpack.i.l.bf16 %v3708_v21  ;;  %v3720_v27 = vunpack.i.h.bf16 %v5076_v26  ;;  %v3719_v28 = vunpack.i.l.bf16 %v5076_v26 }
  0xab   : > { %3997 = vrot.lane.b32.xlu0 %v4937_v52, %s4715_s13  ;;  %4002 = vrot.lane.b32.xlu1 %v4945_v55, %s4715_s13  ;;  %v8717_v52 = vmov 0 }
  0xac   : > { %v530_v39 = vsel %vm8502_vm1, %v3719_v28, %v3709_v25  ;;  %v531_v42 = vsel %vm8502_vm1, %v3720_v27, %v3710_v24  ;;  %v8718_v52 = vsel %vm5117_vm5, 4294967295, %v8717_v52 }
  0xad   : > { %v5085_v29 = vpop.permute.xlu0 %3712  ;;  %v3723_v35 = vpop.permute.xlu1 %3722  ;;  %8719 = vst [vmem:[#allocation5_spill] sm:$0xff] %v8718_v52  ;;  %v3158_v53 = vpack.c.bf16 %v531_v42, %v530_v39  ;;  %v8720_v42 = vmov 0 }
  0xae   : > { %v8471_v30 = vunpack.i.h.bf16 %v5085_v29  ;;  %v8468_v31 = vunpack.i.l.bf16 %v5085_v29  ;;  %v3725_v54 = vunpack.i.h.bf16 %v3723_v35  ;;  %v3724_v55 = vunpack.i.l.bf16 %v3723_v35 }
  0xaf   : > { %4007 = vrot.lane.b32.xlu0 %v5015_v10, %s4716_s14  ;;  %4012 = vrot.lane.b32.xlu1 %v5032_v16, %s4716_s14  ;;  %v8721_v42 = vsel %vm5171_vm8, 4294967295, %v8720_v42 }
  0xb0   : > { %v526_v43 = vsel %vm8502_vm1, %v3709_v25, %v8468_v31  ;;  %v527_v48 = vsel %vm8502_vm1, %v3710_v24, %v8471_v30  ;;  %8722 = vst [vmem:[#allocation6_spill] sm:$0xff] %v8721_v42 }
  0xb1   : > { %v5115_v50 = vpop.permute.xlu0 %3727  ;;  %v3155_v51 = vpack.c.bf16 %v527_v48, %v526_v43  ;;  %v5123_v0 = vpop.permute.xlu1 %3732 }
  0xb2   : > { %v8465_v58 = vunpack.i.h.bf16 %v5115_v50  ;;  %v8464_v61 = vunpack.i.l.bf16 %v5115_v50  ;;  %v3735_v3 = vunpack.i.h.bf16 %v5123_v0  ;;  %v3734_v6 = vunpack.i.l.bf16 %v5123_v0 }
  0xb3   : > { %3156 = vmatprep.subr.msk.bf16.mxu1 %vm5111_vm4, %v3155_v51  ;;  %4017 = vrot.lane.b32.xlu0 %v5015_v10, %s4717_s15 }
  0xb4   : > { %v528_v7 = vsel %vm8502_vm1, %v3724_v55, %v8464_v61  ;;  %v529_v8 = vsel %vm8502_vm1, %v3725_v54, %v8465_v58  ;;  %4022 = vrot.lane.b32.xlu1 %v5032_v16, %s4717_s15  ;;  %3159 = vmatpush1.bf16.msk.msra.mxu1 %vm5117_vm5, %v3158_v53  ;;  %v532_v10 = vsel %vm8502_vm1, %v3734_v6, %v3724_v55 }
  0xb5   : > { %v533_v13 = vsel %vm8502_vm1, %v3735_v3, %v3725_v54  ;;  %v3738_v14 = vpop.permute.xlu0 %3737  ;;  %v3161_v15 = vpack.c.bf16 %v529_v8, %v528_v7  ;;  %v5152_v16 = vpop.permute.xlu1 %3742  ;;  %v8723_v7 = vmov 0 }
  0xb6   : > { %v3740_v17 = vunpack.i.h.bf16 %v3738_v14  ;;  %v3739_v19 = vunpack.i.l.bf16 %v3738_v14  ;;  %v3164_v20 = vpack.c.bf16 %v533_v13, %v532_v10  ;;  %v8462_v21 = vunpack.i.h.bf16 %v5152_v16 }
  0xb7   : > { %v8461_v24 = vunpack.i.l.bf16 %v5152_v16  ;;  %3162 = vmatprep.subr.msk.bf16.mxu1 %vm5111_vm4, %v3161_v15  ;;  %v8724_v7 = vsel %vm5188_vm10, 4294967295, %v8723_v7 }
  0xb8   : > { %3165 = vmatpush1.bf16.msk.msra.mxu1 %vm5117_vm5, %v3164_v20  ;;  %v680_v25 = vsel %vm8503_vm6, %v3740_v17, %v8462_v21  ;;  %8725 = vst [vmem:[#allocation7_spill] sm:$0xff] %v8724_v7 }
  0xb9   : > { %v679_v35 = vsel %vm8503_vm6, %v3739_v19, %v8461_v24  ;;  %v5169_v39 = vpop.permute.xlu0 %3747  ;;  %v3753_v51 = vpop.permute.xlu1 %3752 }
  0xba   : > { %v8483_v43 = vunpack.i.h.bf16 %v5169_v39  ;;  %v8482_v48 = vunpack.i.l.bf16 %v5169_v39  ;;  %v3167_v53 = vpack.c.bf16 %v680_v25, %v679_v35  ;;  %v3755_v13 = vunpack.i.h.bf16 %v3753_v51 }
  0xbb   : > { %v3754_v14 = vunpack.i.l.bf16 %v3753_v51 }
  0xbc   : > { %v684_v54 = vsel %vm8503_vm6, %v8483_v43, %v3740_v17  ;;  %v683_v55 = vsel %vm8503_vm6, %v8482_v48, %v3739_v19  ;;  %3168 = vmatprep.subr.msk.bf16.mxu1 %vm5171_vm8, %v3167_v53 }
  0xbd   : > { %v5192_v8 = vpop.permute.xlu0 %3757  ;;  %v3170_v10 = vpack.c.bf16 %v684_v54, %v683_v55  ;;  %v5196_v20 = vpop.permute.xlu1 %3762 }
  0xbe   : > { %v8463_v15 = vunpack.i.h.bf16 %v5192_v8  ;;  %v8460_v17 = vunpack.i.l.bf16 %v5192_v8  ;;  %v8479_v19 = vunpack.i.h.bf16 %v5196_v20  ;;  %v8478_v25 = vunpack.i.l.bf16 %v5196_v20 }
  0xbf   : > { %3171 = vmatpush1.bf16.msk.msra.mxu1 %vm5188_vm10, %v3170_v10 }
  0xc0   : > { %v681_v35 = vsel %vm8503_vm6, %v3754_v14, %v8460_v17  ;;  %v682_v51 = vsel %vm8503_vm6, %v3755_v13, %v8463_v15  ;;  %v685_v53 = vsel %vm8503_vm6, %v8478_v25, %v3754_v14  ;;  %v686_v54 = vsel %vm8503_vm6, %v8479_v19, %v3755_v13 }
  0xc1   : > { %v3768_v55 = vpop.permute.xlu0 %3767  ;;  %v3173_v10 = vpack.c.bf16 %v682_v51, %v681_v35  ;;  %v754_v17 = vpack.c.bf16 %v4885_v38, %v4882_v37  ;;  %v5220_v24 = vpop.permute.xlu1 %3772  ;;  %v3176_v21 = vpack.c.bf16 %v686_v54, %v685_v53  ;;  %v753_v15 = vpack.c.bf16 %v4871_v33, %v4868_v32 }
  0xc2   : > { %v3770_v14 = vunpack.i.h.bf16 %v3768_v55  ;;  %v3769_v61 = vunpack.i.l.bf16 %v3768_v55  ;;  %v8467_v58 = vunpack.i.h.bf16 %v5220_v24  ;;  %v8466_v13 = vunpack.i.l.bf16 %v5220_v24 }
  0xc3   : > { %3174 = vmatprep.subr.msk.bf16.mxu1 %vm5171_vm8, %v3173_v10  ;;  %v762_v38 = vpack.c.bf16 %v4908_v45, %v4905_v44  ;;  %v338_v35 = vadd.s32 128, %v5064_v18  ;;  %v761_v44 = vpack.c.bf16 %v4895_v41, %v4892_v40 }
  0xc4   : > { %3177 = vmatpush1.bf16.msk.msra.mxu1 %vm5188_vm10, %v3176_v21  ;;  %v845_v21 = vsel %vm8491_vm11, %v3770_v14, %v8467_v58 }
  0xc5   : > { %v5231_v37 = vpop.permute.xlu0 %3777  ;;  %1183 = vmatprep.subr.bf16.mxu1 %v754_v17  ;;  %v3783_v51 = vpop.permute.xlu1 %3782  ;;  %v844_v17 = vsel %vm8491_vm11, %v3769_v61, %v8466_v13  ;;  %v5252_v55 = vand.u32 127, %v338_v35 }
  0xc6   : > { %v8473_v32 = vunpack.i.h.bf16 %v5231_v37  ;;  %v8472_v33 = vunpack.i.l.bf16 %v5231_v37  ;;  %v3785_v45 = vunpack.i.h.bf16 %v3783_v51  ;;  %v3784_v53 = vunpack.i.l.bf16 %v3783_v51 }
  0xc7   : > { %8726 = vst [vmem:[#allocation8_spill] sm:$0xff] %v5252_v55  ;;  %v3179_v13 = vpack.c.bf16 %v845_v21, %v844_v17  ;;  %v8730_v21 = vmov 0  ;;  %vm543_vm2 = vcmp.ge.s32.totalorder %v5252_v55, 4 }
  0xc8   : > { %1184 = vmatpush1.bf16.msra.mxu1 %v753_v15  ;;  %v848_v10 = vsel %vm8491_vm11, %v8472_v33, %v3769_v61  ;;  %v849_v15 = vsel %vm8491_vm11, %v8473_v32, %v3770_v14  ;;  %v8731_v21 = vsel %vm5288_vm15, 4294967295, %v8730_v21  ;;  %v4718_v33 = vmov 0   ;;  %vm5321_vm7 = vmpackc.low %vm543_vm2, %vm543_vm2 }
  0xc9   : > { %v5249_v54 = vpop.permute.xlu0 %3787  ;;  %1185 = vmatprep.subr.bf16.mxu1 %v762_v38  ;;  %v5264_v51 = vpop.permute.xlu1 %3792  ;;  %v8727_v38 = vmov 0  ;;  %8732 = vst [vmem:[#allocation10_spill] sm:$0xff] %v8731_v21  ;;  %v3182_v17 = vpack.c.bf16 %v849_v15, %v848_v10  ;;  %4027 = vset.pattern.permute.xlu1 %v4718_v33  ;;  %vm5372_vm2 = vmpackc.low %vm542_vm9, %vm542_vm9 }
  0xca   : > { %v8470_v40 = vunpack.i.h.bf16 %v5249_v54  ;;  %v8469_v41 = vunpack.i.l.bf16 %v5249_v54  ;;  %v8728_v38 = vsel %vm5269_vm14, 4294967295, %v8727_v38  ;;  %v8477_v61 = vunpack.i.h.bf16 %v5264_v51  ;;  %4026 = vset.pattern.permute.xlu0 %v4718_v33  ;;  %v1075_v33 = vld [vmem:[%s8457_s3 + $0x10] sm:$0xff]  ;;  %vm5391_vm9 = vmpackc.low %vm1019_vm12, %vm1019_vm12 }
  0xcb   : > { %8729 = vst [vmem:[#allocation9_spill] sm:$0xff] %v8728_v38  ;;  %v8474_v35 = vunpack.i.l.bf16 %v5264_v51 }
  0xcc   : > { %v846_v14 = vsel %vm8491_vm11, %v3784_v53, %v8469_v41  ;;  %v847_v58 = vsel %vm8491_vm11, %v3785_v45, %v8470_v40  ;;  %1186 = vmatpush1.bf16.msra.mxu1 %v761_v44  ;;  %v1074_v41 = vld [vmem:[%s8457_s3 + $0x8] sm:$0xff]  ;;  %v1073_v44 = vld [vmem:[%s8457_s3] sm:$0xff]  ;;  %v851_v10 = vsel %vm8491_vm11, %v8477_v61, %v3785_v45 }
  0xcd   : > { %3180 = vmatprep.subr.msk.bf16.mxu1 %vm5269_vm14, %v3179_v13  ;;  %v3798_v31 = vpop.permute.xlu0 %3797  ;;  %v850_v13 = vsel %vm8491_vm11, %v8474_v35, %v3784_v53  ;;  %v3803_v15 = vpop.permute.xlu1 %3802  ;;  %v3185_v32 = vpack.c.bf16 %v847_v58, %v846_v14  ;;  %1084 = vperm.xlu1 %4027, %v1074_v41   ;;  %v8733_v58 = vmov 0  ;;  %vm696_vm11 = vcmp.ge.s32.totalorder %v5252_v55, 2 }
  0xce   : > { %v3800_v40 = vunpack.i.h.bf16 %v3798_v31  ;;  %v3799_v30 = vunpack.i.l.bf16 %v3798_v31  ;;  %1079 = vperm.xlu0 %4026, %v1073_v44   ;;  %v8734_v58 = vsel %vm5321_vm7, 4294967295, %v8733_v58  ;;  %v3188_v45 = vpack.c.bf16 %v851_v10, %v850_v13 }
  0xcf   : > { %8735 = vst [vmem:[#allocation11_spill] sm:$0xff] %v8734_v58  ;;  %v3805_v41 = vunpack.i.h.bf16 %v3803_v15  ;;  %v3804_v14 = vunpack.i.l.bf16 %v3803_v15 }
  0xd0   : > { %3183 = vmatpush1.bf16.msk.msra.mxu1 %vm5288_vm15, %v3182_v17  ;;  %v534_v53 = vsel %vm8502_vm1, %v3799_v30, %v3719_v28  ;;  %v535_v31 = vsel %vm8502_vm1, %v3800_v40, %v3720_v27  ;;  %v1076_v27 = vld [vmem:[%s8457_s3 + $0x18] sm:$0xff] }
  0xd1   : > { %3186 = vmatprep.subr.msk.bf16.mxu1 %vm5269_vm14, %v3185_v32  ;;  %v5330_v28 = vpop.permute.xlu0 %3807  ;;  %v3105_v26 = vpack.c.bf16 %v535_v31, %v534_v53  ;;  %v5337_v17 = vpop.permute.xlu1 %3812  ;;  %1089 = vperm.xlu1 %4027, %v1075_v33   ;;  %v8736_v53 = vmov 0 }
  0xd2   : > { %v8475_v44 = vunpack.i.h.bf16 %v5330_v28  ;;  %v8476_v32 = vunpack.i.l.bf16 %v5330_v28  ;;  %v8488_v35 = vunpack.i.h.bf16 %v5337_v17  ;;  %v8486_v13 = vunpack.i.l.bf16 %v5337_v17  ;;  %1094 = vperm.xlu0 %4026, %v1076_v27  }
  0xd3   : > { %3106 = vmatprep.subr.msk.bf16.mxu0 %vm5321_vm7, %v3105_v26  ;;  %v8737_v53 = vsel %vm5355_vm13, 4294967295, %v8736_v53 }
  0xd4   : > { %v998_v10 = vsel %vm8496_vm3, %v3805_v41, %v8475_v44  ;;  %v997_v15 = vsel %vm8496_vm3, %v3804_v14, %v8476_v32  ;;  %3189 = vmatpush1.bf16.msk.msra.mxu1 %vm5288_vm15, %v3188_v45  ;;  %8738 = vst [vmem:[#allocation12_spill] sm:$0xff] %v8737_v53  ;;  %v538_v33 = vsel %vm8502_vm1, %v8486_v13, %v3799_v30  ;;  %v8739_v45 = vmov 0 }
  0xd5   : > { %v5359_v31 = vpop.permute.xlu0 %3817  ;;  %v539_v26 = vsel %vm8502_vm1, %v8488_v35, %v3800_v40  ;;  %v8740_v45 = vsel %vm5372_vm2, 4294967295, %v8739_v45  ;;  %v3191_v27 = vpack.c.bf16 %v998_v10, %v997_v15  ;;  %v3823_v44 = vpop.permute.xlu1 %3822  ;;  %v8742_v15 = vmov 0 }
  0xd6   : > { %8741 = vst [vmem:[#allocation13_spill] sm:$0xff] %v8740_v45  ;;  %v8480_v32 = vunpack.i.h.bf16 %v5359_v31  ;;  %v8481_v30 = vunpack.i.l.bf16 %v5359_v31  ;;  %v3108_v61 = vpack.c.bf16 %v539_v26, %v538_v33  ;;  %v3825_v25 = vunpack.i.h.bf16 %v3823_v44 }
  0xd7   : > { %v3824_v19 = vunpack.i.l.bf16 %v3823_v44  ;;  %3192 = vmatprep.subr.msk.bf16.mxu1 %vm5355_vm13, %v3191_v27  ;;  %v8743_v15 = vsel %vm5391_vm9, 4294967295, %v8742_v15  ;;  %v344_v44 = vadd.s32 896, %v5064_v18  ;;  %vm8762_vm15 = vcmp.lt.s32.totalorder %v5064_v18, 2 }
  0xd8   : > { %v1002_v40 = vsel %vm8496_vm3, %v8480_v32, %v3805_v41  ;;  %v1001_v10 = vsel %vm8496_vm3, %v8481_v30, %v3804_v14  ;;  %3109 = vmatpush1.bf16.msk.msra.mxu0 %vm5372_vm2, %v3108_v61  ;;  %8744 = vst [vmem:[#allocation14_spill] sm:$0xff] %v8743_v15  ;;  %v537_v41 = vsel %vm8502_vm1, %v3825_v25, %v3735_v3 }
  0xd9   : > { %v536_v33 = vsel %vm8502_vm1, %v3824_v19, %v3734_v6  ;;  %v3828_v14 = vpop.permute.xlu0 %3827  ;;  %v3194_v26 = vpack.c.bf16 %v1002_v40, %v1001_v10  ;;  %v5404_v27 = vpop.permute.xlu1 %3832  ;;  %v5412_v0 = vand.u32 127, %v344_v44  ;;  %v343_v10 = vadd.s32 768, %v5064_v18 }
  0xda   : > { %v3830_v61 = vunpack.i.h.bf16 %v3828_v14  ;;  %v3829_v32 = vunpack.i.l.bf16 %v3828_v14  ;;  %v3111_v30 = vpack.c.bf16 %v537_v41, %v536_v33  ;;  %v8485_v48 = vunpack.i.h.bf16 %v5404_v27 }
  0xdb   : > { %v8484_v43 = vunpack.i.l.bf16 %v5404_v27  ;;  %3195 = vmatpush1.bf16.msk.msra.mxu1 %vm5391_vm9, %v3194_v26  ;;  %8745 = vst [vmem:[#allocation15_spill] sm:$0xff] %v5412_v0  ;;  %vm549_vm12 = vcmp.ge.s32.totalorder %v5412_v0, 4 }
  0xdc   : > { %3112 = vmatprep.subr.msk.bf16.mxu0 %vm5321_vm7, %v3111_v30  ;;  %v1000_v3 = vsel %vm8496_vm3, %v3830_v61, %v8485_v48 }
  0xdd   : > { %v999_v6 = vsel %vm8496_vm3, %v3829_v32, %v8484_v43  ;;  %v5422_v40 = vpop.permute.xlu0 %3837  ;;  %v5425_v33 = vpop.permute.xlu1 %3842 }
  0xde   : > { %v8487_v30 = vunpack.i.h.bf16 %v5422_v40  ;;  %v3839_v44 = vunpack.i.l.bf16 %v5422_v40  ;;  %v3197_v41 = vpack.c.bf16 %v1000_v3, %v999_v6  ;;  %v8499_v14 = vunpack.i.h.bf16 %v5425_v33 }
  0xdf   : > { %v8498_v26 = vunpack.i.l.bf16 %v5425_v33 }
  0xe0   : > { %v541_v43 = vsel %vm8502_vm1, %v8487_v30, %v3825_v25  ;;  %v540_v48 = vsel %vm8502_vm1, %v3839_v44, %v3824_v19  ;;  %3198 = vmatprep.subr.msk.bf16.mxu1 %vm5355_vm13, %v3197_v41  ;;  %v1004_v6 = vsel %vm8496_vm3, %v8499_v14, %v3830_v61  ;;  %v5448_v30 = vand.u32 127, %v343_v10 }
  0xe1   : > { %v1003_v3 = vsel %vm8496_vm3, %v8498_v26, %v3829_v32  ;;  %v3848_v13 = vpop.permute.xlu0 %3847  ;;  %v3114_v25 = vpack.c.bf16 %v541_v43, %v540_v48  ;;  %v3853_v19 = vpop.permute.xlu1 %3852  ;;  %v5456_v32 = vld [vmem:[%s8455_s1] ss:$8 sps:$4 sm:$0xff]   ;;  %v8747_v43 = vunpack.i.h.bf16 %v5337_v17  ;;  %vm5471_vm3 = vmpackc.low %vm549_vm12, %vm549_vm12  ;;  %v8749_v10 = vmov 0 }
  0xe2   : > { %8746 = vst [vmem:[#allocation16_spill] sm:$0xff] %v5448_v30  ;;  %v3850_v35 = vunpack.i.h.bf16 %v3848_v13  ;;  %v3849_v53 = vunpack.i.l.bf16 %v3848_v13  ;;  %v3200_v41 = vpack.c.bf16 %v1004_v6, %v1003_v3  ;;  %v3855_v21 = vunpack.i.h.bf16 %v3853_v19  ;;  %v5478_v3 = vld [vmem:[%s8455_s1 + $0x14] ss:$8 sps:$4 sm:$0xff]   ;;  %vm5490_vm12 = vmpackc.low %vm696_vm11, %vm696_vm11 }
  0xe3   : > { %v3854_v38 = vunpack.i.l.bf16 %v3853_v19  ;;  %3115 = vmatpush1.bf16.msk.msra.mxu0 %vm5372_vm2, %v3114_v25  ;;  %v8748_v13 = vunpack.i.l.bf16 %v5337_v17  ;;  %v8750_v10 = vsel %vm5471_vm3, 4294967295, %v8749_v10  ;;  %v8752_v17 = vunpack.i.h.bf16 %v5169_v39 }
  0xe4   : > { %v511_v48 = vsel %vm8502_vm1, %v3850_v35, %v8747_v43  ;;  %3201 = vmatpush1.bf16.msk.msra.mxu1 %vm5391_vm9, %v3200_v41  ;;  %8751 = vst [vmem:[#allocation17_spill] sm:$0xff] %v8750_v10  ;;  %v8753_v25 = vunpack.i.l.bf16 %v5169_v39  ;;  %vm548_vm0 = vcmp.ge.s32.totalorder %v5448_v30, 4  ;;  %vm8756_vm11 = vcmp.lt.s32.totalorder %v5064_v18, 4 }
  0xe5   : > { %v510_v61 = vsel %vm8502_vm1, %v3849_v53, %v8748_v13  ;;  %v688_v6 = vsel %vm8503_vm6, %v3855_v21, %v8752_v17  ;;  %v5488_v41 = vpop.permute.xlu0 %3857  ;;  %v5495_v26 = vpop.permute.xlu1 %3862  ;;  %vm695_vm1 = vcmp.ge.s32.totalorder %v5064_v18, 2  ;;  %vm5515_vm9 = vmpackc.low %vm548_vm0, %vm548_vm0  ;;  %vm8761_vm13 = vcmask 261120  }
  0xe6   : > { %v687_v19 = vsel %vm8503_vm6, %v3854_v38, %v8753_v25  ;;  %v3255_v13 = vpack.c.bf16 %v511_v48, %v510_v61  ;;  %v8512_v14 = vunpack.i.h.bf16 %v5488_v41  ;;  %v8513_v17 = vunpack.i.l.bf16 %v5488_v41  ;;  %vm8757_vm6 = vmmov %vm8756_vm11 }
  0xe7   : > { %v3117_v15 = vpack.c.bf16 %v688_v6, %v687_v19  ;;  %v3865_v39 = vunpack.i.h.bf16 %v5495_v26  ;;  %v3864_v25 = vunpack.i.l.bf16 %v5495_v26  ;;  %1208 = vmatmul.mubr.bf16.vlgmr.msra.gmra.mrb[0].mxu1 %v5456_v32  ;;  %v8758_v26 = vmov 0  ;;  %vm5525_vm2 = vmpackc.low %vm695_vm1, %vm695_vm1 }
  0xe8   : > { %3256 = vmatprep.subr.msk.bf16.mxu1 %vm5471_vm3, %v3255_v13  ;;  %v514_v48 = vsel %vm8756_vm11, %v8513_v17, %v3849_v53  ;;  %v515_v61 = vsel %vm8757_vm6, %v8512_v14, %v3850_v35  ;;  %v8759_v26 = vsel %vm5515_vm9, 4294967295, %v8758_v26  ;;  %3203 = vmatprep.mubr.msk.bf16.mxu1 %vm8761_vm13, %v5478_v3  ;;  %vm8763_vm11 = vmmov %vm8762_vm15  ;;  %v8764_v35 = vmov 0 }
  0xe9   : > { %3118 = vmatprep.subr.msk.bf16.mxu0 %vm5490_vm12, %v3117_v15  ;;  %8760 = vst [vmem:[#allocation18_spill] sm:$0xff] %v8759_v26  ;;  %v691_v6 = vsel %vm8762_vm15, %v3864_v25, %v3854_v38  ;;  %v692_v53 = vsel %vm8763_vm11, %v3865_v39, %v3855_v21  ;;  %v3258_v19 = vpack.c.bf16 %v515_v61, %v514_v48  ;;  %v3868_v13 = vpop.permute.xlu0 %3867  ;;  %v8765_v35 = vsel %vm5525_vm2, 4294967295, %v8764_v35  ;;  %v3873_v15 = vpop.permute.xlu1 %3872  ;;  %v5534_v38 = vld [vmem:[%s8455_s1 + $0x10] ss:$8 sps:$4 sm:$0xff]   ;;  %vm8766_vm0 = vmmov %vm8757_vm6 }
  0xea   : > { %v3870_v14 = vunpack.i.h.bf16 %v3868_v13  ;;  %v3869_v17 = vunpack.i.l.bf16 %v3868_v13  ;;  %v3120_v45 = vpack.c.bf16 %v692_v53, %v691_v6  ;;  %v3875_v58 = vunpack.i.h.bf16 %v3873_v15  ;;  %vm8768_vm1 = vmmov %vm8766_vm0 }
  0xeb   : > { %v3874_v7 = vunpack.i.l.bf16 %v3873_v15  ;;  %3259 = vmatpush1.bf16.msk.msra.mxu1 %vm5515_vm9, %v3258_v19  ;;  %v8767_v48 = vunpack.i.h.bf16 %v5422_v40  ;;  %v8769_v6 = vunpack.i.h.bf16 %v5196_v20  ;;  %vm8770_vm6 = vmmov %vm8763_vm11  ;;  %v8771_v19 = vunpack.i.l.bf16 %v5196_v20 }
  0xec   : > { %v512_v21 = vsel %vm8766_vm0, %v3869_v17, %v3839_v44  ;;  %3121 = vmatpush1.bf16.msk.msra.mxu0 %vm5525_vm2, %v3120_v45  ;;  %vm8772_vm15 = vmmov %vm8770_vm6 }
  0xed   : > { %v513_v61 = vsel %vm8768_vm1, %v3870_v14, %v8767_v48  ;;  %v690_v53 = vsel %vm8770_vm6, %v3875_v58, %v8769_v6  ;;  %v689_v13 = vsel %vm8772_vm15, %v3874_v7, %v8771_v19  ;;  %v5552_v15 = vpop.permute.xlu0 %3877  ;;  %v3883_v40 = vpop.permute.xlu1 %3882  ;;  %vm8773_vm13 = vmmov %vm8766_vm0  ;;  %vm702_vm15 = vcmp.ge.s32.totalorder %v5412_v0, 2 }
  0xee   : > { %v3261_v44 = vpack.c.bf16 %v513_v61, %v512_v21  ;;  %v3880_v42 = vunpack.i.h.bf16 %v5552_v15  ;;  %v3879_v48 = vunpack.i.l.bf16 %v5552_v15  ;;  %v3123_v52 = vpack.c.bf16 %v690_v53, %v689_v13  ;;  %vm8774_vm11 = vmmov %vm8766_vm0 }
  0xef   : > { %v3885_v45 = vunpack.i.h.bf16 %v3883_v40  ;;  %v3884_v49 = vunpack.i.l.bf16 %v3883_v40  ;;  %1218 = vmatmul.mubr.bf16.gmra.mrb[4].mxu1 %v5534_v38  ;;  %v752_v61 = vpack.c.bf16 %v4879_v36, %v4874_v34  ;;  %vm8775_vm0 = vcmask 261120   ;;  %vm8776_vm1 = vmmov %vm8770_vm6 }
  0xf0   : > { %3262 = vmatprep.subr.msk.bf16.mxu1 %vm5471_vm3, %v3261_v44  ;;  %v516_v20 = vsel %vm8773_vm13, %v3879_v48, %v3869_v17  ;;  %v517_v21 = vsel %vm8774_vm11, %v3880_v42, %v3870_v14  ;;  %3124 = vmatprep.subr.msk.bf16.mxu0 %vm5490_vm12, %v3123_v52  ;;  %vm8777_vm6 = vmmov %vm8776_vm1  ;;  %vm701_vm13 = vcmp.ge.s32.totalorder %v5448_v30, 2  ;;  %v751_v40 = vpack.c.bf16 %v4952_v57, %v4949_v56 }
  0xf1   : > { %3302 = vmatprep.mubr.msk.bf16.mxu1 %vm8775_vm0, %v5008_v9  ;;  %v693_v6 = vsel %vm8776_vm1, %v3884_v49, %v3874_v7  ;;  %v694_v17 = vsel %vm8777_vm6, %v3885_v45, %v3875_v58  ;;  %v3264_v53 = vpack.c.bf16 %v517_v21, %v516_v20  ;;  %v3888_v19 = vpop.permute.xlu0 %3887  ;;  %v5578_v14 = vpop.permute.xlu1 %3892  ;;  %vm8778_vm11 = vmmov %vm8776_vm1  ;;  %v8780_v58 = vmov 0 }
  0xf2   : > { %v3890_v13 = vunpack.i.h.bf16 %v3888_v19  ;;  %v3889_v52 = vunpack.i.l.bf16 %v3888_v19  ;;  %v3126_v44 = vpack.c.bf16 %v694_v17, %v693_v6  ;;  %v3895_v34 = vunpack.i.h.bf16 %v5578_v14  ;;  %vm8779_vm0 = vmmov %vm8776_vm1 }
  0xf3   : > { %v3894_v36 = vunpack.i.l.bf16 %v5578_v14  ;;  %3265 = vmatpush1.bf16.msk.msra.mxu1 %vm5515_vm9, %v3264_v53  ;;  %vm5591_vm1 = vmpackc.low %vm702_vm15, %vm702_vm15  ;;  %v8785_v6 = vmov 0  ;;  %v760_v56 = vpack.c.bf16 %v4914_v47, %v4911_v46  ;;  %v759_v46 = vpack.c.bf16 %v4973_v63, %v4970_v62 }
  0xf4   : > { %v664_v9 = vsel %vm8778_vm11, %v3890_v13, %v3865_v39  ;;  %v663_v7 = vsel %vm8779_vm0, %v3889_v52, %v3864_v25  ;;  %3127 = vmatpush1.bf16.msk.msra.mxu0 %vm5525_vm2, %v3126_v44  ;;  %v8781_v58 = vsel %vm5591_vm1, 4294967295, %v8780_v58  ;;  %vm8783_vm6 = vmmov %vm8779_vm0  ;;  %vm8813_vm3 = vcmp.lt.s32.totalorder %v5064_v18, 124 }
  0xf5   : > { %8782 = vst [vmem:[#allocation19_spill] sm:$0xff] %v8781_v58  ;;  %v668_v20 = vsel %vm8783_vm6, %v3895_v34, %v3890_v13  ;;  %vm8784_vm11 = vmmov %vm8779_vm0  ;;  %v3898_v25 = vpop.permute.xlu0 %3897  ;;  %1130 = vmatprep.subr.bf16.mxu0 %v752_v61  ;;  %v3267_v21 = vpack.c.bf16 %v664_v9, %v663_v7  ;;  %v5611_v17 = vpop.permute.xlu1 %3902  ;;  %vm865_vm6 = vcmp.lt.s32.totalorder %v5252_v55, 126  ;;  %v758_v7 = vpack.c.bf16 %v4963_v60, %v4960_v59 }
  0xf6   : > { %v667_v39 = vsel %vm8784_vm11, %v3894_v36, %v3889_v52  ;;  %vm5605_vm15 = vmpackc.low %vm701_vm13, %vm701_vm13  ;;  %v3900_v53 = vunpack.i.h.bf16 %v3898_v25  ;;  %v3899_v19 = vunpack.i.l.bf16 %v3898_v25  ;;  %v3905_v13 = vunpack.i.h.bf16 %v5611_v17 }
  0xf7   : > { %v8786_v6 = vsel %vm5605_vm15, 4294967295, %v8785_v6  ;;  %v3270_v57 = vpack.c.bf16 %v668_v20, %v667_v39  ;;  %v3904_v44 = vunpack.i.l.bf16 %v5611_v17  ;;  %3268 = vmatprep.subr.msk.bf16.mxu1 %vm5591_vm1, %v3267_v21  ;;  %vm8788_vm13 = vmmov %vm8779_vm0  ;;  %v8791_v21 = vunpack.i.h.bf16 %v5231_v37 }
  0xf8   : > { %8787 = vst [vmem:[#allocation20_spill] sm:$0xff] %v8786_v6  ;;  %v666_v61 = vsel %vm8788_vm13, %v3900_v53, %v3885_v45  ;;  %v665_v52 = vsel %vm8779_vm0, %v3899_v19, %v3884_v49  ;;  %1131 = vmatpush1.bf16.msra.mxu0 %v751_v40  ;;  %vm8789_vm11 = vmmov %vm8779_vm0  ;;  %v8795_v59 = vmov 0  ;;  %v757_v60 = vpack.c.bf16 %v4997_v5, %v4994_v4 }
  0xf9   : > { %3271 = vmatpush1.bf16.msk.msra.mxu1 %vm5605_vm15, %v3270_v57  ;;  %v670_v47 = vsel %vm8789_vm11, %v3905_v13, %v3900_v53  ;;  %vm8790_vm13 = vmmov %vm8779_vm0  ;;  %v3908_v49 = vpop.permute.xlu0 %3907  ;;  %1132 = vmatprep.subr.bf16.mxu0 %v760_v56  ;;  %v3273_v9 = vpack.c.bf16 %v666_v61, %v665_v52  ;;  %v3913_v62 = vpop.permute.xlu1 %3912  ;;  %vm8792_vm0 = vcmp.lt.s32.totalorder %v5064_v18, 126  ;;  %v8793_v56 = vunpack.i.l.bf16 %v5231_v37 }
  0xfa   : > { %v669_v45 = vsel %vm8790_vm13, %v3904_v44, %v3899_v19  ;;  %v3910_v63 = vunpack.i.h.bf16 %v3908_v49  ;;  %v3909_v20 = vunpack.i.l.bf16 %v3908_v49  ;;  %v3915_v39 = vunpack.i.h.bf16 %v3913_v62  ;;  %vm8794_vm11 = vmmov %vm8792_vm0 }
  0xfb   : > { %v3276_v40 = vpack.c.bf16 %v670_v47, %v669_v45  ;;  %v3914_v25 = vunpack.i.l.bf16 %v3913_v62  ;;  %3274 = vmatprep.subr.msk.bf16.mxu1 %vm5591_vm1, %v3273_v9  ;;  %vm5651_vm13 = vmpackc.low %vm865_vm6, %vm865_vm6  ;;  %v766_v47 = vpack.c.bf16 %v4986_v2, %v4983_v1  ;;  %v8803_v62 = vunpack.i.h.bf16 %v5264_v51 }
  0xfc   : > { %v853_v57 = vsel %vm8792_vm0, %v3910_v63, %v8791_v21  ;;  %v852_v53 = vsel %vm8794_vm11, %v3909_v20, %v8793_v56  ;;  %1133 = vmatpush1.bf16.msra.mxu0 %v759_v46  ;;  %v8796_v59 = vsel %vm5651_vm13, 4294967295, %v8795_v59  ;;  %v857_v37 = vsel %vm8792_vm0, %v3915_v39, %v3910_v63  ;;  %vm8798_vm1 = vmmov %vm8792_vm0 }
  0xfd   : > { %3277 = vmatpush1.bf16.msk.msra.mxu1 %vm5605_vm15, %v3276_v40  ;;  %8797 = vst [vmem:[#allocation21_spill] sm:$0xff] %v8796_v59  ;;  %v856_v19 = vsel %vm8798_vm1, %v3914_v25, %v3909_v20  ;;  %v3918_v61 = vpop.permute.xlu0 %3917  ;;  %v3129_v52 = vpack.c.bf16 %v853_v57, %v852_v53  ;;  %vm8799_vm11 = vmmov %vm8792_vm0  ;;  %v8800_v46 = vmov 0  ;;  %v5670_v4 = vpop.permute.xlu1 %3922  ;;  %v8805_v63 = vunpack.i.l.bf16 %v5264_v51 }
  0xfe   : > { %vm5664_vm15 = vmpackc.low %vm8799_vm11, %vm8799_vm11  ;;  %1289 = vmatprep.subr.bf16.mxu1 %v758_v7  ;;  %v3920_v5 = vunpack.i.h.bf16 %v3918_v61  ;;  %v3919_v45 = vunpack.i.l.bf16 %v3918_v61  ;;  %v3132_v49 = vpack.c.bf16 %v857_v37, %v856_v19  ;;  %v3925_v9 = vunpack.i.h.bf16 %v5670_v4 }
  0xff   : > { %v8801_v46 = vsel %vm5664_vm15, 4294967295, %v8800_v46  ;;  %v3924_v40 = vunpack.i.l.bf16 %v5670_v4  ;;  %3130 = vmatprep.subr.msk.bf16.mxu0 %vm5651_vm13, %v3129_v52  ;;  %vm8804_vm1 = vmmov %vm8792_vm0  ;;  %v765_v2 = vpack.c.bf16 %v5022_v12, %v5019_v11  ;;  %v8809_v52 = vmov 0 }
 0x100   : > { %8802 = vst [vmem:[#allocation22_spill] sm:$0xff] %v8801_v46  ;;  %v855_v7 = vsel %vm8804_vm1, %v3920_v5, %v8803_v62  ;;  %vm8806_vm6 = vmmov %vm8792_vm0  ;;  %3133 = vmatpush1.bf16.msk.msra.mxu0 %vm5664_vm15, %v3132_v49  ;;  %v859_v20 = vsel %vm8792_vm0, %v3925_v9, %v3920_v5  ;;  %vm871_vm1 = vcmp.lt.s32.totalorder %v5412_v0, 126  ;;  %v8814_v5 = vunpack.i.h.bf16 %v5359_v31 }
 0x101   : > { %v854_v1 = vsel %vm8806_vm6, %v3919_v45, %v8805_v63  ;;  %1290 = vmatpush1.bf16.msra.mxu1 %v757_v60  ;;  %vm8807_vm11 = vmmov %vm8792_vm0  ;;  %v3928_v57 = vpop.permute.xlu0 %3927  ;;  %v3933_v51 = vpop.permute.xlu1 %3932  ;;  %vm1018_vm6 = vcmp.lt.s32.totalorder %v5252_v55, 124  ;;  %v8889_v17 = vunpack.i.h.bf16 %v5192_v8 }
 0x102   : > { %v858_v21 = vsel %vm8807_vm11, %v3924_v40, %v3919_v45  ;;  %v3135_v56 = vpack.c.bf16 %v855_v7, %v854_v1  ;;  %1291 = vmatprep.subr.bf16.mxu1 %v766_v47  ;;  %v3930_v53 = vunpack.i.h.bf16 %v3928_v57  ;;  %v3929_v37 = vunpack.i.l.bf16 %v3928_v57  ;;  %vm8808_vm11 = vmmov %vm8792_vm0 }
 0x103   : > { %v3138_v19 = vpack.c.bf16 %v859_v20, %v858_v21  ;;  %v3935_v60 = vunpack.i.h.bf16 %v3933_v51  ;;  %v3934_v61 = vunpack.i.l.bf16 %v3933_v51  ;;  %vm5702_vm9 = vmpackc.low %vm871_vm1, %vm871_vm1  ;;  %v8812_v47 = vunpack.i.l.bf16 %v5359_v31 }
 0x104   : > { %3136 = vmatprep.subr.msk.bf16.mxu0 %vm5651_vm13, %v3135_v56  ;;  %v861_v11 = vsel %vm8792_vm0, %v3930_v53, %v3915_v39  ;;  %v860_v12 = vsel %vm8808_vm11, %v3929_v37, %v3914_v25  ;;  %v8810_v52 = vsel %vm5702_vm9, 4294967295, %v8809_v52  ;;  %vm8815_vm0 = vmmov %vm8813_vm3  ;;  %v8816_v25 = vmov 0 }
 0x105   : > { %3139 = vmatpush1.bf16.msk.msra.mxu0 %vm5664_vm15, %v3138_v19  ;;  %1292 = vmatpush1.bf16.msra.mxu1 %v765_v2  ;;  %8811 = vst [vmem:[#allocation23_spill] sm:$0xff] %v8810_v52  ;;  %v1005_v4 = vsel %vm8813_vm3, %v3934_v61, %v8812_v47  ;;  %v1006_v39 = vsel %vm8815_vm0, %v3935_v60, %v8814_v5  ;;  %v5714_v45 = vpop.permute.xlu0 %3937  ;;  %vm5716_vm11 = vmpackc.low %vm1018_vm6, %vm1018_vm6  ;;  %vm870_vm1 = vcmp.lt.s32.totalorder %v5448_v30, 126  ;;  %v5721_v62 = vpop.permute.xlu1 %3942  ;;  %vm8819_vm3 = vcmp.lt.s32.totalorder %v5064_v18, 126 }
 0x106   : > { %v8817_v25 = vsel %vm5716_vm11, 4294967295, %v8816_v25  ;;  %v3279_v49 = vpack.c.bf16 %v861_v11, %v860_v12  ;;  %v8538_v7 = vunpack.i.h.bf16 %v5714_v45  ;;  %v8539_v63 = vunpack.i.l.bf16 %v5714_v45  ;;  %vm8820_vm6 = vmmov %vm8819_vm3 }
 0x107   : > { %8818 = vst [vmem:[#allocation24_spill] sm:$0xff] %v8817_v25  ;;  %v3141_v1 = vpack.c.bf16 %v1006_v39, %v1005_v4  ;;  %v3945_v31 = vunpack.i.h.bf16 %v5721_v62  ;;  %v3944_v2 = vunpack.i.l.bf16 %v5721_v62  ;;  %vm5739_vm0 = vmpackc.low %vm870_vm1, %vm870_vm1  ;;  %v8821_v57 = vmov 0 }
 0x108   : > { %3280 = vmatprep.subr.msk.bf16.mxu1 %vm5702_vm9, %v3279_v49  ;;  %v832_v20 = vsel %vm8819_vm3, %v8539_v63, %v3929_v37  ;;  %v833_v21 = vsel %vm8820_vm6, %v8538_v7, %v3930_v53  ;;  %v8822_v57 = vsel %vm5739_vm0, 4294967295, %v8821_v57  ;;  %v342_v56 = vadd.s32 640, %v5064_v18 }
 0x109   : > { %3142 = vmatprep.subr.msk.bf16.mxu0 %vm5716_vm11, %v3141_v1  ;;  %8823 = vst [vmem:[#allocation25_spill] sm:$0xff] %v8822_v57  ;;  %vm8824_vm15 = vcmp.lt.s32.totalorder %v5064_v18, 124  ;;  %v3282_v19 = vpack.c.bf16 %v833_v21, %v832_v20  ;;  %v3948_v11 = vpop.permute.xlu0 %3947  ;;  %v8827_v53 = vmov 0  ;;  %v3953_v12 = vpop.permute.xlu1 %3952  ;;  %v8833_v21 = vunpack.i.h.bf16 %v5425_v33 }
 0x10a   : > { %v1009_v51 = vsel %vm8824_vm15, %v3944_v2, %v3934_v61  ;;  %vm8825_vm3 = vmmov %vm8824_vm15  ;;  %v3950_v47 = vunpack.i.h.bf16 %v3948_v11  ;;  %v3949_v4 = vunpack.i.l.bf16 %v3948_v11  ;;  %v341_v61 = vadd.s32 512, %v5064_v18 }
 0x10b   : > { %v1010_v37 = vsel %vm8825_vm3, %v3945_v31, %v3935_v60  ;;  %vm8826_vm6 = vmmov %vm8825_vm3  ;;  %v3955_v39 = vunpack.i.h.bf16 %v3953_v12  ;;  %v3954_v49 = vunpack.i.l.bf16 %v3953_v12  ;;  %3283 = vmatpush1.bf16.msk.msra.mxu1 %vm5739_vm0, %v3282_v19  ;;  %vm8830_vm15 = vcmp.lt.s32.totalorder %v5064_v18, 126 }
 0x10c   : > { %vm5753_vm13 = vmpackc.low %vm8826_vm6, %vm8826_vm6  ;;  %v3144_v5 = vpack.c.bf16 %v1010_v37, %v1009_v51  ;;  %v863_v60 = vsel %vm8830_vm15, %v3950_v47, %v3925_v9  ;;  %v5766_v20 = vand.u32 127, %v342_v56  ;;  %v8834_v37 = vunpack.i.l.bf16 %v5425_v33 }
 0x10d   : > { %v8828_v53 = vsel %vm5753_vm13, 4294967295, %v8827_v53  ;;  %vm8831_vm1 = vmmov %vm8830_vm15  ;;  %v1008_v51 = vsel %vm8825_vm3, %v3955_v39, %v8833_v21  ;;  %v5776_v11 = vpop.permute.xlu0 %3957  ;;  %v5778_v12 = vpop.permute.xlu1 %3962  ;;  %v5782_v7 = vand.u32 127, %v341_v61 }
 0x10e   : > { %8829 = vst [vmem:[#allocation26_spill] sm:$0xff] %v8828_v53  ;;  %v862_v1 = vsel %vm8831_vm1, %v3949_v4, %v3924_v40  ;;  %3145 = vmatpush1.bf16.msk.msra.mxu0 %vm5753_vm13, %v3144_v5  ;;  %8832 = vst [vmem:[#allocation27_spill] sm:$0xff] %v5766_v20  ;;  %v3960_v40 = vunpack.i.h.bf16 %v5776_v11  ;;  %v3959_v56 = vunpack.i.l.bf16 %v5776_v11  ;;  %v3965_v63 = vunpack.i.h.bf16 %v5778_v12 }
 0x10f   : > { %vm8835_vm6 = vmmov %vm8825_vm3  ;;  %v3285_v9 = vpack.c.bf16 %v863_v60, %v862_v1  ;;  %8836 = vst [vmem:[#allocation28_spill] sm:$0xff] %v5782_v7  ;;  %v3964_v21 = vunpack.i.l.bf16 %v5778_v12  ;;  %vm547_vm3 = vcmp.ge.s32.totalorder %v5766_v20, 4 }
 0x110   : > { %v1007_v19 = vsel %vm8835_vm6, %v3954_v49, %v8834_v37  ;;  %vm8837_vm15 = vmmov %vm8831_vm1  ;;  %v835_v60 = vsel %vm8831_vm1, %v3960_v40, %v3950_v47 }
 0x111   : > { %v3147_v5 = vpack.c.bf16 %v1008_v51, %v1007_v19  ;;  %3286 = vmatprep.subr.msk.bf16.mxu1 %vm5702_vm9, %v3285_v9  ;;  %v834_v33 = vsel %vm8837_vm15, %v3959_v56, %v3949_v4  ;;  %v1011_v61 = vsel %vm8835_vm6, %v3964_v21, %v3954_v49  ;;  %vm8838_vm9 = vmmov %vm8835_vm6  ;;  %v3968_v37 = vpop.permute.xlu0 %3967  ;;  %vm1024_vm15 = vcmp.lt.s32.totalorder %v5412_v0, 124  ;;  %v3973_v4 = vpop.permute.xlu1 %3972 }
 0x112   : > { %v1012_v1 = vsel %vm8838_vm9, %v3965_v63, %v3955_v39  ;;  %v3288_v51 = vpack.c.bf16 %v835_v60, %v834_v33  ;;  %v3970_v19 = vunpack.i.h.bf16 %v3968_v37  ;;  %v3969_v9 = vunpack.i.l.bf16 %v3968_v37 }
 0x113   : > { %3148 = vmatprep.subr.msk.bf16.mxu0 %vm5716_vm11, %v3147_v5  ;;  %v3150_v12 = vpack.c.bf16 %v1012_v1, %v1011_v61  ;;  %v3975_v47 = vunpack.i.h.bf16 %v3973_v4  ;;  %v3974_v5 = vunpack.i.l.bf16 %v3973_v4  ;;  %vm5807_vm11 = vmpackc.low %vm547_vm3, %vm547_vm3  ;;  %v8839_v49 = vmov 0 }
 0x114   : > { %3289 = vmatpush1.bf16.msk.msra.mxu1 %vm5739_vm0, %v3288_v51  ;;  %v8840_v49 = vsel %vm5807_vm11, 4294967295, %v8839_v49  ;;  %v8842_v39 = vunpack.i.h.bf16 %v5085_v29  ;;  %vm8843_vm9 = vcmp.lt.s32.totalorder %v5064_v18, 4  ;;  %v8844_v60 = vunpack.i.l.bf16 %v5488_v41  ;;  %vm5829_vm0 = vmpackc.low %vm1024_vm15, %vm1024_vm15 }
 0x115   : > { %8841 = vst [vmem:[#allocation29_spill] sm:$0xff] %v8840_v49  ;;  %vm8845_vm6 = vmmov %vm8843_vm9  ;;  %v8846_v1 = vunpack.i.h.bf16 %v5488_v41  ;;  %v8848_v51 = vunpack.i.l.bf16 %v5085_v29  ;;  %3151 = vmatpush1.bf16.msk.msra.mxu0 %vm5753_vm13, %v3150_v12  ;;  %v5839_v29 = vpop.permute.xlu0 %3977  ;;  %v3983_v12 = vpop.permute.xlu1 %3982  ;;  %vm1023_vm15 = vcmp.lt.s32.totalorder %v5448_v30, 124 }
 0x116   : > { %v523_v33 = vsel %vm8843_vm9, %v8842_v39, %v3970_v19  ;;  %v518_v61 = vsel %vm8845_vm6, %v3969_v9, %v8844_v60  ;;  %vm8847_vm1 = vmmov %vm8845_vm6  ;;  %v8850_v39 = vmov 0  ;;  %vm8853_vm9 = vcmp.lt.s32.totalorder %v5064_v18, 124 }
 0x117   : > { %v519_v37 = vsel %vm8847_vm1, %v3970_v19, %v8846_v1  ;;  %vm8849_vm3 = vmmov %vm8847_vm1  ;;  %v8851_v39 = vsel %vm5829_vm0, 4294967295, %v8850_v39  ;;  %v1013_v60 = vsel %vm8853_vm9, %v3974_v5, %v3944_v2  ;;  %vm8855_vm1 = vcmp.ge.s32.totalorder %v5782_v7, 4 }
 0x118   : > { %v522_v4 = vsel %vm8849_vm3, %v8848_v51, %v3969_v9  ;;  %8852 = vst [vmem:[#allocation30_spill] sm:$0xff] %v8851_v39  ;;  %vm8854_vm6 = vmmov %vm8853_vm9  ;;  %v3205_v1 = vpack.c.bf16 %v519_v37, %v518_v61  ;;  %v8856_v9 = vmov 0  ;;  %v8550_v51 = vunpack.i.h.bf16 %v5839_v29  ;;  %1155 = vmatmul.mubr.bf16.vlgmr.msra.gmra.mrb[0].mxu0 %v5456_v32 }
 0x119   : > { %v1014_v41 = vsel %vm8854_vm6, %v3975_v47, %v3945_v31  ;;  %v3208_v19 = vpack.c.bf16 %v523_v33, %v522_v4  ;;  %vm5844_vm3 = vmpackc.low %vm8855_vm1, %vm8855_vm1  ;;  %v3979_v2 = vunpack.i.l.bf16 %v5839_v29  ;;  %v3985_v31 = vunpack.i.h.bf16 %v3983_v12 }
 0x11a   : > { %v8857_v9 = vsel %vm5844_vm3, 4294967295, %v8856_v9  ;;  %v3291_v62 = vpack.c.bf16 %v1014_v41, %v1013_v60  ;;  %v3984_v33 = vunpack.i.l.bf16 %v3983_v12  ;;  %3206 = vmatprep.subr.msk.bf16.mxu0 %vm5807_vm11, %v3205_v1  ;;  %vm8859_vm9 = vmmov %vm8854_vm6  ;;  %v8860_v4 = vunpack.i.h.bf16 %v5115_v50  ;;  %v3988_v1 = vpop.permute.xlu0 %3987 }
 0x11b   : > { %8858 = vst [vmem:[#allocation31_spill] sm:$0xff] %v8857_v9  ;;  %v986_v61 = vsel %vm8859_vm9, %v8550_v51, %v3975_v47  ;;  %v985_v37 = vsel %vm8854_vm6, %v3979_v2, %v3974_v5  ;;  %3209 = vmatpush1.bf16.msk.msra.mxu0 %vm5844_vm3, %v3208_v19  ;;  %vm8861_vm1 = vcmp.lt.s32.totalorder %v5064_v18, 4  ;;  %v8864_v41 = vunpack.i.l.bf16 %v5115_v50  ;;  %vm5882_vm2 = vmpackc.low %vm1023_vm15, %vm1023_vm15 }
 0x11c   : > { %3292 = vmatprep.subr.msk.bf16.mxu1 %vm5829_vm0, %v3291_v62  ;;  %v525_v60 = vsel %vm8861_vm1, %v8860_v4, %v3985_v31  ;;  %vm8862_vm9 = vmmov %vm8861_vm1  ;;  %v8866_v12 = vmov 0  ;;  %v5888_v4 = vpop.permute.xlu1 %3992  ;;  %v3990_v15 = vunpack.i.h.bf16 %v3988_v1  ;;  %v3989_v51 = vunpack.i.l.bf16 %v3988_v1 }
 0x11d   : > { %v520_v47 = vsel %vm8862_vm9, %v3984_v33, %v3879_v48  ;;  %vm8863_vm6 = vmmov %vm8861_vm1  ;;  %v8867_v12 = vsel %vm5882_vm2, 4294967295, %v8866_v12  ;;  %v3294_v48 = vpack.c.bf16 %v986_v61, %v985_v37  ;;  %v3994_v50 = vunpack.i.l.bf16 %v5888_v4 }
 0x11e   : > { %v521_v5 = vsel %vm8863_vm6, %v3985_v31, %v3880_v42  ;;  %vm8865_vm13 = vmmov %vm8861_vm1  ;;  %8868 = vst [vmem:[#allocation32_spill] sm:$0xff] %v8867_v12  ;;  %vm8869_vm1 = vcmask 261120   ;;  %v3995_v42 = vunpack.i.h.bf16 %v5888_v4  ;;  %v8920_v4 = vmov 0 }
 0x11f   : > { %v524_v19 = vsel %vm8865_vm13, %v8864_v41, %v3984_v33  ;;  %3153 = vmatprep.mubr.msk.bf16.mxu0 %vm8869_vm1, %v5478_v3  ;;  %v3211_v31 = vpack.c.bf16 %v521_v5, %v520_v47  ;;  %vm8870_vm13 = vcmp.lt.s32.totalorder %v5064_v18, 124  ;;  %3295 = vmatpush1.bf16.msk.msra.mxu1 %vm5882_vm2, %v3294_v48  ;;  %vm700_vm1 = vcmp.ge.s32.totalorder %v5766_v20, 2 }
 0x120   : > { %v3214_v62 = vpack.c.bf16 %v525_v60, %v524_v19  ;;  %v1016_v33 = vsel %vm8870_vm13, %v3990_v15, %v3965_v63  ;;  %vm8871_vm15 = vmmov %vm8870_vm13  ;;  %v3998_v63 = vpop.permute.xlu0 %3997  ;;  %1165 = vmatmul.mubr.bf16.gmra.mrb[4].mxu0 %v5534_v38 }
 0x121   : > { %v1015_v41 = vsel %vm8871_vm15, %v3989_v51, %v3964_v21  ;;  %vm8872_vm9 = vmmov %vm8870_vm13  ;;  %3212 = vmatprep.subr.msk.bf16.mxu0 %vm5807_vm11, %v3211_v31  ;;  %v4003_v21 = vpop.permute.xlu1 %4002  ;;  %v4000_v5 = vunpack.i.h.bf16 %v3998_v63  ;;  %v3999_v19 = vunpack.i.l.bf16 %v3998_v63  ;;  %vm699_vm13 = vcmp.ge.s32.totalorder %v5782_v7, 2 }
 0x122   : > { %v988_v61 = vsel %vm8872_vm9, %v3995_v42, %v3990_v15  ;;  %vm8873_vm6 = vmmov %vm8872_vm9  ;;  %v3297_v60 = vpack.c.bf16 %v1016_v33, %v1015_v41  ;;  %3215 = vmatpush1.bf16.msk.msra.mxu0 %vm5844_vm3, %v3214_v62  ;;  %v4005_v1 = vunpack.i.h.bf16 %v4003_v21  ;;  %v4004_v48 = vunpack.i.l.bf16 %v4003_v21  ;;  %v4649_v21 = vld [vmem:[%s4865_s11 + $0x28] sm:$0xff] }
 0x123   : > { %v987_v37 = vsel %vm8873_vm6, %v3994_v50, %v3989_v51  ;;  %vm8874_vm15 = vcmp.lt.s32.totalorder %v5064_v18, 2  ;;  %v8875_v62 = vunpack.i.h.bf16 %v5152_v16  ;;  %v8878_v33 = vunpack.i.l.bf16 %v5152_v16 }
 0x124   : > { %v3300_v47 = vpack.c.bf16 %v988_v61, %v987_v37  ;;  %3298 = vmatprep.subr.msk.bf16.mxu1 %vm5829_vm0, %v3297_v60  ;;  %v672_v51 = vsel %vm8874_vm15, %v4000_v5, %v3895_v34  ;;  %vm8876_vm9 = vmmov %vm8874_vm15  ;;  %v4648_v34 = vld [vmem:[%s8455_s1 + $0x4] ss:$8 sps:$4 sm:$0xff]   ;;  %vm8880_vm15 = vcmask 261120   ;;  %v8882_v61 = vmov 0 }
 0x125   : > { %v676_v15 = vsel %vm8876_vm9, %v8875_v62, %v4000_v5  ;;  %vm8877_vm6 = vmmov %vm8876_vm9  ;;  %3252 = vmatprep.mubr.msk.bf16.mxu0 %vm8880_vm15, %v4648_v34  ;;  %v8885_v63 = vmov 0  ;;  %v4650_v5 = vld [vmem:[%s4865_s11 + $0x68] sm:$0xff] }
 0x126   : > { %v671_v31 = vsel %vm8877_vm6, %v3999_v19, %v3894_v36  ;;  %vm8879_vm0 = vmmov %vm8877_vm6  ;;  %3301 = vmatpush1.bf16.msk.msra.mxu1 %vm5882_vm2, %v3300_v47  ;;  %vm868_vm2 = vcmp.lt.s32.totalorder %v5782_v7, 126 }
 0x127   : > { %v675_v41 = vsel %vm8879_vm0, %v8878_v33, %v3999_v19  ;;  %vm8881_vm9 = vmmov %vm8879_vm0  ;;  %v674_v16 = vsel %vm8879_vm0, %v4005_v1, %v3905_v13  ;;  %v3217_v37 = vpack.c.bf16 %v672_v51, %v671_v31  ;;  %v678_v13 = vsel %vm8879_vm0, %v8889_v17, %v4005_v1  ;;  %v4652_v51 = vld [vmem:[%s4865_s11 + $0x60] sm:$0xff]  ;;  %v4654_v31 = vld [vmem:[%s4865_s11 + $0xe8] sm:$0xff] }
 0x128   : > { %v673_v14 = vsel %vm8881_vm9, %v4004_v48, %v3904_v44  ;;  %v3220_v36 = vpack.c.bf16 %v676_v15, %v675_v41  ;;  %vm5945_vm6 = vmpackc.low %vm700_vm1, %vm700_vm1  ;;  %vm8888_vm9 = vcmask 261120   ;;  %v8890_v44 = vunpack.i.l.bf16 %v5192_v8  ;;  %v4008_v8 = vpop.permute.xlu0 %4007  ;;  %v4653_v15 = vld [vmem:[%s4865_s11 + $0xa8] sm:$0xff] }
 0x129   : > { %v8883_v61 = vsel %vm5945_vm6, 4294967295, %v8882_v61  ;;  %1314 = vmatmul.mubr.bf16.vlgmr.msra.gmra.mrb[8].mxu1 %v5456_v32  ;;  %vm5950_vm15 = vmpackc.low %vm699_vm13, %vm699_vm13  ;;  %3218 = vmatprep.subr.msk.bf16.mxu0 %vm5945_vm6, %v3217_v37  ;;  %v3223_v47 = vpack.c.bf16 %v674_v16, %v673_v14  ;;  %v756_v19 = vpack.c.bf16 %v4650_v5, %v4649_v21  ;;  %v764_v33 = vpack.c.bf16 %v4654_v31, %v4653_v15  ;;  %v4013_v14 = vpop.permute.xlu1 %4012 }
 0x12a   : > { %8884 = vst [vmem:[#allocation33_spill] sm:$0xff] %v8883_v61  ;;  %v8886_v63 = vsel %vm5950_vm15, 4294967295, %v8885_v63  ;;  %3303 = vmatprep.mubr.msk.bf16.mxu1 %vm8888_vm9, %v5478_v3  ;;  %vm8891_vm1 = vmmov %vm8879_vm0  ;;  %3221 = vmatpush1.bf16.msk.msra.mxu0 %vm5950_vm15, %v3220_v36  ;;  %v4010_v41 = vunpack.i.h.bf16 %v4008_v8  ;;  %v4009_v34 = vunpack.i.l.bf16 %v4008_v8  ;;  %vm869_vm13 = vcmp.lt.s32.totalorder %v5766_v20, 126 }
 0x12b   : > { %8887 = vst [vmem:[#allocation34_spill] sm:$0xff] %v8886_v63  ;;  %v677_v60 = vsel %vm8891_vm1, %v8890_v44, %v4004_v48  ;;  %3224 = vmatprep.subr.msk.bf16.mxu0 %vm5945_vm6, %v3223_v47  ;;  %v4651_v48 = vld [vmem:[%s4865_s11 + $0x20] sm:$0xff]  ;;  %v8892_v16 = vunpack.i.l.bf16 %v5714_v45  ;;  %vm8893_vm9 = vcmp.lt.s32.totalorder %v5064_v18, 126  ;;  %v8894_v37 = vunpack.i.h.bf16 %v5714_v45  ;;  %vm5990_vm1 = vmpackc.low %vm869_vm13, %vm869_vm13 }
 0x12c   : > { %v3226_v1 = vpack.c.bf16 %v678_v13, %v677_v60  ;;  %v755_v62 = vpack.c.bf16 %v4652_v51, %v4651_v48  ;;  %vm8895_vm0 = vmmov %vm8893_vm9  ;;  %v4655_v13 = vld [vmem:[%s4865_s11 + $0xa0] sm:$0xff]  ;;  %v4018_v47 = vpop.permute.xlu0 %4017  ;;  %v4015_v21 = vunpack.i.h.bf16 %v4013_v14  ;;  %v4014_v5 = vunpack.i.l.bf16 %v4013_v14 }
 0x12d   : > { %v836_v36 = vsel %vm8893_vm9, %v4009_v34, %v8892_v16  ;;  %v837_v17 = vsel %vm8895_vm0, %v4010_v41, %v8894_v37  ;;  %v4656_v44 = vld [vmem:[%s4865_s11 + $0xe0] sm:$0xff]  ;;  %vm8900_vm9 = vmmov %vm8895_vm0  ;;  %v8901_v8 = vunpack.i.l.bf16 %v5220_v24  ;;  %v4020_v31 = vunpack.i.h.bf16 %v4018_v47 }
 0x12e   : > { %3227 = vmatpush1.bf16.msk.msra.mxu0 %vm5950_vm15, %v3226_v1  ;;  %v763_v60 = vpack.c.bf16 %v4656_v44, %v4655_v13  ;;  %v8899_v1 = vunpack.i.h.bf16 %v5220_v24  ;;  %v3229_v51 = vpack.c.bf16 %v837_v17, %v836_v36  ;;  %vm8902_vm13 = vmmov %vm8895_vm0  ;;  %v8904_v24 = vmov 0 }
 0x12f   : > { %1236 = vmatprep.subr.bf16.mxu0 %v756_v19  ;;  %v8896_v19 = vmov 0  ;;  %v840_v48 = vsel %vm8895_vm0, %v8901_v8, %v4009_v34  ;;  %vm8903_vm15 = vmmov %vm8895_vm0  ;;  %vm8907_vm0 = vcmp.lt.s32.totalorder %v5064_v18, 124  ;;  %v8910_v14 = vunpack.i.h.bf16 %v5249_v54 }
 0x130   : > { %v8897_v19 = vsel %vm5990_vm1, 4294967295, %v8896_v19  ;;  %v841_v45 = vsel %vm8900_vm9, %v8899_v1, %v4010_v41  ;;  %v839_v15 = vsel %vm8903_vm15, %v4015_v21, %v3960_v40  ;;  %v4023_v41 = vpop.permute.xlu1 %4022  ;;  %vm6013_vm9 = vmpackc.low %vm868_vm2, %vm868_vm2  ;;  %v8911_v36 = vunpack.i.l.bf16 %v5249_v54 }
 0x131   : > { %1324 = vmatmul.mubr.bf16.gmra.mrb[12].mxu1 %v5534_v38  ;;  %8898 = vst [vmem:[#allocation35_spill] sm:$0xff] %v8897_v19  ;;  %v8905_v24 = vsel %vm6013_vm9, 4294967295, %v8904_v24  ;;  %v3232_v34 = vpack.c.bf16 %v841_v45, %v840_v48  ;;  %vm8909_vm15 = vmmov %vm8907_vm0  ;;  %v843_v16 = vsel %vm8902_vm13, %v8910_v14, %v4015_v21  ;;  %vm1022_vm6 = vcmp.lt.s32.totalorder %v5766_v20, 124 }
 0x132   : > { %1237 = vmatpush1.bf16.msra.mxu0 %v755_v62  ;;  %v838_v62 = vsel %vm8902_vm13, %v4014_v5, %v3959_v56  ;;  %8906 = vst [vmem:[#allocation36_spill] sm:$0xff] %v8905_v24  ;;  %v8908_v56 = vunpack.i.h.bf16 %v5839_v29  ;;  %vm8912_vm2 = vmmov %vm8902_vm13  ;;  %v4025_v13 = vunpack.i.h.bf16 %v4023_v41  ;;  %v8917_v21 = vunpack.i.l.bf16 %v5330_v28 }
 0x133   : > { %1238 = vmatprep.subr.bf16.mxu0 %v764_v33  ;;  %v4019_v33 = vunpack.i.l.bf16 %v4018_v47  ;;  %v842_v37 = vsel %vm8912_vm2, %v8911_v36, %v4014_v5  ;;  %v3235_v17 = vpack.c.bf16 %v839_v15, %v838_v62  ;;  %vm6046_vm13 = vmpackc.low %vm1022_vm6, %vm1022_vm6  ;;  %v8914_v47 = vmov 0 }
 0x134   : > { %v990_v40 = vsel %vm8909_vm15, %v4020_v31, %v8908_v56  ;;  %v3238_v44 = vpack.c.bf16 %v843_v16, %v842_v37  ;;  %vm8913_vm15 = vmmov %vm8907_vm0  ;;  %v8915_v47 = vsel %vm6046_vm13, 4294967295, %v8914_v47  ;;  %vm1021_vm2 = vcmp.lt.s32.totalorder %v5782_v7, 124 }
 0x135   : > { %v989_v11 = vsel %vm8907_vm0, %v4019_v33, %v3979_v2  ;;  %v4024_v2 = vunpack.i.l.bf16 %v4023_v41  ;;  %8916 = vst [vmem:[#allocation37_spill] sm:$0xff] %v8915_v47  ;;  %v8919_v1 = vunpack.i.h.bf16 %v5330_v28  ;;  %vm6063_vm6 = vmpackc.low %vm1021_vm2, %vm1021_vm2  ;;  %v8923_v8 = vunpack.i.h.bf16 %v5404_v27 }
 0x136   : > { %1239 = vmatpush1.bf16.msra.mxu0 %v763_v60  ;;  %v3241_v29 = vpack.c.bf16 %v990_v40, %v989_v11  ;;  %v992_v60 = vsel %vm8913_vm15, %v4025_v13, %v3995_v42  ;;  %v8921_v4 = vsel %vm6063_vm6, 4294967295, %v8920_v4  ;;  %v8925_v48 = vunpack.i.l.bf16 %v5404_v27  ;;  %vm8926_vm15 = vmmov %vm8907_vm0 }
 0x137   : > { %3230 = vmatprep.subr.msk.bf16.mxu0 %vm5990_vm1, %v3229_v51  ;;  %v991_v54 = vsel %vm8907_vm0, %v4024_v2, %v3994_v50  ;;  %v994_v50 = vsel %vm8907_vm0, %v8919_v1, %v4020_v31  ;;  %8922 = vst [vmem:[#allocation38_spill] sm:$0xff] %v8921_v4  ;;  %vm8927_vm2 = vcmask 261120  }
 0x138   : > { %v3247_v42 = vpack.c.bf16 %v992_v60, %v991_v54  ;;  %v995_v51 = vsel %vm8926_vm15, %v8925_v48, %v4024_v2 }
 0x13a   : > { %3233 = vmatpush1.bf16.msk.msra.mxu0 %vm6013_vm9, %v3232_v34 }
 0x13b   : > { %3236 = vmatprep.subr.msk.bf16.mxu0 %vm5990_vm1, %v3235_v17  ;;  %vm8918_vm1 = vmmov %vm8907_vm0 }
 0x13c   : > { %v993_v5 = vsel %vm8918_vm1, %v8917_v21, %v4019_v33  ;;  %vm8924_vm1 = vmmov %vm8907_vm0 }
 0x13d   : > { %v3244_v45 = vpack.c.bf16 %v994_v50, %v993_v5  ;;  %v996_v28 = vsel %vm8924_vm1, %v8923_v8, %v4025_v13 }
 0x13e   : > { %3239 = vmatpush1.bf16.msk.msra.mxu0 %vm6013_vm9, %v3238_v44  ;;  %v3250_v62 = vpack.c.bf16 %v996_v28, %v995_v51 }
 0x13f   : > { %3242 = vmatprep.subr.msk.bf16.mxu0 %vm6046_vm13, %v3241_v29 }
 0x142   : > { %3245 = vmatpush1.bf16.msk.msra.mxu0 %vm6063_vm6, %v3244_v45 }
 0x143   : > { %3248 = vmatprep.subr.msk.bf16.mxu0 %vm6046_vm13, %v3247_v42 }
 0x146   : > { %3251 = vmatpush1.bf16.msk.msra.mxu0 %vm6063_vm6, %v3250_v62 }
 0x149   : > { %1261 = vmatmul.mubr.bf16.vlgmr.msra.gmra.mrb[8].mxu0 %v5456_v32 }
 0x14a   : > { %3253 = vmatprep.mubr.msk.bf16.mxu0 %vm8927_vm2, %v5478_v3 }
 0x14c   : > { %v6087_v31 = vpop.permute.xlu1 %1084 }
 0x14d   : > { %v6085_v27 = vpop.permute.xlu0 %1079 }
 0x150   : > { %v6093_v37 = vpop.permute.xlu1 %1089 }
 0x151   : > { %1271 = vmatmul.mubr.bf16.gmra.mrb[12].mxu0 %v5534_v38  ;;  %v6095_v44 = vpop.permute.xlu0 %1094 }
 0x1ba   : > { %v1209_v15 = vpop.f32.mrb[0].mxu1 }
 0x1bb   : > { %v1211_v33 = vpop.f32.mrb[1].mxu1  ;;  %v1210_v41 = vadd.f32 %v1209_v15, %v6085_v27 }
 0x1bc   : > { %v1213_v34 = vpop.f32.mrb[2].mxu1  ;;  %v1212_v11 = vadd.f32 %v1211_v33, %v6085_v27 }
 0x1bd   : > { %v1214_v56 = vadd.f32 %v1213_v34, %v6087_v31  ;;  %v1215_v40 = vpop.f32.mrb[3].mxu1  ;;  %v1368_v32 = vmin.f32 %v1210_v41, 0.0  ;;  %vm1336_vm0 = vcmp.gt.f32.partialorder %v1210_v41, 0.0 }
 0x1be   : > { %v1216_v14 = vadd.f32 %v1215_v40, %v6087_v31  ;;  %v1369_v3 = vmin.f32 %v1212_v11, 0.0  ;;  %vm1337_vm1 = vcmp.gt.f32.partialorder %v1212_v11, 0.0 }
 0x1bf   : > { %v1376_v16 = vmin.f32 %v1214_v56, 0.0  ;;  %v1402_v38 = vmul.f32 1.442695, %v1368_v32  ;;  %vm1344_vm15 = vcmp.gt.f32.partialorder %v1214_v56, 0.0 }
 0x1c0   : > { %v1377_v36 = vmin.f32 %v1216_v14, 0.0  ;;  %v1404_v17 = vmul.f32 1.442695, %v1369_v3  ;;  %vm1345_vm2 = vcmp.gt.f32.partialorder %v1216_v14, 0.0 }
 0x1c1   : > { %v1418_v13 = vmul.f32 1.442695, %v1376_v16  ;;  %4520 = vpow2.f32 %v1402_v38 }
 0x1c2   : > { %v1420_v2 = vmul.f32 1.442695, %v1377_v36  ;;  %v1219_v29 = vpop.f32.mrb[4].mxu1  ;;  %4522 = vpow2.f32 %v1404_v17 }
 0x1c3   : > { %4524 = vpow2.f32 %v1418_v13  ;;  %v1221_v54 = vpop.f32.mrb[5].mxu1  ;;  %v1220_v60 = vadd.f32 %v1219_v29, %v6093_v37 }
 0x1c4   : > { %4526 = vpow2.f32 %v1420_v2  ;;  %v1223_v21 = vpop.f32.mrb[6].mxu1  ;;  %v1222_v5 = vadd.f32 %v1221_v54, %v6093_v37 }
 0x1c5   : > { %v1225_v1 = vpop.f32.mrb[7].mxu1  ;;  %v1224_v50 = vadd.f32 %v1223_v21, %v6095_v44  ;;  %v1384_v42 = vmin.f32 %v1220_v60, 0.0  ;;  %vm1352_vm6 = vcmp.gt.f32.partialorder %v1220_v60, 0.0 }
 0x1c6   : > { %v1226_v45 = vadd.f32 %v1225_v1, %v6095_v44  ;;  %v1385_v8 = vmin.f32 %v1222_v5, 0.0  ;;  %vm1353_vm13 = vcmp.gt.f32.partialorder %v1222_v5, 0.0 }
 0x1c7   : > { %v1392_v28 = vmin.f32 %v1224_v50, 0.0  ;;  %v1434_v48 = vmul.f32 1.442695, %v1384_v42 }
 0x1c8   : > { %v1393_v51 = vmin.f32 %v1226_v45, 0.0  ;;  %v1436_v62 = vmul.f32 1.442695, %v1385_v8 }
 0x1c9   : > { %4528 = vpow2.f32 %v1434_v48  ;;  %v1450_v15 = vmul.f32 1.442695, %v1392_v28 }
 0x1ca   : > { %v1452_v33 = vmul.f32 1.442695, %v1393_v51  ;;  %4530 = vpow2.f32 %v1436_v62 }
 0x1cb   : > { %v4521_v34 = vpop.eup %4520  ;;  %4532 = vpow2.f32 %v1450_v15 }
 0x1cc   : > { %v4523_v40 = vpop.eup %4522  ;;  %4534 = vpow2.f32 %v1452_v33  ;;  %v3306_v32 = vadd.f32 -1.0, %v4521_v34 }
 0x1cd   : > { %v4525_v3 = vpop.eup %4524  ;;  %v3307_v16 = vadd.f32 -1.0, %v4523_v40 }
 0x1ce   : > { %v4527_v38 = vpop.eup %4526  ;;  %v3314_v36 = vadd.f32 -1.0, %v4525_v3  ;;  %v6101_v17 = vsel %vm1336_vm0, %v1210_v41, %v3306_v32  ;;  %vm1360_vm0 = vcmp.gt.f32.partialorder %v1224_v50, 0.0 }
 0x1cf   : > { %v3315_v13 = vadd.f32 -1.0, %v4527_v38  ;;  %v6103_v2 = vsel %vm1337_vm1, %v1212_v11, %v3307_v16  ;;  %vm1361_vm1 = vcmp.gt.f32.partialorder %v1226_v45, 0.0 }
 0x1d0   : > { %v6105_v29 = vsel %vm1344_vm15, %v1214_v56, %v3314_v36 }
 0x1d1   : > { %v6107_v54 = vsel %vm1345_vm2, %v1216_v14, %v3315_v13  ;;  %v6111_v21 = vpack.i.bf16 %v6105_v29, %v6101_v17 }
 0x1d2   : > { %v6115_v1 = vpack.i.bf16 %v6107_v54, %v6103_v2 }
 0x1d3   : > { %v4529_v42 = vpop.eup %4528  ;;  %4059 = vrot.lane.b32.xlu0 %v6111_v21, %s4716_s14 }
 0x1d4   : > { %v4531_v41 = vpop.eup %4530  ;;  %v3322_v11 = vadd.f32 -1.0, %v4529_v42 }
 0x1d5   : > { %v4533_v8 = vpop.eup %4532  ;;  %v3323_v28 = vadd.f32 -1.0, %v4531_v41 }
 0x1d6   : > { %v4535_v48 = vpop.eup %4534  ;;  %v3330_v51 = vadd.f32 -1.0, %v4533_v8  ;;  %v6124_v62 = vsel %vm1352_vm6, %v1220_v60, %v3322_v11 }
 0x1d7   : > { %v3331_v15 = vadd.f32 -1.0, %v4535_v48  ;;  %4069 = vrot.lane.b32.xlu0 %v6111_v21, %s4717_s15  ;;  %v6129_v33 = vsel %vm1353_vm13, %v1222_v5, %v3323_v28 }
 0x1d8   : > { %v6131_v34 = vsel %vm1360_vm0, %v1224_v50, %v3330_v51 }
 0x1d9   : > { %v6133_v40 = vsel %vm1361_vm1, %v1226_v45, %v3331_v15  ;;  %v6137_v32 = vpack.i.bf16 %v6131_v34, %v6124_v62 }
 0x1da   : > { %v6141_v3 = vpack.i.bf16 %v6133_v40, %v6129_v33 }
 0x1eb   : > { %v1156_v5 = vpop.f32.mrb[0].mxu0 }
 0x1ec   : > { %v6148_v50 = vadd.f32 %v1156_v5, %v6085_v27  ;;  %v1158_v45 = vpop.f32.mrb[1].mxu0 }
 0x1ed   : > { %v6151_v38 = vadd.f32 %v1158_v45, %v6085_v27  ;;  %v1160_v36 = vpop.f32.mrb[2].mxu0 }
 0x1ee   : > { %v1366_v13 = vmin.f32 %v6148_v50, 0.0  ;;  %v6155_v42 = vadd.f32 %v1160_v36, %v6087_v31  ;;  %v1162_v41 = vpop.f32.mrb[3].mxu0  ;;  %vm1334_vm13 = vcmp.gt.f32.partialorder %v6148_v50, 0.0 }
 0x1ef   : > { %v1367_v11 = vmin.f32 %v6151_v38, 0.0  ;;  %v6159_v8 = vadd.f32 %v1162_v41, %v6087_v31 }
 0x1f0   : > { %v1398_v28 = vmul.f32 1.442695, %v1366_v13  ;;  %v1374_v48 = vmin.f32 %v6155_v42, 0.0  ;;  %vm1342_vm15 = vcmp.gt.f32.partialorder %v6155_v42, 0.0 }
 0x1f1   : > { %v1400_v51 = vmul.f32 1.442695, %v1367_v11  ;;  %v1375_v15 = vmin.f32 %v6159_v8, 0.0 }
 0x1f2   : > { %4536 = vpow2.f32 %v1398_v28  ;;  %v1414_v5 = vmul.f32 1.442695, %v1374_v48 }
 0x1f3   : > { %4538 = vpow2.f32 %v1400_v51  ;;  %v1416_v45 = vmul.f32 1.442695, %v1375_v15  ;;  %v1166_v16 = vpop.f32.mrb[4].mxu0 }
 0x1f4   : > { %4540 = vpow2.f32 %v1414_v5  ;;  %v6164_v36 = vadd.f32 %v1166_v16, %v6093_v37  ;;  %v1168_v60 = vpop.f32.mrb[5].mxu0 }
 0x1f5   : > { %4542 = vpow2.f32 %v1416_v45  ;;  %v6167_v41 = vadd.f32 %v1168_v60, %v6093_v37  ;;  %v1170_v13 = vpop.f32.mrb[6].mxu0 }
 0x1f6   : > { %v1382_v14 = vmin.f32 %v6164_v36, 0.0  ;;  %v6171_v11 = vadd.f32 %v1170_v13, %v6095_v44  ;;  %v1172_v28 = vpop.f32.mrb[7].mxu0  ;;  %vm1350_vm0 = vcmp.gt.f32.partialorder %v6164_v36, 0.0 }
 0x1f7   : > { %v1383_v48 = vmin.f32 %v6167_v41, 0.0  ;;  %v6175_v51 = vadd.f32 %v1172_v28, %v6095_v44  ;;  %vm1351_vm6 = vcmp.gt.f32.partialorder %v6167_v41, 0.0 }
 0x1f8   : > { %v1430_v16 = vmul.f32 1.442695, %v1382_v14  ;;  %v1390_v5 = vmin.f32 %v6171_v11, 0.0  ;;  %vm1358_vm1 = vcmp.gt.f32.partialorder %v6171_v11, 0.0 }
 0x1f9   : > { %v1432_v56 = vmul.f32 1.442695, %v1383_v48  ;;  %v1391_v4 = vmin.f32 %v6175_v51, 0.0 }
 0x1fa   : > { %4544 = vpow2.f32 %v1430_v16  ;;  %v1446_v47 = vmul.f32 1.442695, %v1390_v5 }
 0x1fb   : > { %4546 = vpow2.f32 %v1432_v56  ;;  %v1448_v14 = vmul.f32 1.442695, %v1391_v4 }
 0x1fc   : > { %v1315_v15 = vpop.f32.mrb[8].mxu1  ;;  %v4537_v57 = vpop.eup %4536  ;;  %4548 = vpow2.f32 %v1446_v47 }
 0x1fd   : > { %v6179_v45 = vadd.f32 %v1315_v15, %v6085_v27  ;;  %v1317_v60 = vpop.f32.mrb[9].mxu1  ;;  %4550 = vpow2.f32 %v1448_v14  ;;  %v3304_v4 = vadd.f32 -1.0, %v4537_v57 }
 0x1fe   : > { %v6183_v13 = vadd.f32 %v1317_v60, %v6085_v27  ;;  %v1319_v12 = vpop.f32.mrb[10].mxu1  ;;  %v4539_v60 = vpop.eup %4538 }
 0x1ff   : > { %v1372_v28 = vmin.f32 %v6179_v45, 0.0  ;;  %v1321_v39 = vpop.f32.mrb[11].mxu1  ;;  %v6188_v48 = vadd.f32 %v1319_v12, %v6087_v31  ;;  %v4541_v56 = vpop.eup %4540  ;;  %v3305_v63 = vadd.f32 -1.0, %v4539_v60  ;;  %vm1340_vm2 = vcmp.gt.f32.partialorder %v6179_v45, 0.0 }
 0x200   : > { %v1373_v24 = vmin.f32 %v6183_v13, 0.0  ;;  %v6191_v19 = vadd.f32 %v1321_v39, %v6087_v31  ;;  %v4543_v12 = vpop.eup %4542  ;;  %v3312_v5 = vadd.f32 -1.0, %v4541_v56 }
 0x201   : > { %v1410_v15 = vmul.f32 1.442695, %v1372_v28  ;;  %v1380_v47 = vmin.f32 %v6188_v48, 0.0  ;;  %v3313_v28 = vadd.f32 -1.0, %v4543_v12 }
 0x202   : > { %v1412_v16 = vmul.f32 1.442695, %v1373_v24  ;;  %v1381_v24 = vmin.f32 %v6191_v19, 0.0  ;;  %v6212_v56 = vsel %vm1342_vm15, %v6155_v42, %v3312_v5  ;;  %vm8930_vm15 = vcmp.gt.f32.partialorder %v6159_v8, 0.0 }
 0x203   : > { %4552 = vpow2.f32 %v1410_v15  ;;  %v1426_v14 = vmul.f32 1.442695, %v1380_v47  ;;  %8928 = vst [vmem:[#allocation39_spill] sm:$0xff] %v6212_v56  ;;  %v6228_v42 = vsel %vm8930_vm15, %v6159_v8, %v3313_v28  ;;  %vm1349_vm15 = vcmp.gt.f32.partialorder %v6191_v19, 0.0 }
 0x204   : > { %4554 = vpow2.f32 %v1412_v16  ;;  %v1325_v39 = vpop.f32.mrb[12].mxu1  ;;  %v1428_v47 = vmul.f32 1.442695, %v1381_v24  ;;  %v4545_v61 = vpop.eup %4544 }
 0x205   : > { %v1327_v52 = vpop.f32.mrb[13].mxu1  ;;  %v6204_v15 = vadd.f32 %v1325_v39, %v6093_v37  ;;  %4556 = vpow2.f32 %v1426_v14  ;;  %v6220_v39 = vsel %vm1334_vm13, %v6148_v50, %v3304_v4  ;;  %v4547_v50 = vpop.eup %4546  ;;  %v3320_v4 = vadd.f32 -1.0, %v4545_v61 }
 0x206   : > { %v6207_v57 = vadd.f32 %v1327_v52, %v6093_v37  ;;  %v1329_v16 = vpop.f32.mrb[14].mxu1  ;;  %8929 = vst [vmem:[#allocation40_spill] sm:$0xff] %v6220_v39  ;;  %4558 = vpow2.f32 %v1428_v47  ;;  %v6236_v58 = vpack.i.bf16 %v6212_v56, %v6220_v39  ;;  %v4549_v9 = vpop.eup %4548  ;;  %vm8931_vm13 = vcmp.gt.f32.partialorder %v6151_v38, 0.0 }
 0x207   : > { %v6215_v60 = vadd.f32 %v1329_v16, %v6095_v44  ;;  %v1331_v12 = vpop.f32.mrb[15].mxu1  ;;  %v1388_v52 = vmin.f32 %v6204_v15, 0.0  ;;  %v6241_v8 = vsel %vm8931_vm13, %v6151_v38, %v3305_v63  ;;  %v3321_v28 = vadd.f32 -1.0, %v4547_v50 }
 0x208   : > { %v1389_v6 = vmin.f32 %v6207_v57, 0.0  ;;  %v6232_v14 = vadd.f32 %v1331_v12, %v6095_v44  ;;  %v4551_v12 = vpop.eup %4550  ;;  %v3328_v49 = vadd.f32 -1.0, %v4549_v9  ;;  %4029 = vrot.lane.b32.xlu1 %v6236_v58, %s4719_s27  ;;  %v6254_v63 = vsel %vm1350_vm0, %v6164_v36, %v3320_v4 }
 0x209   : > { %v1396_v5 = vmin.f32 %v6215_v60, 0.0  ;;  %v1442_v24 = vmul.f32 1.442695, %v1388_v52  ;;  %8932 = vst [vmem:[#allocation41_spill] sm:$0xff] %v6254_v63  ;;  %v3329_v38 = vadd.f32 -1.0, %v4551_v12  ;;  %vm1341_vm13 = vcmp.gt.f32.partialorder %v6183_v13, 0.0 }
 0x20a   : > { %v1444_v16 = vmul.f32 1.442695, %v1389_v6  ;;  %v1397_v26 = vmin.f32 %v6232_v14, 0.0  ;;  %v6249_v6 = vpack.i.bf16 %v6228_v42, %v6241_v8  ;;  %v6268_v36 = vsel %vm1351_vm6, %v6167_v41, %v3321_v28 }
 0x20b   : > { %v1458_v47 = vmul.f32 1.442695, %v1396_v5  ;;  %4560 = vpow2.f32 %v1442_v24  ;;  %v6261_v5 = vsel %vm1358_vm1, %v6171_v11, %v3328_v49  ;;  %8934 = vst [vmem:[#allocation43_spill] sm:$0xff] %v6268_v36  ;;  %vm8935_vm0 = vcmp.gt.f32.partialorder %v6175_v51, 0.0 }
 0x20c   : > { %4562 = vpow2.f32 %v1444_v16  ;;  %v1460_v9 = vmul.f32 1.442695, %v1397_v26  ;;  %8933 = vst [vmem:[#allocation42_spill] sm:$0xff] %v6261_v5  ;;  %4079 = vrot.lane.b32.xlu0 %v6249_v6, %s4719_s27  ;;  %v6273_v26 = vsel %vm8935_vm0, %v6175_v51, %v3329_v38  ;;  %vm1356_vm1 = vcmp.gt.f32.partialorder %v6204_v15, 0.0  ;;  %4034 = vrot.lane.b32.xlu1 %v6111_v21, %s4719_s27 }
 0x20d   : > { %v4553_v61 = vpop.eup %4552  ;;  %4564 = vpow2.f32 %v1458_v47  ;;  %8936 = vst [vmem:[#allocation44_spill] sm:$0xff] %v6273_v26  ;;  %vm1357_vm6 = vcmp.gt.f32.partialorder %v6207_v57, 0.0  ;;  %v6286_v41 = vpack.i.bf16 %v6261_v5, %v6254_v63  ;;  %v6292_v16 = vpack.i.bf16 %v6273_v26, %v6268_v36 }
 0x20e   : > { %v4555_v52 = vpop.eup %4554  ;;  %v3310_v50 = vadd.f32 -1.0, %v4553_v61  ;;  %4566 = vpow2.f32 %v1460_v9  ;;  %vm8938_vm0 = vcmp.gt.f32.partialorder %v6188_v48, 0.0 }
 0x20f   : > { %v3311_v4 = vadd.f32 -1.0, %v4555_v52  ;;  %v4557_v49 = vpop.eup %4556 }
 0x210   : > { %v6281_v11 = vsel %vm1340_vm2, %v6179_v45, %v3310_v50  ;;  %v3318_v51 = vadd.f32 -1.0, %v4557_v49  ;;  %4084 = vrot.lane.b32.xlu0 %v6115_v1, %s4719_s27  ;;  %v4559_v24 = vpop.eup %4558  ;;  %4039 = vrot.lane.b32.xlu1 %v6236_v58, %s4714_s12  ;;  %vm1364_vm2 = vcmp.gt.f32.partialorder %v6215_v60, 0.0 }
 0x211   : > { %8937 = vst [vmem:[#allocation45_spill] sm:$0xff] %v6281_v11  ;;  %v3319_v28 = vadd.f32 -1.0, %v4559_v24  ;;  %v6304_v12 = vsel %vm1341_vm13, %v6183_v13, %v3311_v4 }
 0x212   : > { %v6297_v45 = vsel %vm8938_vm0, %v6188_v48, %v3318_v51  ;;  %8940 = vst [vmem:[#allocation47_spill] sm:$0xff] %v6304_v12 }
 0x213   : > { %8939 = vst [vmem:[#allocation46_spill] sm:$0xff] %v6297_v45  ;;  %v6309_v61 = vsel %vm1349_vm15, %v6191_v19, %v3319_v28  ;;  %v6315_v48 = vpack.i.bf16 %v6297_v45, %v6281_v11  ;;  %vm1365_vm15 = vcmp.gt.f32.partialorder %v6232_v14, 0.0 }
 0x214   : > { %8941 = vst [vmem:[#allocation48_spill] sm:$0xff] %v6309_v61  ;;  %4089 = vrot.lane.b32.xlu0 %v6249_v6, %s4714_s12  ;;  %v6319_v52 = vpack.i.bf16 %v6309_v61, %v6304_v12  ;;  %4044 = vrot.lane.b32.xlu1 %v6111_v21, %s4714_s12 }
 0x215   : > { %v4561_v47 = vpop.eup %4560 }
 0x216   : > { %v4563_v38 = vpop.eup %4562  ;;  %v3326_v9 = vadd.f32 -1.0, %v4561_v47 }
 0x217   : > { %v4565_v13 = vpop.eup %4564  ;;  %v3327_v50 = vadd.f32 -1.0, %v4563_v38 }
 0x218   : > { %v4567_v19 = vpop.eup %4566  ;;  %v6328_v4 = vsel %vm1356_vm1, %v6204_v15, %v3326_v9  ;;  %v3334_v49 = vadd.f32 -1.0, %v4565_v13  ;;  %4094 = vrot.lane.b32.xlu0 %v6115_v1, %s4714_s12  ;;  %4049 = vrot.lane.b32.xlu1 %v6236_v58, %s4715_s13 }
 0x219   : > { %8942 = vst [vmem:[#allocation49_spill] sm:$0xff] %v6328_v4  ;;  %v6333_v51 = vsel %vm1357_vm6, %v6207_v57, %v3327_v50  ;;  %v3335_v24 = vadd.f32 -1.0, %v4567_v19 }
 0x21a   : > { %8943 = vst [vmem:[#allocation50_spill] sm:$0xff] %v6333_v51  ;;  %v6338_v28 = vsel %vm1364_vm2, %v6215_v60, %v3334_v49 }
 0x21b   : > { %8944 = vst [vmem:[#allocation51_spill] sm:$0xff] %v6338_v28  ;;  %v6341_v47 = vsel %vm1365_vm15, %v6232_v14, %v3335_v24  ;;  %v6347_v15 = vpack.i.bf16 %v6338_v28, %v6328_v4 }
 0x21c   : > { %8945 = vst [vmem:[#allocation52_spill] sm:$0xff] %v6341_v47  ;;  %v6351_v57 = vpack.i.bf16 %v6341_v47, %v6333_v51  ;;  %4099 = vrot.lane.b32.xlu0 %v6249_v6, %s4715_s13  ;;  %v1262_v38 = vpop.f32.mrb[8].mxu0  ;;  %4054 = vrot.lane.b32.xlu1 %v6111_v21, %s4715_s13 }
 0x21d   : > { %v6356_v60 = vadd.f32 %v1262_v38, %v6085_v27  ;;  %v1264_v14 = vpop.f32.mrb[9].mxu0 }
 0x21e   : > { %v6365_v50 = vadd.f32 %v1264_v14, %v6085_v27  ;;  %v1266_v19 = vpop.f32.mrb[10].mxu0 }
 0x21f   : > { %v1370_v9 = vmin.f32 %v6356_v60, 0.0  ;;  %v1267_v13 = vadd.f32 %v1266_v19, %v6087_v31  ;;  %v1268_v10 = vpop.f32.mrb[11].mxu0  ;;  %vm1338_vm13 = vcmp.gt.f32.partialorder %v6356_v60, 0.0 }
 0x220   : > { %v1371_v27 = vmin.f32 %v6365_v50, 0.0  ;;  %4104 = vrot.lane.b32.xlu0 %v6115_v1, %s4715_s13  ;;  %v1269_v14 = vadd.f32 %v1268_v10, %v6087_v31  ;;  %4064 = vrot.lane.b32.xlu1 %v6236_v58, %s4716_s14  ;;  %vm1339_vm1 = vcmp.gt.f32.partialorder %v6365_v50, 0.0 }
 0x221   : > { %v1406_v49 = vmul.f32 1.442695, %v1370_v9  ;;  %v1378_v38 = vmin.f32 %v1267_v13, 0.0  ;;  %vm1346_vm6 = vcmp.gt.f32.partialorder %v1267_v13, 0.0 }
 0x222   : > { %v1408_v19 = vmul.f32 1.442695, %v1371_v27  ;;  %v1379_v61 = vmin.f32 %v1269_v14, 0.0  ;;  %vm1347_vm0 = vcmp.gt.f32.partialorder %v1269_v14, 0.0 }
 0x223   : > { %4568 = vpow2.f32 %v1406_v49  ;;  %v1422_v7 = vmul.f32 1.442695, %v1378_v38 }
 0x224   : > { %4570 = vpow2.f32 %v1408_v19  ;;  %v1424_v11 = vmul.f32 1.442695, %v1379_v61  ;;  %4129 = vrot.lane.b32.xlu0 %v6286_v41, %s4719_s27  ;;  %v1272_v10 = vpop.f32.mrb[12].mxu0  ;;  %4074 = vrot.lane.b32.xlu1 %v6236_v58, %s4717_s15 }
 0x225   : > { %4572 = vpow2.f32 %v1422_v7  ;;  %v1273_v31 = vadd.f32 %v1272_v10, %v6093_v37  ;;  %v1274_v9 = vpop.f32.mrb[13].mxu0 }
 0x226   : > { %4574 = vpow2.f32 %v1424_v11  ;;  %v1275_v27 = vadd.f32 %v1274_v9, %v6093_v37  ;;  %v1276_v12 = vpop.f32.mrb[14].mxu0 }
 0x227   : > { %v1386_v24 = vmin.f32 %v1273_v31, 0.0  ;;  %v1277_v49 = vadd.f32 %v1276_v12, %v6095_v44  ;;  %v1278_v38 = vpop.f32.mrb[15].mxu0  ;;  %vm1354_vm2 = vcmp.gt.f32.partialorder %v1273_v31, 0.0 }
 0x228   : > { %v1387_v61 = vmin.f32 %v1275_v27, 0.0  ;;  %4134 = vrot.lane.b32.xlu0 %v6137_v32, %s4719_s27  ;;  %v1279_v7 = vadd.f32 %v1278_v38, %v6095_v44  ;;  %4109 = vrot.lane.b32.xlu1 %v6249_v6, %s4716_s14  ;;  %vm1355_vm15 = vcmp.gt.f32.partialorder %v1275_v27, 0.0 }
 0x229   : > { %v1438_v19 = vmul.f32 1.442695, %v1386_v24  ;;  %v1394_v10 = vmin.f32 %v1277_v49, 0.0 }
 0x22a   : > { %v1440_v4 = vmul.f32 1.442695, %v1387_v61  ;;  %v1395_v11 = vmin.f32 %v1279_v7, 0.0 }
 0x22b   : > { %4576 = vpow2.f32 %v1438_v19  ;;  %v1454_v37 = vmul.f32 1.442695, %v1394_v10 }
 0x22c   : > { %4578 = vpow2.f32 %v1440_v4  ;;  %v1456_v9 = vmul.f32 1.442695, %v1395_v11  ;;  %4139 = vrot.lane.b32.xlu0 %v6286_v41, %s4714_s12  ;;  %4114 = vrot.lane.b32.xlu1 %v6115_v1, %s4716_s14 }
 0x22d   : > { %v4569_v12 = vpop.eup %4568  ;;  %4580 = vpow2.f32 %v1454_v37 }
 0x22e   : > { %v4571_v28 = vpop.eup %4570  ;;  %v3308_v51 = vadd.f32 -1.0, %v4569_v12  ;;  %4582 = vpow2.f32 %v1456_v9 }
 0x22f   : > { %v4573_v44 = vpop.eup %4572  ;;  %v3309_v24 = vadd.f32 -1.0, %v4571_v28 }
 0x230   : > { %v4575_v38 = vpop.eup %4574  ;;  %v3316_v61 = vadd.f32 -1.0, %v4573_v44  ;;  %4144 = vrot.lane.b32.xlu0 %v6137_v32, %s4714_s12  ;;  %v6408_v19 = vsel %vm1338_vm13, %v6356_v60, %v3308_v51  ;;  %4119 = vrot.lane.b32.xlu1 %v6249_v6, %s4717_s15  ;;  %vm1362_vm13 = vcmp.gt.f32.partialorder %v1277_v49, 0.0 }
 0x231   : > { %v3317_v4 = vadd.f32 -1.0, %v4575_v38  ;;  %8946 = vst [vmem:[#allocation53_spill] sm:$0xff] %v6408_v19  ;;  %v6411_v10 = vsel %vm1339_vm1, %v6365_v50, %v3309_v24  ;;  %vm1363_vm1 = vcmp.gt.f32.partialorder %v1279_v7, 0.0 }
 0x232   : > { %8947 = vst [vmem:[#allocation54_spill] sm:$0xff] %v6411_v10  ;;  %v6413_v11 = vsel %vm1346_vm6, %v1267_v13, %v3316_v61  ;;  %vm8609_vm6 = vcmask 785408  }
 0x233   : > { %8948 = vst [vmem:[#allocation55_spill] sm:$0xff] %v6413_v11  ;;  %v6417_v28 = vsel %vm1347_vm0, %v1269_v14, %v3317_v4  ;;  %v6421_v37 = vpack.i.bf16 %v6413_v11, %v6408_v19  ;;  %vm8635_vm0 = vcmp.lt.s32.totalorder %v5064_v18, 6 }
 0x234   : > { %8949 = vst [vmem:[#allocation56_spill] sm:$0xff] %v6417_v28  ;;  %4149 = vrot.lane.b32.xlu0 %v6286_v41, %s4715_s13  ;;  %v6427_v51 = vpack.i.bf16 %v6417_v28, %v6411_v10  ;;  %4124 = vrot.lane.b32.xlu1 %v6115_v1, %s4717_s15 }
 0x235   : > { %v4577_v60 = vpop.eup %4576 }
 0x236   : > { %v4579_v13 = vpop.eup %4578  ;;  %v3324_v50 = vadd.f32 -1.0, %v4577_v60 }
 0x237   : > { %v4581_v12 = vpop.eup %4580  ;;  %v3325_v44 = vadd.f32 -1.0, %v4579_v13 }
 0x238   : > { %v4583_v24 = vpop.eup %4582  ;;  %v3332_v38 = vadd.f32 -1.0, %v4581_v12  ;;  %4154 = vrot.lane.b32.xlu0 %v6137_v32, %s4715_s13  ;;  %v6437_v4 = vsel %vm1354_vm2, %v1273_v31, %v3324_v50  ;;  %4159 = vrot.lane.b32.xlu1 %v6137_v32, %s4716_s14  ;;  %vm1628_vm2 = vcmp.ge.s32.totalorder %v5252_v55, 6 }
 0x239   : > { %v3333_v61 = vadd.f32 -1.0, %v4583_v24  ;;  %8950 = vst [vmem:[#allocation57_spill] sm:$0xff] %v6437_v4  ;;  %v6439_v60 = vsel %vm1355_vm15, %v1275_v27, %v3325_v44  ;;  %vm6556_vm15 = vmpackc.low %vm1628_vm2, %vm1628_vm2 }
 0x23a   : > { %8951 = vst [vmem:[#allocation58_spill] sm:$0xff] %v6439_v60  ;;  %v6441_v47 = vsel %vm1362_vm13, %v1277_v49, %v3332_v38  ;;  %vm1630_vm13 = vcmp.ge.s32.totalorder %v5072_v22, 6 }
 0x23b   : > { %8952 = vst [vmem:[#allocation59_spill] sm:$0xff] %v6441_v47  ;;  %v6445_v13 = vsel %vm1363_vm1, %v1279_v7, %v3333_v61  ;;  %v6449_v12 = vpack.i.bf16 %v6441_v47, %v6437_v4  ;;  %vm1629_vm1 = vcmp.ge.s32.totalorder %v5074_v23, 6  ;;  %vm6586_vm2 = vmpackc.low %vm1630_vm13, %vm1630_vm13  ;;  %vm8967_vm13 = vcmp.lt.s32.totalorder %v5064_v18, 126 }
 0x23c   : > { %8953 = vst [vmem:[#allocation60_spill] sm:$0xff] %v6445_v13  ;;  %4164 = vrot.lane.b32.xlu0 %v6286_v41, %s4716_s14  ;;  %v6455_v31 = vpack.i.bf16 %v6445_v13, %v6439_v60  ;;  %4169 = vrot.lane.b32.xlu1 %v6137_v32, %s4717_s15 }
 0x240   : > { %4204 = vrot.lane.b32.xlu0 %v6292_v16, %s4716_s14  ;;  %4174 = vrot.lane.b32.xlu1 %v6292_v16, %s4719_s27 }
 0x244   : > { %4209 = vrot.lane.b32.xlu0 %v6141_v3, %s4716_s14  ;;  %4179 = vrot.lane.b32.xlu1 %v6141_v3, %s4719_s27 }
 0x248   : > { %4214 = vrot.lane.b32.xlu0 %v6292_v16, %s4717_s15  ;;  %4184 = vrot.lane.b32.xlu1 %v6292_v16, %s4714_s12 }
 0x24c   : > { %4219 = vrot.lane.b32.xlu0 %v6141_v3, %s4717_s15  ;;  %4189 = vrot.lane.b32.xlu1 %v6141_v3, %s4714_s12 }
 0x250   : > { %4224 = vrot.lane.b32.xlu0 %v6421_v37, %s4716_s14  ;;  %4194 = vrot.lane.b32.xlu1 %v6292_v16, %s4715_s13 }
 0x254   : > { %4229 = vrot.lane.b32.xlu0 %v6421_v37, %s4717_s15  ;;  %4199 = vrot.lane.b32.xlu1 %v6141_v3, %s4715_s13 }
 0x258   : > { %4259 = vrot.lane.b32.xlu0 %v6351_v57, %s4719_s27  ;;  %4234 = vrot.lane.b32.xlu1 %v6319_v52, %s4719_s27 }
 0x25c   : > { %4264 = vrot.lane.b32.xlu0 %v6286_v41, %s4717_s15  ;;  %4239 = vrot.lane.b32.xlu1 %v6319_v52, %s4714_s12 }
 0x260   : > { %4274 = vrot.lane.b32.xlu0 %v6351_v57, %s4714_s12  ;;  %4244 = vrot.lane.b32.xlu1 %v6319_v52, %s4715_s13 }
 0x264   : > { %4279 = vrot.lane.b32.xlu0 %v6111_v21, %s4720_s28  ;;  %4249 = vrot.lane.b32.xlu1 %v6449_v12, %s4716_s14  ;;  %v6515_v21 = vpop.permute.xlu0 %4059 }
 0x268   : > { %4289 = vrot.lane.b32.xlu0 %v6351_v57, %s4715_s13  ;;  %4254 = vrot.lane.b32.xlu1 %v6449_v12, %s4717_s15  ;;  %v6523_v7 = vpop.permute.xlu0 %4069 }
 0x269   : > { %v8973_v25 = vunpack.i.l.bf16 %v6523_v7 }
 0x26c   : > { %4294 = vrot.lane.b32.xlu0 %v6421_v37, %s4720_s28  ;;  %4269 = vrot.lane.b32.xlu1 %v6249_v6, %s4720_s28 }
 0x270   : > { %4304 = vrot.lane.b32.xlu0 %v6292_v16, %s4720_s28  ;;  %4284 = vrot.lane.b32.xlu1 %v6115_v1, %s4720_s28 }
 0x274   : > { %4314 = vrot.lane.b32.xlu0 %v6141_v3, %s4720_s28  ;;  %4299 = vrot.lane.b32.xlu1 %v6236_v58, %s4720_s28  ;;  %v6536_v58 = vld [vmem:[%s8456_s2 + $0x4] ss:$8 sps:$4 sm:$0xff]  }
 0x275   : > { %8954 = vst [vmem:[#allocation61_spill] sm:$0xff] %v6536_v58  ;;  %3486 = vmatprep.mubr.msk.bf16.mxu1 %vm8609_vm6, %v6536_v58  ;;  %3412 = vmatprep.mubr.msk.bf16.mxu0 %vm8609_vm6, %v6536_v58  ;;  %vm6594_vm6 = vmpackc.low %vm1629_vm1, %vm1629_vm1 }
 0x276   : > { %vm8969_vm1 = vmmov %vm8967_vm13 }
 0x278   : > { %4324 = vrot.lane.b32.xlu0 %v6286_v41, %s4720_s28  ;;  %4309 = vrot.lane.b32.xlu1 %v6137_v32, %s4720_s28 }
 0x27a   : > { %v6529_v1 = vpop.permute.xlu1 %4029 }
 0x27b   : > { %v8607_v6 = vunpack.i.h.bf16 %v6529_v1  ;;  %v8606_v3 = vunpack.i.l.bf16 %v6529_v1 }
 0x27c   : > { %4334 = vrot.lane.b32.xlu0 %v6427_v51, %s4719_s27  ;;  %4319 = vrot.lane.b32.xlu1 %v6449_v12, %s4720_s28 }
 0x27e   : > { %v4080_v41 = vpop.permute.xlu0 %4079  ;;  %v4035_v50 = vpop.permute.xlu1 %4034 }
 0x27f   : > { %v4082_v32 = vunpack.i.h.bf16 %v4080_v41  ;;  %v4081_v16 = vunpack.i.l.bf16 %v4080_v41  ;;  %v4037_v38 = vunpack.i.h.bf16 %v4035_v50  ;;  %v4036_v61 = vunpack.i.l.bf16 %v4035_v50 }
 0x280   : > { %4344 = vrot.lane.b32.xlu0 %v6449_v12, %s4719_s27  ;;  %4329 = vrot.lane.b32.xlu1 %v6421_v37, %s4719_s27 }
 0x281   : > { %v1619_v44 = vsel %vm8635_vm0, %v8606_v3, %v4081_v16  ;;  %v1620_v24 = vsel %vm8635_vm0, %v8607_v6, %v4082_v32  ;;  %v1616_v50 = vsel %vm8635_vm0, %v4082_v32, %v4037_v38  ;;  %v1615_v3 = vsel %vm8635_vm0, %v4081_v16, %v4036_v61 }
 0x282   : > { %v3341_v49 = vpack.c.bf16 %v1620_v24, %v1619_v44  ;;  %v6560_v27 = vpop.permute.xlu0 %4084  ;;  %v6576_v44 = vpop.permute.xlu1 %4039 }
 0x283   : > { %8957 = vst [vmem:[#allocation62_spill] sm:$0xff] %v6560_v27  ;;  %v8611_v9 = vunpack.i.h.bf16 %v6560_v27  ;;  %v8610_v14 = vunpack.i.l.bf16 %v6560_v27 }
 0x284   : > { %4349 = vrot.lane.b32.xlu0 %v6347_v15, %s4719_s27  ;;  %3342 = vmatprep.subr.msk.bf16.mxu0 %vm6556_vm15, %v3341_v49 }
 0x285   : > { %v1611_v24 = vsel %vm8635_vm0, %v4036_v61, %v8610_v14  ;;  %v1612_v32 = vsel %vm8635_vm0, %v4037_v38, %v8611_v9  ;;  %4339 = vrot.lane.b32.xlu1 %v6315_v48, %s4719_s27  ;;  %v3418_v61 = vpack.c.bf16 %v1616_v50, %v1615_v3 }
 0x286   : > { %v3415_v6 = vpack.c.bf16 %v1612_v32, %v1611_v24  ;;  %v6590_v4 = vpop.permute.xlu0 %4089  ;;  %v6602_v38 = vpop.permute.xlu1 %4044 }
 0x287   : > { %v4047_v0 = vunpack.i.h.bf16 %v6602_v38  ;;  %v4091_v36 = vunpack.i.l.bf16 %v6590_v4 }
 0x288   : > { %4359 = vrot.lane.b32.xlu0 %v6427_v51, %s4714_s12  ;;  %3416 = vmatprep.subr.msk.bf16.mxu1 %vm6586_vm2, %v3415_v6 }
 0x289   : > { %3419 = vmatpush1.bf16.msk.msra.mxu1 %vm6594_vm6, %v3418_v61  ;;  %4354 = vrot.lane.b32.xlu1 %v6421_v37, %s4714_s12 }
 0x28a   : > { %v6606_v24 = vpop.permute.xlu0 %4094  ;;  %v6612_v3 = vpop.permute.xlu1 %4049 }
 0x28b   : > { %8962 = vst [vmem:[#allocation63_spill] sm:$0xff] %v6606_v24 }
 0x28c   : > { %4369 = vrot.lane.b32.xlu0 %v6449_v12, %s4714_s12 }
 0x28d   : > { %4364 = vrot.lane.b32.xlu1 %v6315_v48, %s4714_s12 }
 0x28e   : > { %v6614_v50 = vpop.permute.xlu0 %4099  ;;  %v6620_v6 = vpop.permute.xlu1 %4054 }
 0x290   : > { %4374 = vrot.lane.b32.xlu0 %v6347_v15, %s4714_s12 }
 0x291   : > { %4379 = vrot.lane.b32.xlu1 %v6421_v37, %s4715_s13 }
 0x292   : > { %v6622_v32 = vpop.permute.xlu0 %4104  ;;  %v6628_v61 = vpop.permute.xlu1 %4064 }
 0x293   : > { %8963 = vst [vmem:[#allocation64_spill] sm:$0xff] %v6622_v32  ;;  %8964 = vst [vmem:[#allocation65_spill] sm:$0xff] %v6628_v61  ;;  %v8625_v60 = vunpack.i.h.bf16 %v6628_v61  ;;  %v8623_v13 = vunpack.i.l.bf16 %v6628_v61 }
 0x294   : > { %4384 = vrot.lane.b32.xlu0 %v6427_v51, %s4715_s13 }
 0x295   : > { %4389 = vrot.lane.b32.xlu1 %v6455_v31, %s4719_s27 }
 0x296   : > { %v6630_v14 = vpop.permute.xlu0 %4129  ;;  %v6636_v9 = vpop.permute.xlu1 %4074 }
 0x297   : > { %8965 = vst [vmem:[#allocation66_spill] sm:$0xff] %v6636_v9  ;;  %v8978_v30 = vunpack.i.h.bf16 %v6636_v9 }
 0x298   : > { %4399 = vrot.lane.b32.xlu0 %v6449_v12, %s4715_s13 }
 0x299   : > { %4394 = vrot.lane.b32.xlu1 %v6315_v48, %s4715_s13 }
 0x29a   : > { %v6638_v47 = vpop.permute.xlu0 %4134  ;;  %v6644_v37 = vpop.permute.xlu1 %4109 }
 0x29b   : > { %8966 = vst [vmem:[#allocation67_spill] sm:$0xff] %v6644_v37  ;;  %v8626_v19 = vunpack.i.h.bf16 %v6644_v37  ;;  %v8624_v12 = vunpack.i.l.bf16 %v6644_v37 }
 0x29c   : > { %4404 = vrot.lane.b32.xlu0 %v6347_v15, %s4715_s13 }
 0x29d   : > { %4409 = vrot.lane.b32.xlu1 %v6455_v31, %s4714_s12  ;;  %v6660_v45 = vsel %vm8967_vm13, %v8623_v13, %v8624_v12  ;;  %v6668_v10 = vsel %vm8969_vm1, %v8625_v60, %v8626_v19  ;;  %v8642_v13 = vunpack.i.h.bf16 %v6523_v7  ;;  %v8647_v19 = vunpack.i.l.bf16 %v6636_v9 }
 0x29e   : > { %v6650_v11 = vpop.permute.xlu0 %4139  ;;  %8968 = vst [vmem:[#allocation68_spill] sm:$0xff] %v6660_v45  ;;  %8970 = vst [vmem:[#allocation69_spill] sm:$0xff] %v6668_v10  ;;  %v6674_v58 = vpop.permute.xlu1 %4114  ;;  %vm8971_vm13 = vcmp.lt.s32.totalorder %v5064_v18, 124  ;;  %v4136_v10 = vunpack.i.l.bf16 %v6638_v47 }
 0x29f   : > { %vm8974_vm1 = vmmov %vm8971_vm13 }
 0x2a0   : > { %4419 = vrot.lane.b32.xlu0 %v6315_v48, %s4716_s14  ;;  %vm8976_vm0 = vmmov %vm8974_vm1 }
 0x2a1   : > { %4414 = vrot.lane.b32.xlu1 %v6427_v51, %s4716_s14  ;;  %vm8979_vm9 = vmmov %vm8976_vm0 }
 0x2a2   : > { %v6676_v27 = vpop.permute.xlu0 %4144  ;;  %v4120_v60 = vpop.permute.xlu1 %4119 }
 0x2a3   : > { %v4122_v61 = vunpack.i.h.bf16 %v4120_v60  ;;  %v4121_v20 = vunpack.i.l.bf16 %v4120_v60 }
 0x2a4   : > { %4444 = vrot.lane.b32.xlu0 %v6315_v48, %s4717_s15 }
 0x2a5   : > { %4424 = vrot.lane.b32.xlu1 %v6455_v31, %s4715_s13  ;;  %v6694_v12 = vsel %vm8971_vm13, %v4122_v61, %v8642_v13  ;;  %v6700_v28 = vsel %vm8974_vm1, %v4121_v20, %v8973_v25  ;;  %v6706_v60 = vsel %vm8976_vm0, %v8647_v19, %v4121_v20  ;;  %v6712_v55 = vsel %vm8979_vm9, %v8978_v30, %v4122_v61 }
 0x2a6   : > { %v6686_v53 = vpop.permute.xlu0 %4149  ;;  %8972 = vst [vmem:[#allocation70_spill] sm:$0xff] %v6694_v12  ;;  %8975 = vst [vmem:[#allocation71_spill] sm:$0xff] %v6700_v28  ;;  %v6720_v25 = vpop.permute.xlu1 %4124  ;;  %v4046_v13 = vunpack.i.l.bf16 %v6602_v38  ;;  %v4137_v38 = vunpack.i.h.bf16 %v6638_v47  ;;  %vm8983_vm9 = vcmp.lt.s32.totalorder %v5064_v18, 4  ;;  %v8984_v28 = vunpack.i.h.bf16 %v6606_v24 }
 0x2a7   : > { %8977 = vst [vmem:[#allocation72_spill] sm:$0xff] %v6706_v60  ;;  %8980 = vst [vmem:[#allocation73_spill] sm:$0xff] %v6712_v55  ;;  %v8663_v55 = vunpack.i.l.bf16 %v6606_v24  ;;  %vm8987_vm13 = vcmp.lt.s32.totalorder %v5064_v18, 6 }
 0x2a8   : > { %4464 = vrot.lane.b32.xlu0 %v6315_v48, %s4720_s28  ;;  %vm8985_vm0 = vmmov %vm8983_vm9 }
 0x2a9   : > { %4429 = vrot.lane.b32.xlu1 %v6319_v52, %s4716_s14  ;;  %v1763_v12 = vsel %vm8983_vm9, %v4046_v13, %v8663_v55  ;;  %v1764_v5 = vsel %vm8985_vm0, %v4047_v0, %v8984_v28  ;;  %vm8989_vm1 = vmmov %vm8987_vm13 }
 0x2aa   : > { %v6722_v46 = vpop.permute.xlu0 %4154  ;;  %v6728_v30 = vpop.permute.xlu1 %4159  ;;  %vm8991_vm9 = vmmov %vm8989_vm1  ;;  %v3427_v56 = vpack.c.bf16 %v1764_v5, %v1763_v12 }
 0x2ab   : > { %vm8993_vm0 = vmmov %vm8989_vm1  ;;  %v4157_v16 = vunpack.i.h.bf16 %v6722_v46 }
 0x2ac   : > { %4479 = vrot.lane.b32.xlu0 %v6455_v31, %s4716_s14 }
 0x2ad   : > { %4434 = vrot.lane.b32.xlu1 %v6347_v15, %s4716_s14 }
 0x2ae   : > { %v6730_v20 = vpop.permute.xlu0 %4164  ;;  %v6736_v48 = vpop.permute.xlu1 %4169 }
 0x2af   : > { %8981 = vst [vmem:[#allocation74_spill] sm:$0xff] %v6730_v20  ;;  %v4092_v20 = vunpack.i.h.bf16 %v6590_v4 }
 0x2b0   : > { %4484 = vrot.lane.b32.xlu0 %v6351_v57, %s4716_s14 }
 0x2b1   : > { %4439 = vrot.lane.b32.xlu1 %v6427_v51, %s4717_s15 }
 0x2b2   : > { %v6738_v61 = vpop.permute.xlu0 %4204  ;;  %v6744_v19 = vpop.permute.xlu1 %4174 }
 0x2b3   : > { %v8986_v47 = vunpack.i.h.bf16 %v6744_v19  ;;  %v8988_v59 = vunpack.i.l.bf16 %v6744_v19 }
 0x2b4   : > { %4489 = vrot.lane.b32.xlu0 %v6455_v31, %s4717_s15 }
 0x2b5   : > { %4449 = vrot.lane.b32.xlu1 %v6319_v52, %s4717_s15  ;;  %v1618_v63 = vsel %vm8987_vm13, %v8986_v47, %v4137_v38  ;;  %vm8994_vm13 = vcmp.lt.s32.totalorder %v5064_v18, 4 }
 0x2b6   : > { %v6748_v9 = vpop.permute.xlu0 %4209  ;;  %v6758_v45 = vpop.permute.xlu1 %4179  ;;  %v1768_v39 = vsel %vm8994_vm13, %v4092_v20, %v4047_v0  ;;  %v4057_v0 = vunpack.i.h.bf16 %v6620_v6 }
 0x2b7   : > { %v8990_v55 = vunpack.i.h.bf16 %v6758_v45  ;;  %v8992_v28 = vunpack.i.l.bf16 %v6758_v45 }
 0x2b8   : > { %4494 = vrot.lane.b32.xlu0 %v6351_v57, %s4717_s15 }
 0x2b9   : > { %4454 = vrot.lane.b32.xlu1 %v6347_v15, %s4717_s15  ;;  %v1614_v24 = vsel %vm8991_vm9, %v4137_v38, %v8990_v55  ;;  %v1613_v26 = vsel %vm8993_vm0, %v4136_v10, %v8992_v28  ;;  %v4102_v28 = vunpack.i.h.bf16 %v6614_v50 }
 0x2ba   : > { %v6764_v60 = vpop.permute.xlu0 %4214  ;;  %v6796_v47 = vpop.permute.xlu1 %4184 }
 0x2bb   : > { %8982 = vst [vmem:[#allocation75_spill] sm:$0xff] %v6764_v60  ;;  %v1617_v60 = vsel %vm8989_vm1, %v8988_v59, %v4136_v10  ;;  %v3421_v59 = vpack.c.bf16 %v1614_v24, %v1613_v26  ;;  %vm8995_vm1 = vmmov %vm8994_vm13  ;;  %v4056_v10 = vunpack.i.l.bf16 %v6620_v6  ;;  %v8673_v38 = vunpack.i.h.bf16 %v6796_v47  ;;  %v2429_v6 = vld [vmem:[%s8458_s4 + $0x8] sm:$0xff] }
 0x2bc   : > { %4499 = vrot.lane.b32.xlu0 %v6455_v31, %s4720_s28  ;;  %v1767_v4 = vsel %vm8995_vm1, %v4091_v36, %v4046_v13  ;;  %v3424_v37 = vpack.c.bf16 %v1618_v63, %v1617_v60  ;;  %v8671_v31 = vunpack.i.l.bf16 %v6622_v32  ;;  %v8672_v26 = vunpack.i.l.bf16 %v6796_v47  ;;  %vm8999_vm9 = vmmov %vm8995_vm1 }
 0x2bd   : > { %4459 = vrot.lane.b32.xlu1 %v6427_v51, %s4720_s28  ;;  %3422 = vmatprep.subr.msk.bf16.mxu1 %vm6586_vm2, %v3421_v59  ;;  %v8674_v63 = vunpack.i.h.bf16 %v6622_v32  ;;  %v4147_v13 = vunpack.i.h.bf16 %v6676_v27  ;;  %v4146_v24 = vunpack.i.l.bf16 %v6676_v27  ;;  %v3430_v12 = vpack.c.bf16 %v1768_v39, %v1767_v4  ;;  %vm8998_vm2 = vmmov %vm8995_vm1 }
 0x2be   : > { %v6802_v55 = vpop.permute.xlu0 %4219  ;;  %3425 = vmatpush1.bf16.msk.msra.mxu1 %vm6594_vm6, %v3424_v37  ;;  %v6818_v5 = vpop.permute.xlu1 %4189  ;;  %vm8997_vm6 = vcmp.lt.s32.totalorder %v5064_v18, 2  ;;  %vm9001_vm13 = vmmov %vm8995_vm1  ;;  %v9014_v32 = vunpack.i.l.bf16 %v6612_v3 }
 0x2bf   : > { %3428 = vmatprep.subr.msk.bf16.mxu1 %vm5111_vm4, %v3427_v56  ;;  %v8675_v49 = vunpack.i.h.bf16 %v6818_v5  ;;  %v8676_v37 = vunpack.i.l.bf16 %v6818_v5  ;;  %v1907_v56 = vsel %vm8997_vm6, %v4056_v10, %v8671_v31  ;;  %v1770_v27 = vsel %vm8998_vm2, %v8673_v38, %v4147_v13  ;;  %vm9000_vm0 = vmmov %vm8997_vm6 }
 0x2c0   : > { %4504 = vrot.lane.b32.xlu0 %v6351_v57, %s4720_s28  ;;  %v8677_v57 = vunpack.i.l.bf16 %v6576_v44  ;;  %v1769_v39 = vsel %vm8999_vm9, %v8672_v26, %v4146_v24  ;;  %v4101_v38 = vunpack.i.l.bf16 %v6614_v50  ;;  %vm9003_vm6 = vmmov %vm8995_vm1 }
 0x2c1   : > { %4469 = vrot.lane.b32.xlu1 %v6319_v52, %s4720_s28  ;;  %v1908_v52 = vsel %vm9000_vm0, %v4057_v0, %v8674_v63  ;;  %v1766_v59 = vsel %vm9001_vm13, %v4147_v13, %v8675_v49  ;;  %v1765_v4 = vsel %vm8995_vm1, %v4146_v24, %v8676_v37  ;;  %v2431_v63 = vld [vmem:[%s8458_s4 + $0x18] sm:$0xff]  ;;  %v9004_v24 = vunpack.i.h.bf16 %v6576_v44  ;;  %vm9005_vm2 = vmmov %vm8995_vm1 }
 0x2c2   : > { %v6831_v60 = vpop.permute.xlu0 %4224  ;;  %3431 = vmatpush1.bf16.msk.msra.mxu1 %vm5117_vm5, %v3430_v12  ;;  %v6862_v26 = vpop.permute.xlu1 %4194  ;;  %v3433_v51 = vpack.c.bf16 %v1766_v59, %v1765_v4  ;;  %v6872_v13 = vsel %vm9003_vm6, %v8677_v57, %v4091_v36  ;;  %vm9006_vm9 = vmmov %vm9000_vm0  ;;  %v3436_v12 = vpack.c.bf16 %v1770_v27, %v1769_v39  ;;  %v1911_v4 = vsel %vm9000_vm0, %v4101_v38, %v4056_v10 }
 0x2c3   : > { %v1912_v50 = vsel %vm9006_vm9, %v4102_v28, %v4057_v0  ;;  %v3439_v36 = vpack.c.bf16 %v1908_v52, %v1907_v56  ;;  %v8678_v49 = vunpack.i.h.bf16 %v6862_v26  ;;  %v8679_v37 = vunpack.i.l.bf16 %v6862_v26  ;;  %vm9011_vm1 = vmmov %vm9000_vm0 }
 0x2c4   : > { %2439 = vperm.xlu0 %4026, %v2429_v6   ;;  %v6878_v6 = vsel %vm9005_vm2, %v9004_v24, %v4092_v20  ;;  %3434 = vmatprep.subr.msk.bf16.mxu1 %vm5111_vm4, %v3433_v51  ;;  %v2428_v20 = vld [vmem:[%s8458_s4] sm:$0xff]  ;;  %vm1627_vm13 = vcmp.ge.s32.totalorder %v5064_v18, 6  ;;  %v4156_v56 = vunpack.i.l.bf16 %v6722_v46  ;;  %v3442_v31 = vpack.c.bf16 %v1912_v50, %v1911_v4  ;;  %vm9009_vm4 = vmmov %vm9000_vm0  ;;  %v2430_v4 = vld [vmem:[%s8458_s4 + $0x10] sm:$0xff] }
 0x2c5   : > { %4474 = vrot.lane.b32.xlu1 %v6347_v15, %s4720_s28  ;;  %v4132_v10 = vunpack.i.h.bf16 %v6630_v14  ;;  %v4117_v57 = vunpack.i.h.bf16 %v6674_v58  ;;  %v1914_v46 = vsel %vm9009_vm4, %v8678_v49, %v4157_v16  ;;  %vm9012_vm6 = vmmov %vm9000_vm0  ;;  %vm9021_vm4 = vcmp.lt.s32.totalorder %v5064_v18, 6 }
 0x2c6   : > { %v6882_v59 = vpop.permute.xlu0 %4229  ;;  %3437 = vmatpush1.bf16.msk.msra.mxu1 %vm5117_vm5, %v3436_v12  ;;  %v6899_v15 = vpop.permute.xlu1 %4199  ;;  %vm9010_vm5 = vmmov %vm9000_vm0  ;;  %v9053_v39 = vpack.c.bf16 %v6131_v34, %v6124_v62  ;;  %v9057_v62 = vunpack.i.h.bf16 %v6523_v7 }
 0x2c7   : > { %9007 = vst [vmem:[#allocation4_spill] sm:$0xff] %v6899_v15  ;;  %3440 = vmatprep.subr.msk.bf16.mxu1 %vm5171_vm8, %v3439_v36  ;;  %v8682_v52 = vunpack.i.h.bf16 %v6899_v15  ;;  %v8683_v24 = vunpack.i.l.bf16 %v6899_v15  ;;  %v1913_v50 = vsel %vm9010_vm5, %v8679_v37, %v4156_v56  ;;  %v4131_v36 = vunpack.i.l.bf16 %v6630_v14  ;;  %vm9015_vm2 = vmmov %vm9000_vm0 }
 0x2c8   : > { %2449 = vperm.xlu0 %4026, %v2431_v63   ;;  %vm9017_vm9 = vmmov %vm9000_vm0  ;;  %vm9019_vm0 = vcmp.lt.s32.totalorder %v5064_v18, 126  ;;  %v4141_v15 = vunpack.i.l.bf16 %v6650_v11 }
 0x2c9   : > { %2434 = vperm.xlu1 %4027, %v2428_v20   ;;  %v4116_v20 = vunpack.i.l.bf16 %v6674_v58  ;;  %v1910_v27 = vsel %vm9011_vm1, %v4157_v16, %v8682_v52  ;;  %v1909_v49 = vsel %vm9012_vm6, %v4156_v56, %v8683_v24  ;;  %v6948_v16 = vsel %vm9015_vm2, %v9014_v32, %v4101_v38  ;;  %vm9023_vm5 = vmmov %vm9021_vm4 }
 0x2ca   : > { %v6912_v12 = vpop.permute.xlu0 %4259  ;;  %3443 = vmatpush1.bf16.msk.msra.mxu1 %vm5188_vm10, %v3442_v31  ;;  %v6939_v37 = vpop.permute.xlu1 %4234  ;;  %v3445_v51 = vpack.c.bf16 %v1910_v27, %v1909_v49  ;;  %v9016_v56 = vunpack.i.h.bf16 %v6612_v3  ;;  %v3448_v52 = vpack.c.bf16 %v1914_v46, %v1913_v50  ;;  %v9018_v24 = vunpack.i.h.bf16 %v6515_v21  ;;  %vm9025_vm1 = vmmov %vm9021_vm4 }
 0x2cb   : > { %v8686_v58 = vunpack.i.l.bf16 %v6912_v12  ;;  %v8684_v63 = vunpack.i.h.bf16 %v6939_v37  ;;  %v8685_v49 = vunpack.i.l.bf16 %v6939_v37  ;;  %v9020_v32 = vunpack.i.h.bf16 %v6744_v19  ;;  %vm9027_vm6 = vmmov %vm9019_vm0 }
 0x2cc   : > { %v6954_v31 = vsel %vm9017_vm9, %v9016_v56, %v4102_v28  ;;  %v6963_v14 = vsel %vm9019_vm0, %v9018_v24, %v4117_v57  ;;  %v9022_v28 = vunpack.i.l.bf16 %v6744_v19  ;;  %v9024_v50 = vunpack.i.h.bf16 %v6529_v1  ;;  %3446 = vmatprep.subr.msk.bf16.mxu1 %vm5171_vm8, %v3445_v51  ;;  %vm9029_vm2 = vmmov %vm9025_vm1 }
 0x2cd   : > { %2444 = vperm.xlu1 %4027, %v2430_v4   ;;  %v1622_v38 = vsel %vm9021_vm4, %v4132_v10, %v9020_v32  ;;  %v9026_v24 = vunpack.i.l.bf16 %v6515_v21  ;;  %vm7002_vm8 = vmpackc.low %vm1627_vm13, %vm1627_vm13  ;;  %v4142_v19 = vunpack.i.h.bf16 %v6650_v11  ;;  %vm9042_vm4 = vcmp.lt.s32.totalorder %v5064_v18, 4 }
 0x2ce   : > { %v6957_v27 = vpop.permute.xlu0 %4264  ;;  %v1621_v46 = vsel %vm9023_vm5, %v4131_v36, %v9022_v28  ;;  %v1624_v4 = vsel %vm9025_vm1, %v8684_v63, %v9024_v50  ;;  %v9028_v28 = vunpack.i.l.bf16 %v6529_v1  ;;  %3449 = vmatpush1.bf16.msk.msra.mxu1 %vm5188_vm10, %v3448_v52  ;;  %v6997_v51 = vpop.permute.xlu1 %4239  ;;  %vm9032_vm9 = vmmov %vm9025_vm1  ;;  %v9035_v63 = vpack.c.bf16 %v6107_v54, %v6103_v2 }
 0x2cf   : > { %v6985_v56 = vsel %vm9027_vm6, %v9026_v24, %v4116_v20  ;;  %v1625_v1 = vsel %vm9032_vm9, %v8686_v58, %v4131_v36  ;;  %v9033_v24 = vunpack.i.h.bf16 %v6912_v12  ;;  %vm9034_vm0 = vmmov %vm9025_vm1  ;;  %v3347_v32 = vpack.c.bf16 %v1622_v38, %v1621_v46 }
 0x2d0   : > { %v1623_v50 = vsel %vm9029_vm2, %v8685_v49, %v9028_v28  ;;  %v4242_v28 = vunpack.i.h.bf16 %v6997_v51  ;;  %2542 = vmatprep.subr.bf16.mxu1 %v9035_v63  ;;  %v3365_v49 = vpack.c.bf16 %v6954_v31, %v6948_v16  ;;  %v4241_v36 = vunpack.i.l.bf16 %v6997_v51  ;;  %vm9037_vm10 = vmmov %vm9027_vm6  ;;  %v9080_v31 = vld [vmem:[#allocation12_spill] sm:$0xff] }
 0x2d1   : > { %v1626_v0 = vsel %vm9034_vm0, %v9033_v24, %v4132_v10  ;;  %v3344_v52 = vpack.c.bf16 %v1624_v4, %v1623_v50  ;;  %v3454_v10 = vpack.c.bf16 %v6963_v14, %v6985_v56  ;;  %v4152_v4 = vunpack.i.h.bf16 %v6686_v53  ;;  %vm9039_vm13 = vmmov %vm9027_vm6 }
 0x2d2   : > { %v7022_v58 = vpop.permute.xlu0 %4274  ;;  %v4212_v2 = vunpack.i.h.bf16 %v6748_v9  ;;  %v4211_v54 = vunpack.i.l.bf16 %v6748_v9  ;;  %v9036_v63 = vunpack.i.l.bf16 %v6831_v60  ;;  %v9038_v46 = vunpack.i.h.bf16 %v6831_v60  ;;  %v7045_v50 = vpop.permute.xlu1 %4244  ;;  %vm9044_vm5 = vmmov %vm9042_vm4 }
 0x2d3   : > { %3345 = vmatpush1.bf16.msk.msra.mxu0 %vm7002_vm8, %v3344_v52  ;;  %v3350_v14 = vpack.c.bf16 %v1626_v0, %v1625_v1  ;;  %v9040_v56 = vpack.c.bf16 %v6105_v29, %v6101_v17  ;;  %v9041_v9 = vunpack.i.l.bf16 %v6576_v44  ;;  %v9043_v24 = vunpack.i.h.bf16 %v6576_v44  ;;  %vm9049_vm1 = vmmov %vm9042_vm4 }
 0x2d4   : > { %v2063_v38 = vsel %vm9037_vm10, %v4116_v20, %v9036_v63  ;;  %v2064_v11 = vsel %vm9039_vm13, %v4117_v57, %v9038_v46  ;;  %3348 = vmatprep.subr.msk.bf16.mxu0 %vm6556_vm15, %v3347_v32  ;;  %v8689_v57 = vunpack.i.h.bf16 %v7022_v58  ;;  %v8693_v17 = vunpack.i.l.bf16 %v7022_v58  ;;  %vm9047_vm15 = vmmov %vm9042_vm4 }
 0x2d5   : > { %2543 = vmatpush1.bf16.msra.mxu1 %v9040_v56  ;;  %v1775_v20 = vsel %vm9042_vm4, %v4241_v36, %v9041_v9  ;;  %v1776_v41 = vsel %vm9044_vm5, %v4242_v28, %v9043_v24  ;;  %v9045_v29 = vpack.c.bf16 %v6133_v40, %v6129_v33  ;;  %v4127_v32 = vunpack.i.h.bf16 %v6720_v25  ;;  %vm9050_vm2 = vmmov %vm9027_vm6 }
 0x2d6   : > { %v4126_v1 = vunpack.i.l.bf16 %v6720_v25  ;;  %v4162_v0 = vunpack.i.h.bf16 %v6728_v30  ;;  %v4161_v44 = vunpack.i.l.bf16 %v6728_v30  ;;  %v7068_v52 = vpop.permute.xlu0 %4279  ;;  %v9046_v63 = vunpack.i.h.bf16 %v6796_v47  ;;  %vm9055_vm9 = vmmov %vm9049_vm1 }
 0x2d7   : > { %2544 = vmatprep.subr.bf16.mxu1 %v9045_v29  ;;  %v9048_v56 = vunpack.i.l.bf16 %v6796_v47  ;;  %v3451_v40 = vpack.c.bf16 %v2064_v11, %v2063_v38  ;;  %v8690_v9 = vunpack.i.l.bf16 %v6882_v59  ;;  %3351 = vmatpush1.bf16.msk.msra.mxu0 %vm7002_vm8, %v3350_v14  ;;  %v8694_v47 = vunpack.i.h.bf16 %v6882_v59  ;;  %v7098_v14 = vpop.permute.xlu1 %4249  ;;  %vm9054_vm8 = vmmov %vm9049_vm1 }
 0x2d8   : > { %v1774_v46 = vsel %vm9047_vm15, %v4142_v19, %v9046_v63  ;;  %v2069_v25 = vsel %vm9027_vm6, %v4161_v44, %v4211_v54  ;;  %v2070_v24 = vsel %vm9050_vm2, %v4162_v0, %v4212_v2  ;;  %v3356_v29 = vpack.c.bf16 %v1776_v41, %v1775_v20  ;;  %vm9060_vm13 = vmmov %vm9050_vm2 }
 0x2d9   : > { %v1773_v33 = vsel %vm9049_vm1, %v4141_v15, %v9048_v56  ;;  %v9051_v38 = vpack.c.bf16 %v6878_v6, %v6872_v13  ;;  %2545 = vmatpush1.bf16.msra.mxu1 %v9053_v39  ;;  %v1777_v63 = vsel %vm9054_vm8, %v8693_v17, %v4141_v15  ;;  %v1778_v20 = vsel %vm9055_vm9, %v8689_v57, %v4142_v19  ;;  %vm9061_vm4 = vmmov %vm9050_vm2 }
 0x2da   : > { %v8691_v13 = vunpack.i.h.bf16 %v7098_v14  ;;  %v8692_v6 = vunpack.i.l.bf16 %v7098_v14  ;;  %3452 = vmatprep.subr.msk.bf16.mxu1 %vm5269_vm14, %v3451_v40  ;;  %vm9058_vm0 = vcmp.lt.s32.totalorder %v5064_v18, 124  ;;  %v3359_v56 = vpack.c.bf16 %v1774_v46, %v1773_v33  ;;  %v7118_v39 = vpop.permute.xlu0 %4289  ;;  %v9062_v33 = vld [vmem:[#allocation13_spill] sm:$0xff] }
 0x2db   : > { %3354 = vmatprep.subr.msk.bf16.mxu0 %vm5321_vm7, %v9051_v38  ;;  %v2212_v34 = vsel %vm9058_vm0, %v9057_v62, %v4127_v32  ;;  %v8695_v15 = vunpack.i.h.bf16 %v7045_v50  ;;  %v8708_v38 = vunpack.i.l.bf16 %v7045_v50  ;;  %v3460_v19 = vpack.c.bf16 %v2070_v24, %v2069_v25  ;;  %vm9059_vm10 = vmmov %vm9058_vm0 }
 0x2dc   : > { %v2207_v57 = vsel %vm9059_vm10, %v4126_v1, %v8690_v9  ;;  %v2066_v40 = vsel %vm9060_vm13, %v4212_v2, %v8691_v13  ;;  %v2065_v46 = vsel %vm9061_vm4, %v4211_v54, %v8692_v6  ;;  %vm9063_vm5 = vnez %v9062_v33  ;;  %vm9064_vm15 = vmmov %vm9058_vm0  ;;  %v9065_v2 = vld [vmem:[#allocation10_spill] sm:$0xff]  ;;  %v7143_v13 = vpop.permute.xlu1 %4254 }
 0x2dd   : > { %3357 = vmatpush1.bf16.msk.msra.mxu0 %vm9063_vm5, %v3356_v29  ;;  %v4151_v25 = vunpack.i.l.bf16 %v6686_v53  ;;  %v2208_v24 = vsel %vm9064_vm15, %v4127_v32, %v8694_v47  ;;  %v3362_v62 = vpack.c.bf16 %v1778_v20, %v1777_v63  ;;  %v3457_v9 = vpack.c.bf16 %v2066_v40, %v2065_v46  ;;  %vm9072_vm2 = vmmov %vm9058_vm0 }
 0x2de   : > { %3360 = vmatprep.subr.msk.bf16.mxu0 %vm5321_vm7, %v3359_v56  ;;  %vm9066_vm1 = vnez %v9065_v2  ;;  %v8706_v54 = vunpack.i.h.bf16 %v7118_v39  ;;  %v8707_v29 = vunpack.i.l.bf16 %v7118_v39  ;;  %v8700_v6 = vunpack.i.h.bf16 %v7143_v13  ;;  %v7163_v40 = vpop.permute.xlu0 %4294  ;;  %vm9083_vm15 = vmmov %vm9058_vm0 }
 0x2df   : > { %3455 = vmatpush1.bf16.msk.msra.mxu1 %vm9066_vm1, %v3454_v10  ;;  %v8701_v17 = vunpack.i.l.bf16 %v7143_v13  ;;  %v4222_v32 = vunpack.i.h.bf16 %v6802_v55  ;;  %v4221_v63 = vunpack.i.l.bf16 %v6802_v55  ;;  %v9067_v11 = vunpack.i.l.bf16 %v6612_v3 }
 0x2e0   : > { %vm9068_vm7 = vcmp.lt.s32.totalorder %v5064_v18, 2  ;;  %v9069_v20 = vunpack.i.h.bf16 %v6612_v3  ;;  %3458 = vmatprep.subr.msk.bf16.mxu1 %vm5269_vm14, %v3457_v9  ;;  %v9071_v55 = vunpack.i.l.bf16 %v6523_v7  ;;  %v9073_v47 = vunpack.i.h.bf16 %v6862_v26  ;;  %vm9077_vm14 = vmmov %vm9058_vm0 }
 0x2e1   : > { %v1919_v10 = vsel %vm9068_vm7, %v8708_v38, %v9067_v11  ;;  %vm9070_vm6 = vmmov %vm9068_vm7  ;;  %v9075_v11 = vunpack.i.l.bf16 %v6862_v26  ;;  %3363 = vmatpush1.bf16.msk.msra.mxu0 %vm9063_vm5, %v3362_v62  ;;  %v4172_v7 = vunpack.i.h.bf16 %v6736_v48  ;;  %v2209_v9 = vsel %vm9058_vm0, %v4221_v63, %v8701_v17  ;;  %v7199_v26 = vpop.permute.xlu1 %4269  ;;  %v9085_v62 = vld [vmem:[#allocation14_spill] sm:$0xff]  ;;  %v9133_v17 = vld [vmem:[#allocation71_spill] sm:$0xff] }
 0x2e2   : > { %v1920_v56 = vsel %vm9070_vm6, %v8695_v15, %v9069_v20  ;;  %v2211_v46 = vsel %vm9072_vm2, %v9071_v55, %v4126_v1  ;;  %vm9074_vm8 = vmmov %vm9070_vm6  ;;  %v3463_v15 = vpack.c.bf16 %v2208_v24, %v2207_v57  ;;  %v2210_v1 = vsel %vm9077_vm14, %v4222_v32, %v8700_v6  ;;  %3366 = vmatprep.subr.msk.bf16.mxu0 %vm5490_vm12, %v3365_v49  ;;  %v7214_v33 = vpop.permute.xlu0 %4304  ;;  %v9132_v6 = vld [vmem:[#allocation70_spill] sm:$0xff] }
 0x2e3   : > { %v1918_v3 = vsel %vm9074_vm8, %v4152_v4, %v9073_v47  ;;  %vm9076_vm9 = vmmov %vm9070_vm6  ;;  %3461 = vmatpush1.bf16.msk.msra.mxu1 %vm9066_vm1, %v3460_v19  ;;  %v4171_v57 = vunpack.i.l.bf16 %v6736_v48  ;;  %v3368_v47 = vpack.c.bf16 %v1920_v56, %v1919_v10  ;;  %vm9081_vm4 = vnez %v9080_v31  ;;  %v9147_v38 = vld [vmem:[#allocation26_spill] sm:$0xff] }
 0x2e4   : > { %v1917_v20 = vsel %vm9076_vm9, %v4151_v25, %v9075_v11  ;;  %vm9078_vm10 = vmmov %vm9070_vm6  ;;  %3464 = vmatprep.subr.msk.bf16.mxu1 %vm9081_vm4, %v3463_v15  ;;  %v3466_v49 = vpack.c.bf16 %v2212_v34, %v2211_v46  ;;  %v2214_v53 = vsel %vm9083_vm15, %v4172_v7, %v4222_v32  ;;  %vm9084_vm1 = vnez %v8765_v35 }
 0x2e5   : > { %v1921_v41 = vsel %vm9078_vm10, %v8707_v29, %v4151_v25  ;;  %vm9079_vm13 = vmmov %vm9070_vm6  ;;  %v3371_v19 = vpack.c.bf16 %v1918_v3, %v1917_v20  ;;  %v3469_v25 = vpack.c.bf16 %v2210_v1, %v2209_v9  ;;  %3369 = vmatpush1.bf16.msk.msra.mxu0 %vm9084_vm1, %v3368_v47  ;;  %v4281_v34 = vunpack.i.l.bf16 %v7068_v52  ;;  %v4285_v2 = vpop.permute.xlu1 %4284 }
 0x2e6   : > { %v1922_v16 = vsel %vm9079_vm13, %v8706_v54, %v4152_v4  ;;  %vm9082_vm5 = vmmov %vm9058_vm0  ;;  %v4282_v4 = vunpack.i.h.bf16 %v7068_v52  ;;  %vm9086_vm7 = vnez %v9085_v62  ;;  %vm2375_vm6 = vcmp.lt.s32.totalorder %v5072_v22, 122  ;;  %v4315_v43 = vpop.permute.xlu0 %4314  ;;  %v9100_v62 = vld [vmem:[#allocation40_spill] sm:$0xff] }
 0x2e7   : > { %v2213_v24 = vsel %vm9082_vm5, %v4171_v57, %v4221_v63  ;;  %v3374_v15 = vpack.c.bf16 %v1922_v16, %v1921_v41  ;;  %3372 = vmatprep.subr.msk.bf16.mxu0 %vm5490_vm12, %v3371_v19  ;;  %3467 = vmatpush1.bf16.msk.msra.mxu1 %vm9086_vm7, %v3466_v49  ;;  %v8697_v32 = vunpack.i.h.bf16 %v7163_v40  ;;  %v8696_v63 = vunpack.i.l.bf16 %v7163_v40  ;;  %vm7257_vm8 = vmpackc.low %vm2375_vm6, %vm2375_vm6  ;;  %v7434_v41 = vld [vmem:[%s8456_s2 + $0x14] ss:$8 sps:$4 sm:$0xff]   ;;  %v9145_v54 = vld [vmem:[#allocation72_spill] sm:$0xff] }
 0x2e8   : > { %v4287_v10 = vunpack.i.h.bf16 %v4285_v2  ;;  %v4286_v56 = vunpack.i.l.bf16 %v4285_v2  ;;  %3470 = vmatprep.subr.msk.bf16.mxu1 %vm9081_vm4, %v3469_v25  ;;  %vm2339_vm2 = vcmp.lt.s32.totalorder %v5064_v18, 122  ;;  %v3472_v55 = vpack.c.bf16 %v2214_v53, %v2213_v24 }
 0x2e9   : > { %vm2374_vm12 = vcmp.lt.s32.totalorder %v5074_v23, 122  ;;  %3375 = vmatpush1.bf16.msk.msra.mxu0 %vm9084_vm1, %v3374_v15  ;;  %v9089_v9 = vpack.c.bf16 %v6228_v42, %v6241_v8  ;;  %v7266_v47 = vpop.permute.xlu1 %4299  ;;  %v4206_v35 = vunpack.i.l.bf16 %v6738_v61  ;;  %v9092_v31 = vunpack.i.h.bf16 %v6515_v21  ;;  %v9093_v42 = vld [vmem:[#allocation67_spill] sm:$0xff] }
 0x2ea   : > { %v2353_v22 = vsel %vm2339_vm2, %v4287_v10, %v8697_v32  ;;  %v2357_v46 = vsel %vm2339_vm2, %v4282_v4, %v4287_v10  ;;  %v2352_v3 = vsel %vm2339_vm2, %v4286_v56, %v8696_v63  ;;  %v2356_v23 = vsel %vm2339_vm2, %v4281_v34, %v4286_v56  ;;  %vm7268_vm9 = vmpackc.low %vm2374_vm12, %vm2374_vm12  ;;  %v7273_v16 = vpop.permute.xlu0 %4324  ;;  %v9099_v15 = vld [vmem:[#allocation39_spill] sm:$0xff]  ;;  %v9102_v10 = vld [vmem:[#allocation44_spill] sm:$0xff] }
 0x2eb   : > { %v3475_v20 = vpack.c.bf16 %v2353_v22, %v2352_v3  ;;  %v3478_v1 = vpack.c.bf16 %v2357_v46, %v2356_v23  ;;  %2489 = vmatprep.subr.bf16.mxu0 %v9089_v9  ;;  %3473 = vmatpush1.bf16.msk.msra.mxu1 %vm9086_vm7, %v3472_v55  ;;  %v9094_v8 = vunpack.i.h.bf16 %v9093_v42  ;;  %vm9095_vm14 = vcmp.lt.s32.totalorder %v5064_v18, 126  ;;  %v9103_v56 = vld [vmem:[#allocation43_spill] sm:$0xff]  ;;  %v9119_v32 = vld [vmem:[#allocation22_spill] sm:$0xff] }
 0x2ec   : > { %v9096_v19 = vunpack.i.l.bf16 %v6515_v21  ;;  %v9097_v24 = vunpack.i.l.bf16 %v9093_v42  ;;  %vm9098_vm0 = vmmov %vm9095_vm14  ;;  %v4207_v25 = vunpack.i.h.bf16 %v6738_v61  ;;  %v9101_v2 = vpack.c.bf16 %v9099_v15, %v9100_v62  ;;  %v9105_v21 = vld [vmem:[#allocation74_spill] sm:$0xff] }
 0x2ed   : > { %3476 = vmatprep.subr.msk.bf16.mxu1 %vm7257_vm8, %v3475_v20  ;;  %v2072_v49 = vsel %vm9095_vm14, %v9094_v8, %v9092_v31  ;;  %v9104_v55 = vpack.c.bf16 %v9102_v10, %v9103_v56  ;;  %v7298_v22 = vpop.permute.xlu1 %4309  ;;  %v8704_v46 = vunpack.i.h.bf16 %v9105_v21  ;;  %v8705_v3 = vunpack.i.l.bf16 %v9105_v21  ;;  %vm9106_vm10 = vmmov %vm9098_vm0  ;;  %v9110_v8 = vld [vmem:[#allocation75_spill] sm:$0xff] }
 0x2ee   : > { %v2071_v53 = vsel %vm9098_vm0, %v9097_v24, %v9096_v19  ;;  %2490 = vmatpush1.bf16.msra.mxu0 %v9101_v2  ;;  %v2073_v61 = vsel %vm9106_vm10, %v4206_v35, %v4161_v44  ;;  %v4312_v20 = vunpack.i.h.bf16 %v7298_v22  ;;  %v4311_v9 = vunpack.i.l.bf16 %v7298_v22  ;;  %v7308_v31 = vpop.permute.xlu0 %4334  ;;  %vm9107_vm13 = vmmov %vm9098_vm0  ;;  %v9111_v19 = vld [vmem:[#allocation42_spill] sm:$0xff]  ;;  %v9112_v24 = vld [vmem:[#allocation41_spill] sm:$0xff] }
 0x2ef   : > { %2491 = vmatprep.subr.bf16.mxu0 %v9104_v55  ;;  %3479 = vmatpush1.bf16.msk.msra.mxu1 %vm7268_vm9, %v3478_v1  ;;  %v3377_v23 = vpack.c.bf16 %v2072_v49, %v2071_v53  ;;  %v2074_v1 = vsel %vm9107_vm13, %v4207_v25, %v4162_v0  ;;  %vm9108_vm4 = vmmov %vm9098_vm0  ;;  %v4217_v49 = vunpack.i.h.bf16 %v9110_v8  ;;  %v9113_v53 = vpack.c.bf16 %v9111_v19, %v9112_v24  ;;  %v9114_v2 = vld [vmem:[#allocation21_spill] sm:$0xff] }
 0x2f0   : > { %v2077_v42 = vsel %vm9108_vm4, %v8705_v3, %v4206_v35  ;;  %vm9109_vm5 = vmmov %vm9098_vm0  ;;  %v4216_v30 = vunpack.i.l.bf16 %v9110_v8  ;;  %v8703_v0 = vunpack.i.l.bf16 %v6957_v27  ;;  %v4317_v15 = vunpack.i.h.bf16 %v4315_v43  ;;  %v9144_v3 = vld [vmem:[#allocation73_spill] sm:$0xff] }
 0x2f1   : > { %v2078_v44 = vsel %vm9109_vm5, %v8704_v46, %v4207_v25  ;;  %v4316_v62 = vunpack.i.l.bf16 %v4315_v43  ;;  %vm9115_vm15 = vnez %v9114_v2  ;;  %v7330_v35 = vpop.permute.xlu1 %4319  ;;  %v8702_v10 = vunpack.i.h.bf16 %v6957_v27 }
 0x2f2   : > { %2492 = vmatpush1.bf16.msra.mxu0 %v9113_v53  ;;  %v8698_v25 = vunpack.i.h.bf16 %v7330_v35  ;;  %v8699_v56 = vunpack.i.l.bf16 %v7330_v35  ;;  %v3383_v55 = vpack.c.bf16 %v2074_v1, %v2073_v61  ;;  %v3386_v19 = vpack.c.bf16 %v2078_v44, %v2077_v42  ;;  %v9116_v44 = vld [vmem:[#allocation69_spill] sm:$0xff]  ;;  %v9117_v53 = vld [vmem:[#allocation68_spill] sm:$0xff] }
 0x2f3   : > { %3378 = vmatprep.subr.msk.bf16.mxu0 %vm9115_vm15, %v3377_v23  ;;  %v2359_v8 = vsel %vm2339_vm2, %v4312_v20, %v4317_v15  ;;  %v2358_v43 = vsel %vm2339_vm2, %v4311_v9, %v4316_v62  ;;  %v7343_v23 = vpop.permute.xlu0 %4344  ;;  %v9118_v63 = vpack.c.bf16 %v9116_v44, %v9117_v53  ;;  %vm9120_vm1 = vnez %v9119_v32 }
 0x2f4   : > { %v2355_v24 = vsel %vm2339_vm2, %v4317_v15, %v8698_v25  ;;  %v2354_v61 = vsel %vm2339_vm2, %v4316_v62, %v8699_v56  ;;  %v4347_v1 = vunpack.i.h.bf16 %v7343_v23  ;;  %v4346_v42 = vunpack.i.l.bf16 %v7343_v23 }
 0x2f5   : > { %vm9121_vm7 = vcmp.lt.s32.totalorder %v5064_v18, 124  ;;  %v3481_v44 = vpack.c.bf16 %v2355_v24, %v2354_v61  ;;  %vm9126_vm0 = vcmp.lt.s32.totalorder %v5064_v18, 6  ;;  %v9127_v2 = vunpack.i.h.bf16 %v6758_v45 }
 0x2f6   : > { %3381 = vmatpush1.bf16.msk.msra.mxu0 %vm9120_vm1, %v9118_v63  ;;  %v2217_v15 = vsel %vm9121_vm7, %v4216_v30, %v4171_v57  ;;  %vm9122_vm6 = vmmov %vm9121_vm7  ;;  %v7376_v63 = vpop.permute.xlu1 %4329  ;;  %v4272_v57 = vunpack.i.h.bf16 %v7199_v26  ;;  %v3484_v24 = vpack.c.bf16 %v2359_v8, %v2358_v43  ;;  %v9134_v11 = vpack.c.bf16 %v9132_v6, %v9133_v17 }
 0x2f7   : > { %v2218_v62 = vsel %vm9122_vm6, %v4217_v49, %v4172_v7  ;;  %vm9123_vm12 = vmmov %vm9122_vm6  ;;  %3384 = vmatprep.subr.msk.bf16.mxu0 %vm9115_vm15, %v3383_v55  ;;  %v9125_v7 = vunpack.i.l.bf16 %v6758_v45  ;;  %v7402_v53 = vpop.permute.xlu0 %4349  ;;  %3482 = vmatprep.subr.msk.bf16.mxu1 %vm7257_vm8, %v3481_v44  ;;  %v9130_v45 = vld [vmem:[#allocation8_spill] sm:$0xff]  ;;  %v9142_v46 = vunpack.i.h.bf16 %v6939_v37  ;;  %v9146_v29 = vpack.c.bf16 %v9144_v3, %v9145_v54 }
 0x2f8   : > { %v7372_v25 = vsel %vm9123_vm12, %v8703_v0, %v4216_v30  ;;  %vm9124_vm14 = vmmov %vm9122_vm6  ;;  %vm2373_vm4 = vcmp.lt.s32.totalorder %v9130_v45, 122  ;;  %v3395_v56 = vpack.c.bf16 %v2218_v62, %v2217_v15  ;;  %v4352_v8 = vunpack.i.h.bf16 %v7402_v53  ;;  %v9135_v44 = vld [vmem:[#allocation24_spill] sm:$0xff]  ;;  %3485 = vmatpush1.bf16.msk.msra.mxu1 %vm7268_vm9, %v3484_v24 }
 0x2f9   : > { %v2222_v48 = vsel %vm9124_vm14, %v8702_v10, %v4217_v49  ;;  %v7389_v30 = vsel %vm9126_vm0, %v9125_v7, %v4346_v42  ;;  %vm9128_vm10 = vmmov %vm9126_vm0  ;;  %v4271_v49 = vunpack.i.l.bf16 %v7199_v26  ;;  %v9129_v7 = vld [vmem:[#allocation15_spill] sm:$0xff]  ;;  %v4351_v43 = vunpack.i.l.bf16 %v7402_v53 }
 0x2fa   : > { %v7397_v55 = vsel %vm9128_vm10, %v9127_v2, %v4347_v1  ;;  %3387 = vmatpush1.bf16.msk.msra.mxu0 %vm9120_vm1, %v3386_v19  ;;  %vm1634_vm13 = vcmp.ge.s32.totalorder %v9129_v7, 6  ;;  %v9131_v2 = vld [vmem:[#allocation16_spill] sm:$0xff]  ;;  %v3398_v26 = vpack.c.bf16 %v2222_v48, %v7372_v25  ;;  %vm9136_vm8 = vnez %v9135_v44  ;;  %v4340_v32 = vpop.permute.xlu1 %4339  ;;  %vm9138_vm9 = vmmov %vm9126_vm0 }
 0x2fb   : > { %v3498_v61 = vpack.c.bf16 %v7397_v55, %v7389_v30  ;;  %vm1633_vm5 = vcmp.ge.s32.totalorder %v9131_v2, 6  ;;  %3390 = vmatprep.subr.msk.bf16.mxu0 %vm9136_vm8, %v9134_v11  ;;  %v7424_v19 = vld [vmem:[%s8456_s2] ss:$8 sps:$4 sm:$0xff]   ;;  %v2361_v25 = vsel %vm2339_vm2, %v4272_v57, %v4282_v4  ;;  %v4337_v15 = vunpack.i.h.bf16 %v7308_v31  ;;  %v7443_v11 = vpop.permute.xlu0 %4359  ;;  %vm9139_vm15 = vmmov %vm9126_vm0 }
 0x2fc   : > { %v4342_v17 = vunpack.i.h.bf16 %v4340_v32  ;;  %v4341_v6 = vunpack.i.l.bf16 %v4340_v32  ;;  %v2360_v62 = vsel %vm2339_vm2, %v4271_v49, %v4281_v34  ;;  %v8709_v48 = vunpack.i.h.bf16 %v7266_v47  ;;  %vm9141_vm1 = vmmov %vm9126_vm0  ;;  %2563 = vmatmul.mubr.bf16.vlgmr.msra.gmra.mrb[16].mxu1 %v7424_v19 }
 0x2fd   : > { %v8710_v24 = vunpack.i.l.bf16 %v7266_v47  ;;  %v4336_v4 = vunpack.i.l.bf16 %v7308_v31  ;;  %v9137_v32 = vunpack.i.l.bf16 %v6912_v12  ;;  %v9140_v34 = vunpack.i.l.bf16 %v6939_v37  ;;  %vm9143_vm7 = vmmov %vm9126_vm0 }
 0x2fe   : > { %v1600_v52 = vsel %vm9139_vm15, %v4337_v15, %v4342_v17  ;;  %v1596_v31 = vsel %vm9143_vm7, %v4342_v17, %v9142_v46  ;;  %vm9148_vm6 = vnez %v9147_v38  ;;  %vm7469_vm12 = vmpackc.low %vm1634_vm13, %vm1634_vm13  ;;  %v9151_v37 = vunpack.i.h.bf16 %v6912_v12  ;;  %v7485_v3 = vpop.permute.xlu1 %4354  ;;  %v7546_v38 = vld [vmem:[%s8456_s2 + $0x10] ss:$8 sps:$4 sm:$0xff]  }
 0x2ff   : > { %v1597_v10 = vsel %vm9138_vm9, %v4351_v43, %v9137_v32  ;;  %v1595_v0 = vsel %vm9141_vm1, %v4341_v6, %v9140_v34  ;;  %3393 = vmatpush1.bf16.msk.msra.mxu0 %vm9148_vm6, %v9146_v29  ;;  %v4307_v34 = vunpack.i.h.bf16 %v7214_v33  ;;  %vm9152_vm14 = vmmov %vm9126_vm0  ;;  %v1599_v54 = vsel %vm9126_vm0, %v4336_v4, %v4341_v6 }
 0x300   : > { %v1598_v46 = vsel %vm9152_vm14, %v4352_v8, %v9151_v37  ;;  %v3563_v29 = vpack.c.bf16 %v1596_v31, %v1595_v0  ;;  %3396 = vmatprep.subr.msk.bf16.mxu0 %vm9136_vm8, %v3395_v56  ;;  %vm7490_vm10 = vmpackc.low %vm2373_vm4, %vm2373_vm4  ;;  %v3401_v17 = vpack.c.bf16 %v2361_v25, %v2360_v62  ;;  %v4306_v37 = vunpack.i.l.bf16 %v7214_v33  ;;  %v7518_v62 = vpop.permute.xlu0 %4369 }
 0x301   : > { %v8712_v6 = vunpack.i.l.bf16 %v7273_v16  ;;  %v3566_v0 = vpack.c.bf16 %v1600_v52, %v1599_v54  ;;  %vm7499_vm13 = vmpackc.low %vm1633_vm5, %vm1633_vm5  ;;  %vm9157_vm8 = vcmask 785408   ;;  %v2364_v45 = vsel %vm2339_vm2, %v8710_v24, %v4271_v49 }
 0x302   : > { %3487 = vmatprep.mubr.msk.bf16.mxu1 %vm9157_vm8, %v7434_v41  ;;  %v2365_v33 = vsel %vm2339_vm2, %v8709_v48, %v4272_v57  ;;  %v8711_v44 = vunpack.i.h.bf16 %v7273_v16  ;;  %v2363_v25 = vsel %vm2339_vm2, %v4307_v34, %v4312_v20  ;;  %3564 = vmatprep.subr.msk.bf16.mxu1 %vm7469_vm12, %v3563_v29  ;;  %v2362_v49 = vsel %vm2339_vm2, %v4306_v37, %v4311_v9  ;;  %v4365_v22 = vpop.permute.xlu1 %4364  ;;  %vm7539_vm4 = vmpackc.low %vm2339_vm2, %vm2339_vm2 }
 0x303   : > { %v4332_v52 = vunpack.i.h.bf16 %v7376_v63  ;;  %v4331_v57 = vunpack.i.l.bf16 %v7376_v63  ;;  %v3569_v31 = vpack.c.bf16 %v1598_v46, %v1597_v10  ;;  %3399 = vmatpush1.bf16.msk.msra.mxu0 %vm9148_vm6, %v3398_v26  ;;  %v4372_v20 = vunpack.i.h.bf16 %v7518_v62  ;;  %3567 = vmatpush1.bf16.msk.msra.mxu1 %vm7499_vm13, %v3566_v0  ;;  %v9160_v26 = vld [vmem:[#allocation27_spill] sm:$0xff]  ;;  %vm9165_vm1 = vmmov %vm9126_vm0 }
 0x304   : > { %v4371_v54 = vunpack.i.l.bf16 %v7518_v62  ;;  %3402 = vmatprep.subr.msk.bf16.mxu0 %vm7490_vm10, %v3401_v17  ;;  %v3404_v10 = vpack.c.bf16 %v2365_v33, %v2364_v45  ;;  %v2366_v63 = vsel %vm2339_vm2, %v8712_v6, %v4306_v37  ;;  %vm1632_vm5 = vcmp.ge.s32.totalorder %v9160_v26, 6  ;;  %v7575_v45 = vpop.permute.xlu0 %4374  ;;  %vm9166_vm7 = vmmov %vm9126_vm0  ;;  %2573 = vmatmul.mubr.bf16.gmra.mrb[20].mxu1 %v7546_v38 }
 0x305   : > { %3570 = vmatprep.subr.msk.bf16.mxu1 %vm7469_vm12, %v3569_v31  ;;  %v2367_v46 = vsel %vm2339_vm2, %v8711_v44, %v4307_v34  ;;  %v3407_v29 = vpack.c.bf16 %v2363_v25, %v2362_v49  ;;  %v9161_v17 = vunpack.i.l.bf16 %v6818_v5  ;;  %vm9162_vm9 = vcmp.lt.s32.totalorder %v5064_v18, 4  ;;  %v9167_v49 = vld [vmem:[#allocation28_spill] sm:$0xff]  ;;  %vm9170_vm12 = vmmov %vm9126_vm0 }
 0x306   : > { %v9163_v32 = vunpack.i.h.bf16 %v6818_v5  ;;  %vm9164_vm15 = vmmov %vm9162_vm9  ;;  %v1604_v34 = vsel %vm9165_vm1, %v4332_v52, %v4337_v15  ;;  %v1603_v33 = vsel %vm9166_vm7, %v4331_v57, %v4336_v4  ;;  %v7588_v5 = vpop.permute.xlu1 %4379  ;;  %vm1631_vm6 = vcmp.ge.s32.totalorder %v9167_v49, 6  ;;  %v9168_v15 = vld [vmem:[#allocation62_spill] sm:$0xff] }
 0x307   : > { %v7565_v0 = vsel %vm9162_vm9, %v9161_v17, %v4371_v54  ;;  %3405 = vmatpush1.bf16.msk.msra.mxu0 %vm7539_vm4, %v3404_v10  ;;  %v3410_v31 = vpack.c.bf16 %v2367_v46, %v2366_v63  ;;  %v9169_v17 = vunpack.i.h.bf16 %v9168_v15  ;;  %vm9172_vm14 = vmmov %vm9126_vm0  ;;  %v4357_v48 = vunpack.i.h.bf16 %v7485_v3  ;;  %v9175_v63 = vld [vmem:[#allocation61_spill] sm:$0xff] }
 0x308   : > { %v7573_v37 = vsel %vm9164_vm15, %v9163_v32, %v4372_v20  ;;  %3408 = vmatprep.subr.msk.bf16.mxu0 %vm7490_vm10, %v3407_v29  ;;  %v9171_v32 = vunpack.i.l.bf16 %v9168_v15  ;;  %vm7603_vm0 = vmpackc.low %vm1632_vm5, %vm1632_vm5  ;;  %v3489_v46 = vpack.c.bf16 %v1604_v34, %v1603_v33  ;;  %v4367_v29 = vunpack.i.h.bf16 %v4365_v22  ;;  %v9180_v34 = vld [vmem:[#allocation63_spill] sm:$0xff] }
 0x309   : > { %v3510_v25 = vpack.c.bf16 %v7573_v37, %v7565_v0  ;;  %v1608_v4 = vsel %vm9170_vm12, %v9169_v17, %v4332_v52  ;;  %vm9176_vm10 = vmmov %vm9157_vm8  ;;  %v4366_v52 = vunpack.i.l.bf16 %v4365_v22  ;;  %v7609_v17 = vpop.permute.xlu0 %4384  ;;  %v4362_v15 = vunpack.i.h.bf16 %v7443_v11 }
 0x30a   : > { %v1607_v10 = vsel %vm9172_vm14, %v9171_v32, %v4331_v57  ;;  %3634 = vmatprep.mubr.msk.bf16.mxu1 %vm9176_vm10, %v9175_v63  ;;  %v4356_v57 = vunpack.i.l.bf16 %v7485_v3  ;;  %v4361_v24 = vunpack.i.l.bf16 %v7443_v11  ;;  %v4390_v44 = vpop.permute.xlu1 %4389  ;;  %vm7621_vm8 = vmpackc.low %vm1631_vm6, %vm1631_vm6  ;;  %v9181_v9 = vunpack.i.h.bf16 %v9180_v34 }
 0x30b   : > { %3411 = vmatpush1.bf16.msk.msra.mxu0 %vm7539_vm4, %v3410_v31  ;;  %v3492_v32 = vpack.c.bf16 %v1608_v4, %v1607_v10  ;;  %vm9179_vm5 = vmmov %vm9162_vm9  ;;  %v4392_v11 = vunpack.i.h.bf16 %v4390_v44  ;;  %v4391_v31 = vunpack.i.l.bf16 %v4390_v44  ;;  %v4377_v63 = vunpack.i.h.bf16 %v7575_v45 }
 0x30c   : > { %3490 = vmatprep.subr.msk.bf16.mxu0 %vm7603_vm0, %v3489_v46  ;;  %v1756_v3 = vsel %vm9179_vm5, %v4357_v48, %v4362_v15  ;;  %vm9182_vm4 = vmmov %vm9179_vm5  ;;  %v4376_v46 = vunpack.i.l.bf16 %v7575_v45  ;;  %v9188_v44 = vunpack.i.l.bf16 %v9180_v34  ;;  %v4382_v34 = vunpack.i.h.bf16 %v7588_v5 }
 0x30d   : > { %v1760_v33 = vsel %vm9182_vm4, %v9181_v9, %v4357_v48  ;;  %vm9183_vm9 = vmmov %vm9182_vm4  ;;  %v7641_v6 = vpop.permute.xlu0 %4399 }
 0x30e   : > { %v1747_v4 = vsel %vm9183_vm9, %v4366_v52, %v4241_v36  ;;  %vm9184_vm15 = vmmov %vm9182_vm4  ;;  %2510 = vmatmul.mubr.bf16.vlgmr.msra.gmra.mrb[16].mxu0 %v7424_v19  ;;  %v1602_v36 = vsel %vm9166_vm7, %v4392_v11, %v4352_v8  ;;  %v4395_v9 = vpop.permute.xlu1 %4394 }
 0x30f   : > { %v1748_v10 = vsel %vm9184_vm15, %v4367_v29, %v4242_v28  ;;  %vm9185_vm1 = vmmov %vm9182_vm4  ;;  %3493 = vmatpush1.bf16.msk.msra.mxu0 %vm7621_vm8, %v3492_v32  ;;  %vm9192_vm4 = vcmask 785408  }
 0x310   : > { %v1755_v48 = vsel %vm9185_vm1, %v4356_v57, %v4361_v24  ;;  %vm9186_vm6 = vmmov %vm9166_vm7  ;;  %3413 = vmatprep.mubr.msk.bf16.mxu0 %vm9192_vm4, %v7434_v41  ;;  %v3575_v32 = vpack.c.bf16 %v1748_v10, %v1747_v4  ;;  %v4381_v10 = vunpack.i.l.bf16 %v7588_v5 }
 0x311   : > { %v1606_v51 = vsel %vm9186_vm6, %v4347_v1, %v4392_v11  ;;  %vm9187_vm12 = vmmov %vm9186_vm6  ;;  %v9194_v11 = vunpack.i.l.bf16 %v7022_v58 }
 0x312   : > { %v1601_v28 = vsel %vm9187_vm12, %v4391_v31, %v4351_v43  ;;  %vm9189_vm14 = vmmov %vm9185_vm1  ;;  %v4410_v56 = vpop.permute.xlu1 %4409 }
 0x313   : > { %v1759_v45 = vsel %vm9189_vm14, %v9188_v44, %v4356_v57  ;;  %vm9190_vm10 = vmmov %vm9185_vm1  ;;  %v3572_v53 = vpack.c.bf16 %v1602_v36, %v1601_v28  ;;  %v7684_v36 = vpop.permute.xlu0 %4404  ;;  %v4412_v28 = vunpack.i.h.bf16 %v4410_v56  ;;  %v4411_v12 = vunpack.i.l.bf16 %v4410_v56  ;;  %v9228_v44 = vld [vmem:[#allocation4_spill] sm:$0xff] }
 0x314   : > { %v1752_v8 = vsel %vm9190_vm10, %v4362_v15, %v4367_v29  ;;  %vm9191_vm5 = vmmov %vm9186_vm6  ;;  %v9196_v29 = vunpack.i.h.bf16 %v7022_v58  ;;  %v4387_v15 = vunpack.i.h.bf16 %v7609_v17  ;;  %v4386_v58 = vunpack.i.l.bf16 %v7609_v17 }
 0x315   : > { %v1605_v1 = vsel %vm9191_vm5, %v4346_v42, %v4391_v31  ;;  %vm9193_vm9 = vmmov %vm9185_vm1  ;;  %v4396_v31 = vunpack.i.l.bf16 %v4395_v9  ;;  %3573 = vmatpush1.bf16.msk.msra.mxu1 %vm7499_vm13, %v3572_v53  ;;  %vm9200_vm13 = vcmp.lt.s32.totalorder %v5064_v18, 2  ;;  %v9201_v17 = vunpack.i.l.bf16 %v7045_v50 }
 0x316   : > { %v1751_v43 = vsel %vm9193_vm9, %v4361_v24, %v4366_v52  ;;  %v3495_v57 = vpack.c.bf16 %v1606_v51, %v1605_v1  ;;  %vm9195_vm15 = vmmov %vm9185_vm1  ;;  %v1750_v42 = vsel %vm9185_vm1, %v4377_v63, %v9196_v29  ;;  %v3501_v24 = vpack.c.bf16 %v1756_v3, %v1755_v48  ;;  %v9197_v51 = vld [vmem:[#allocation17_spill] sm:$0xff]  ;;  %2520 = vmatmul.mubr.bf16.gmra.mrb[20].mxu0 %v7546_v38 }
 0x317   : > { %v1749_v23 = vsel %vm9195_vm15, %v4376_v46, %v9194_v11  ;;  %v4397_v52 = vunpack.i.h.bf16 %v4395_v9  ;;  %v3578_v4 = vpack.c.bf16 %v1752_v8, %v1751_v43  ;;  %vm9198_vm7 = vnez %v9197_v51  ;;  %v7709_v22 = vpop.permute.xlu0 %4419  ;;  %vm9207_vm12 = vmmov %vm9185_vm1 }
 0x318   : > { %3496 = vmatprep.subr.msk.bf16.mxu0 %vm7603_vm0, %v3495_v57  ;;  %3576 = vmatprep.subr.msk.bf16.mxu1 %vm9198_vm7, %v3575_v32  ;;  %v3504_v3 = vpack.c.bf16 %v1760_v33, %v1759_v45  ;;  %v3581_v48 = vpack.c.bf16 %v1750_v42, %v1749_v23  ;;  %v1900_v5 = vsel %vm9200_vm13, %v4382_v34, %v4387_v15  ;;  %vm9202_vm0 = vmmov %vm9200_vm13  ;;  %v4407_v55 = vunpack.i.h.bf16 %v7684_v36  ;;  %v9203_v33 = vld [vmem:[#allocation18_spill] sm:$0xff]  ;;  %v4415_v57 = vpop.permute.xlu1 %4414 }
 0x319   : > { %3499 = vmatpush1.bf16.msk.msra.mxu0 %vm7621_vm8, %v3498_v61  ;;  %v1891_v30 = vsel %vm9202_vm0, %v4396_v31, %v9201_v17  ;;  %v4406_v61 = vunpack.i.l.bf16 %v7684_v36  ;;  %vm9204_vm8 = vnez %v9203_v33  ;;  %v9205_v45 = vunpack.i.h.bf16 %v7045_v50  ;;  %vm9206_vm6 = vmmov %vm9202_vm0  ;;  %v9226_v17 = vld [vmem:[#allocation33_spill] sm:$0xff]  ;;  %v9233_v33 = vld [vmem:[#allocation20_spill] sm:$0xff] }
 0x31a   : > { %3502 = vmatprep.subr.msk.bf16.mxu0 %vm5807_vm11, %v3501_v24  ;;  %3579 = vmatpush1.bf16.msk.msra.mxu1 %vm9204_vm8, %v3578_v4  ;;  %v1754_v1 = vsel %vm9207_vm12, %v4412_v28, %v4377_v63  ;;  %vm9208_vm14 = vmmov %vm9185_vm1  ;;  %vm9213_vm9 = vcmask 785408   ;;  %v4401_v23 = vunpack.i.l.bf16 %v7641_v6  ;;  %v9216_v42 = vunpack.i.l.bf16 %v7118_v39  ;;  %v9239_v32 = vld [vmem:[#allocation34_spill] sm:$0xff] }
 0x31b   : > { %v1892_v8 = vsel %vm9206_vm6, %v4397_v52, %v9205_v45  ;;  %v1758_v53 = vsel %vm9208_vm14, %v4372_v20, %v4412_v28  ;;  %vm9209_vm10 = vmmov %vm9185_vm1  ;;  %3582 = vmatprep.subr.msk.bf16.mxu1 %vm9198_vm7, %v3581_v48  ;;  %v4657_v20 = vld [vmem:[%s8456_s2 + $0x4] ss:$8 sps:$4 sm:$0xff]   ;;  %v9218_v24 = vunpack.i.h.bf16 %v7118_v39  ;;  %v7754_v51 = vpop.permute.xlu0 %4444  ;;  %vm9227_vm12 = vnez %v9226_v17 }
 0x31c   : > { %v1753_v9 = vsel %vm9209_vm10, %v4411_v12, %v4376_v46  ;;  %vm9210_vm5 = vmmov %vm9202_vm0  ;;  %3560 = vmatprep.mubr.msk.bf16.mxu0 %vm9213_vm9, %v4657_v20  ;;  %v4402_v46 = vunpack.i.h.bf16 %v7641_v6  ;;  %v3587_v29 = vpack.c.bf16 %v1892_v8, %v1891_v30  ;;  %v9231_v0 = vunpack.i.h.bf16 %v9228_v44  ;;  %v9259_v17 = vld [vmem:[#allocation45_spill] sm:$0xff] }
 0x31d   : > { %v1899_v50 = vsel %vm9210_vm5, %v4381_v10, %v4386_v58  ;;  %vm9211_vm4 = vmmov %vm9185_vm1  ;;  %v3584_v63 = vpack.c.bf16 %v1754_v1, %v1753_v9  ;;  %3505 = vmatpush1.bf16.msk.msra.mxu0 %vm5844_vm3, %v3504_v3  ;;  %v9224_v3 = vld [vmem:[#allocation19_spill] sm:$0xff]  ;;  %vm9234_vm14 = vnez %v9233_v33  ;;  %v4417_v9 = vunpack.i.h.bf16 %v4415_v57  ;;  %v9262_v33 = vld [vmem:[#allocation50_spill] sm:$0xff] }
 0x31e   : > { %v1757_v43 = vsel %vm9211_vm4, %v4371_v54, %v4411_v12  ;;  %vm9214_vm15 = vmmov %vm9202_vm0  ;;  %v3513_v56 = vpack.c.bf16 %v1900_v5, %v1899_v50  ;;  %v9229_v5 = vunpack.i.l.bf16 %v9228_v44  ;;  %v4416_v50 = vunpack.i.l.bf16 %v4415_v57  ;;  %v9241_v57 = vld [vmem:[#allocation48_spill] sm:$0xff] }
 0x31f   : > { %v1896_v11 = vsel %vm9214_vm15, %v4387_v15, %v4397_v52  ;;  %vm9215_vm1 = vmmov %vm9202_vm0  ;;  %v3507_v54 = vpack.c.bf16 %v1758_v53, %v1757_v43  ;;  %3585 = vmatpush1.bf16.msk.msra.mxu1 %vm9204_vm8, %v3584_v63  ;;  %v9220_v15 = vld [vmem:[#allocation64_spill] sm:$0xff]  ;;  %vm9225_vm8 = vnez %v9224_v3  ;;  %vm9240_vm15 = vnez %v9239_v32 }
 0x320   : > { %v1895_v62 = vsel %vm9215_vm1, %v4386_v58, %v4396_v31  ;;  %vm9217_vm7 = vmmov %vm9202_vm0  ;;  %v9221_v31 = vunpack.i.h.bf16 %v9220_v15  ;;  %v9222_v52 = vunpack.i.l.bf16 %v9220_v15  ;;  %3588 = vmatprep.subr.msk.bf16.mxu1 %vm9225_vm8, %v3587_v29  ;;  %vm9244_vm1 = vcmp.lt.s32.totalorder %v5064_v18, 126 }
 0x321   : > { %v1893_v36 = vsel %vm9217_vm7, %v4406_v61, %v9216_v42  ;;  %vm9219_vm13 = vmmov %vm9202_vm0  ;;  %3508 = vmatprep.subr.msk.bf16.mxu0 %vm5807_vm11, %v3507_v54  ;;  %v3590_v39 = vpack.c.bf16 %v1896_v11, %v1895_v62  ;;  %v4421_v11 = vunpack.i.l.bf16 %v7709_v22 }
 0x322   : > { %v1894_v4 = vsel %vm9219_vm13, %v4407_v55, %v9218_v24  ;;  %v1904_v6 = vsel %vm9202_vm0, %v9221_v31, %v4382_v34  ;;  %vm9223_vm6 = vmmov %vm9202_vm0  ;;  %3511 = vmatpush1.bf16.msk.msra.mxu0 %vm5844_vm3, %v3510_v25  ;;  %v4425_v34 = vpop.permute.xlu1 %4424  ;;  %v7785_v25 = vpop.permute.xlu0 %4464 }
 0x323   : > { %v1903_v58 = vsel %vm9223_vm6, %v9222_v52, %v4381_v10  ;;  %v3593_v48 = vpack.c.bf16 %v1894_v4, %v1893_v36  ;;  %v4427_v28 = vunpack.i.h.bf16 %v4425_v34  ;;  %v4426_v12 = vunpack.i.l.bf16 %v4425_v34  ;;  %3514 = vmatprep.subr.msk.bf16.mxu0 %vm9227_vm12, %v3513_v56  ;;  %vm9230_vm11 = vmmov %vm9202_vm0  ;;  %3591 = vmatpush1.bf16.msk.msra.mxu1 %vm9234_vm14, %v3590_v39  ;;  %v9251_v52 = vld [vmem:[#allocation54_spill] sm:$0xff]  ;;  %v9253_v56 = vld [vmem:[#allocation65_spill] sm:$0xff] }
 0x324   : > { %v3516_v10 = vpack.c.bf16 %v1904_v6, %v1903_v58  ;;  %v1905_v30 = vsel %vm9230_vm11, %v9229_v5, %v4401_v23  ;;  %vm9232_vm3 = vmmov %vm9202_vm0  ;;  %v9245_v36 = vunpack.i.h.bf16 %v6831_v60  ;;  %v9248_v4 = vunpack.i.l.bf16 %v6831_v60  ;;  %v9250_v6 = vld [vmem:[#allocation56_spill] sm:$0xff] }
 0x325   : > { %v1906_v37 = vsel %vm9232_vm3, %v9231_v0, %v4402_v46  ;;  %vm9235_vm10 = vmmov %vm9202_vm0  ;;  %3594 = vmatprep.subr.msk.bf16.mxu1 %vm9225_vm8, %v3593_v48  ;;  %v9252_v58 = vpack.c.bf16 %v9250_v6, %v9251_v52  ;;  %v9254_v39 = vunpack.i.l.bf16 %v9253_v56  ;;  %v9256_v34 = vunpack.i.h.bf16 %v9253_v56 }
 0x326   : > { %v1898_v45 = vsel %vm9235_vm10, %v4427_v28, %v4407_v55  ;;  %vm9236_vm5 = vmmov %vm9202_vm0  ;;  %3517 = vmatpush1.bf16.msk.msra.mxu0 %vm9240_vm15, %v3516_v10  ;;  %v4430_v55 = vpop.permute.xlu1 %4429  ;;  %v3522_v20 = vpack.c.bf16 %v1906_v37, %v1905_v30  ;;  %v4480_v54 = vpop.permute.xlu0 %4479  ;;  %v9261_v37 = vld [vmem:[#allocation52_spill] sm:$0xff]  ;;  %v4467_v56 = vunpack.i.h.bf16 %v7785_v25 }
 0x327   : > { %v1902_v8 = vsel %vm9236_vm5, %v4402_v46, %v4427_v28  ;;  %vm9237_vm4 = vmmov %vm9202_vm0  ;;  %v4422_v46 = vunpack.i.h.bf16 %v7709_v22  ;;  %v4431_v62 = vunpack.i.l.bf16 %v4430_v55 }
 0x328   : > { %v1897_v1 = vsel %vm9237_vm4, %v4426_v12, %v4406_v61  ;;  %vm9238_vm9 = vmmov %vm9202_vm0  ;;  %v4432_v61 = vunpack.i.h.bf16 %v4430_v55  ;;  %v4446_v55 = vunpack.i.l.bf16 %v7754_v51 }
 0x329   : > { %v1901_v53 = vsel %vm9238_vm9, %v4401_v23, %v4426_v12  ;;  %v3596_v63 = vpack.c.bf16 %v1898_v45, %v1897_v1  ;;  %v9242_v23 = vld [vmem:[#allocation47_spill] sm:$0xff]  ;;  %v2056_v42 = vsel %vm9244_vm1, %v4417_v9, %v4422_v46  ;;  %vm9246_vm7 = vmmov %vm9244_vm1  ;;  %v9258_v12 = vld [vmem:[#allocation46_spill] sm:$0xff]  ;;  %v9263_v45 = vpack.c.bf16 %v9261_v37, %v9262_v33 }
 0x32a   : > { %v3519_v43 = vpack.c.bf16 %v1902_v8, %v1901_v53  ;;  %v9243_v29 = vpack.c.bf16 %v9241_v57, %v9242_v23  ;;  %v7816_v22 = vsel %vm9246_vm7, %v9245_v36, %v4417_v9  ;;  %vm9247_vm13 = vmmov %vm9244_vm1  ;;  %v4435_v31 = vpop.permute.xlu1 %4434  ;;  %v4485_v28 = vpop.permute.xlu0 %4484  ;;  %v9260_v10 = vpack.c.bf16 %v9258_v12, %v9259_v17  ;;  %v9288_v12 = vld [vmem:[#allocation57_spill] sm:$0xff] }
 0x32b   : > { %3597 = vmatpush1.bf16.msk.msra.mxu1 %vm9234_vm14, %v3596_v63  ;;  %v2055_v24 = vsel %vm9247_vm13, %v4416_v50, %v4421_v11  ;;  %vm9249_vm0 = vmmov %vm9244_vm1  ;;  %v4437_v48 = vunpack.i.h.bf16 %v4435_v31  ;;  %v4436_v30 = vunpack.i.l.bf16 %v4435_v31  ;;  %v4487_v0 = vunpack.i.h.bf16 %v4485_v28 }
 0x32c   : > { %3520 = vmatprep.subr.msk.bf16.mxu0 %vm9227_vm12, %v3519_v43  ;;  %2648 = vmatprep.subr.bf16.mxu1 %v9243_v29  ;;  %v7824_v15 = vsel %vm9249_vm0, %v9248_v4, %v4416_v50  ;;  %vm9255_vm6 = vmmov %vm9249_vm0  ;;  %v3525_v44 = vpack.c.bf16 %v2056_v42, %v2055_v24  ;;  %v4447_v8 = vunpack.i.h.bf16 %v7754_v51  ;;  %v4482_v1 = vunpack.i.h.bf16 %v4480_v54  ;;  %v9264_v50 = vld [vmem:[#allocation55_spill] sm:$0xff]  ;;  %v9265_v43 = vld [vmem:[#allocation53_spill] sm:$0xff] }
 0x32d   : > { %3523 = vmatpush1.bf16.msk.msra.mxu0 %vm9240_vm15, %v3522_v20  ;;  %v2079_v3 = vsel %vm9255_vm6, %v4431_v62, %v9254_v39  ;;  %vm9257_vm8 = vmmov %vm9249_vm0  ;;  %v3528_v5 = vpack.c.bf16 %v7816_v22, %v7824_v15  ;;  %v4481_v53 = vunpack.i.l.bf16 %v4480_v54  ;;  %v4486_v9 = vunpack.i.l.bf16 %v4485_v28  ;;  %v9269_v29 = vld [vmem:[#allocation60_spill] sm:$0xff]  ;;  %v9270_v42 = vld [vmem:[#allocation58_spill] sm:$0xff] }
 0x32e   : > { %2595 = vmatprep.subr.bf16.mxu0 %v9252_v58  ;;  %v2080_v60 = vsel %vm9257_vm8, %v4432_v61, %v9256_v34  ;;  %v9266_v63 = vpack.c.bf16 %v9264_v50, %v9265_v43  ;;  %v4440_v32 = vpop.permute.xlu1 %4439  ;;  %vm9267_vm12 = vmmov %vm9249_vm0  ;;  %v9271_v36 = vpack.c.bf16 %v9269_v29, %v9270_v42  ;;  %v9273_v22 = vunpack.i.l.bf16 %v9105_v21  ;;  %v9278_v4 = vld [vmem:[#allocation49_spill] sm:$0xff]  ;;  %v9283_v58 = vld [vmem:[#allocation23_spill] sm:$0xff] }
 0x32f   : > { %2649 = vmatpush1.bf16.msra.mxu1 %v9260_v10  ;;  %v2052_v20 = vsel %vm9267_vm12, %v4422_v46, %v4432_v61  ;;  %vm9268_vm11 = vmmov %vm9249_vm0  ;;  %v3599_v23 = vpack.c.bf16 %v2080_v60, %v2079_v3  ;;  %v9275_v51 = vunpack.i.h.bf16 %v9105_v21  ;;  %v4442_v61 = vunpack.i.h.bf16 %v4440_v32  ;;  %v9287_v28 = vld [vmem:[#allocation59_spill] sm:$0xff] }
 0x330   : > { %2650 = vmatprep.subr.bf16.mxu1 %v9263_v45  ;;  %v2051_v57 = vsel %vm9268_vm11, %v4421_v11, %v4431_v62  ;;  %vm9272_vm3 = vmmov %vm9249_vm0  ;;  %v7869_v11 = vpop.permute.xlu0 %4489  ;;  %v9277_v62 = vld [vmem:[#allocation51_spill] sm:$0xff]  ;;  %v4441_v21 = vunpack.i.l.bf16 %v4440_v32  ;;  %vm9284_vm15 = vnez %v9283_v58  ;;  %v4466_v39 = vunpack.i.l.bf16 %v7785_v25  ;;  %v9297_v32 = vld [vmem:[#allocation25_spill] sm:$0xff] }
 0x331   : > { %2596 = vmatpush1.bf16.msra.mxu0 %v9266_v63  ;;  %v2058_v54 = vsel %vm9272_vm3, %v4482_v1, %v4437_v48  ;;  %vm9274_vm14 = vmmov %vm9249_vm0  ;;  %v9279_v15 = vpack.c.bf16 %v9277_v62, %v9278_v4  ;;  %v3602_v3 = vpack.c.bf16 %v2052_v20, %v2051_v57  ;;  %v9285_v34 = vunpack.i.l.bf16 %v7098_v14  ;;  %v9292_v45 = vld [vmem:[#allocation35_spill] sm:$0xff] }
 0x332   : > { %2597 = vmatprep.subr.bf16.mxu0 %v9271_v36  ;;  %v2081_v24 = vsel %vm9274_vm14, %v4486_v9, %v9273_v22  ;;  %vm9276_vm10 = vmmov %vm9249_vm0  ;;  %v9289_v17 = vpack.c.bf16 %v9287_v28, %v9288_v12  ;;  %v4450_v10 = vpop.permute.xlu1 %4449  ;;  %vm9293_vm13 = vnez %v9292_v45  ;;  %v9295_v43 = vunpack.i.h.bf16 %v6882_v59 }
 0x333   : > { %v2082_v46 = vsel %vm9276_vm10, %v4487_v0, %v9275_v51  ;;  %2651 = vmatpush1.bf16.msra.mxu1 %v9279_v15  ;;  %vm9280_vm5 = vmmov %vm9249_vm0  ;;  %v4452_v37 = vunpack.i.h.bf16 %v4450_v10  ;;  %v4451_v33 = vunpack.i.l.bf16 %v4450_v10  ;;  %vm9298_vm8 = vnez %v9297_v32 }
 0x334   : > { %v2057_v31 = vsel %vm9280_vm5, %v4481_v53, %v4436_v30  ;;  %vm9281_vm4 = vmmov %vm9249_vm0  ;;  %3600 = vmatprep.subr.msk.bf16.mxu1 %vm9284_vm15, %v3599_v23  ;;  %v9300_v20 = vunpack.i.l.bf16 %v6882_v59  ;;  %v9303_v23 = vld [vmem:[#allocation66_spill] sm:$0xff]  ;;  %vm2377_vm10 = vcmp.lt.s32.totalorder %v9160_v26, 122  ;;  %v4491_v15 = vunpack.i.l.bf16 %v7869_v11 }
 0x335   : > { %v2053_v6 = vsel %vm9281_vm4, %v4436_v30, %v4486_v9  ;;  %vm9282_vm9 = vmmov %vm9249_vm0  ;;  %2598 = vmatpush1.bf16.msra.mxu0 %v9289_v17  ;;  %v3531_v9 = vpack.c.bf16 %v2058_v54, %v2057_v31  ;;  %v9304_v29 = vunpack.i.l.bf16 %v9303_v23  ;;  %v9307_v59 = vunpack.i.h.bf16 %v9303_v23 }
 0x336   : > { %v2054_v52 = vsel %vm9282_vm9, %v4437_v48, %v4487_v0  ;;  %vm9286_vm1 = vmmov %vm9249_vm0  ;;  %v9290_v48 = vunpack.i.h.bf16 %v7098_v14  ;;  %v3605_v0 = vpack.c.bf16 %v2082_v46, %v2081_v24  ;;  %3526 = vmatprep.subr.msk.bf16.mxu0 %vm9293_vm13, %v3525_v44  ;;  %v4495_v14 = vpop.permute.xlu0 %4494  ;;  %v9309_v24 = vld [vmem:[#allocation36_spill] sm:$0xff]  ;;  %v4455_v51 = vpop.permute.xlu1 %4454  ;;  %v9311_v31 = vunpack.i.l.bf16 %v6957_v27 }
 0x337   : > { %v2061_v60 = vsel %vm9286_vm1, %v9285_v34, %v4481_v53  ;;  %vm9291_vm7 = vmmov %vm9249_vm0  ;;  %v3608_v50 = vpack.c.bf16 %v2054_v52, %v2053_v6  ;;  %vm9294_vm0 = vcmp.lt.s32.totalorder %v5064_v18, 124  ;;  %3603 = vmatpush1.bf16.msk.msra.mxu1 %vm9298_vm8, %v3602_v3  ;;  %v4497_v22 = vunpack.i.h.bf16 %v4495_v14 }
 0x338   : > { %v2062_v30 = vsel %vm9291_vm7, %v9290_v48, %v4482_v1  ;;  %v2200_v53 = vsel %vm9294_vm0, %v4442_v61, %v4447_v8  ;;  %vm9296_vm6 = vmmov %vm9294_vm0  ;;  %3606 = vmatprep.subr.msk.bf16.mxu1 %vm9284_vm15, %v3605_v0  ;;  %vm9310_vm9 = vnez %v9309_v24  ;;  %vm2379_vm1 = vcmp.lt.s32.totalorder %v9129_v7, 122 }
 0x339   : > { %v2204_v63 = vsel %vm9296_vm6, %v9295_v43, %v4442_v61  ;;  %vm9299_vm12 = vmmov %vm9294_vm0  ;;  %3529 = vmatpush1.bf16.msk.msra.mxu0 %vm9310_vm9, %v3528_v5  ;;  %v3534_v46 = vpack.c.bf16 %v2062_v30, %v2061_v60  ;;  %v4457_v62 = vunpack.i.h.bf16 %v4455_v51  ;;  %v4456_v4 = vunpack.i.l.bf16 %v4455_v51 }
 0x33a   : > { %v2199_v1 = vsel %vm9299_vm12, %v4441_v21, %v4446_v55  ;;  %vm9301_vm11 = vmmov %vm9294_vm0  ;;  %3532 = vmatprep.subr.msk.bf16.mxu0 %vm9293_vm13, %v3531_v9  ;;  %v9313_v5 = vunpack.i.h.bf16 %v6957_v27  ;;  %v4460_v10 = vpop.permute.xlu1 %4459  ;;  %v9322_v45 = vunpack.i.l.bf16 %v7143_v13  ;;  %v9326_v43 = vunpack.i.l.bf16 %v7330_v35 }
 0x33b   : > { %v2203_v44 = vsel %vm9301_vm11, %v9300_v20, %v4441_v21  ;;  %vm9302_vm3 = vmmov %vm9294_vm0  ;;  %v7941_v21 = vpop.permute.xlu0 %4499  ;;  %3609 = vmatpush1.bf16.msk.msra.mxu1 %vm9298_vm8, %v3608_v50  ;;  %v3537_v58 = vpack.c.bf16 %v2200_v53, %v2199_v1  ;;  %v4462_v0 = vunpack.i.h.bf16 %v4460_v10  ;;  %v9324_v50 = vunpack.i.h.bf16 %v7143_v13  ;;  %v9328_v20 = vld [vmem:[#allocation32_spill] sm:$0xff] }
 0x33c   : > { %v2196_v57 = vsel %vm9302_vm3, %v4447_v8, %v4452_v37  ;;  %vm9305_vm14 = vmmov %vm9294_vm0  ;;  %v4496_v8 = vunpack.i.l.bf16 %v4495_v14  ;;  %v3540_v3 = vpack.c.bf16 %v2204_v63, %v2203_v44  ;;  %v4502_v12 = vunpack.i.h.bf16 %v7941_v21 }
 0x33d   : > { %v2223_v42 = vsel %vm9305_vm14, %v4451_v33, %v9304_v29  ;;  %vm9306_vm5 = vmmov %vm9294_vm0  ;;  %v4501_v17 = vunpack.i.l.bf16 %v7941_v21  ;;  %3535 = vmatpush1.bf16.msk.msra.mxu0 %vm9310_vm9, %v3534_v46  ;;  %v9327_v14 = vunpack.i.h.bf16 %v7330_v35  ;;  %v2345_v13 = vsel %vm2339_vm2, %v4462_v0, %v4467_v56 }
 0x33e   : > { %v2195_v36 = vsel %vm9306_vm5, %v4446_v55, %v4451_v33  ;;  %vm9308_vm4 = vmmov %vm9294_vm0  ;;  %v4492_v55 = vunpack.i.h.bf16 %v7869_v11  ;;  %v9315_v11 = vld [vmem:[#allocation30_spill] sm:$0xff]  ;;  %v9320_v33 = vld [vmem:[#allocation37_spill] sm:$0xff]  ;;  %vm9329_vm5 = vnez %v9328_v20  ;;  %vm2376_vm9 = vcmp.lt.s32.totalorder %v9167_v49, 122 }
 0x33f   : > { %v2224_v54 = vsel %vm9308_vm4, %v4452_v37, %v9307_v59  ;;  %vm9312_vm15 = vmmov %vm9294_vm0  ;;  %v3614_v34 = vpack.c.bf16 %v2196_v57, %v2195_v36  ;;  %vm9316_vm13 = vnez %v9315_v11  ;;  %v4461_v37 = vunpack.i.l.bf16 %v4460_v10  ;;  %v4505_v1 = vpop.permute.xlu0 %4504  ;;  %v9330_v36 = vld [vmem:[#allocation38_spill] sm:$0xff]  ;;  %v4470_v59 = vpop.permute.xlu1 %4469 }
 0x340   : > { %v3611_v61 = vpack.c.bf16 %v2224_v54, %v2223_v42  ;;  %v2225_v6 = vsel %vm9312_vm15, %v4496_v8, %v9311_v31  ;;  %vm9314_vm7 = vmmov %vm9294_vm0  ;;  %v2202_v28 = vsel %vm9294_vm0, %v4492_v55, %v4457_v62  ;;  %vm9321_vm11 = vnez %v9320_v33 }
 0x341   : > { %v2226_v52 = vsel %vm9314_vm7, %v4497_v22, %v9313_v5  ;;  %vm9317_vm6 = vmmov %vm9294_vm0  ;;  %3538 = vmatprep.subr.msk.bf16.mxu0 %vm9321_vm11, %v3537_v58  ;;  %v2350_v63 = vsel %vm2339_vm2, %v9326_v43, %v4501_v17  ;;  %v2351_v32 = vsel %vm2339_vm2, %v9327_v14, %v4502_v12  ;;  %v2344_v23 = vsel %vm2339_vm2, %v4461_v37, %v4466_v39 }
 0x342   : > { %v3617_v60 = vpack.c.bf16 %v2226_v52, %v2225_v6  ;;  %3612 = vmatprep.subr.msk.bf16.mxu1 %vm9316_vm13, %v3611_v61  ;;  %v2201_v27 = vsel %vm9317_vm6, %v4491_v15, %v4456_v4  ;;  %vm9318_vm8 = vmmov %vm9294_vm0  ;;  %v3558_v57 = vpack.c.bf16 %v2351_v32, %v2350_v63  ;;  %v4507_v29 = vunpack.i.h.bf16 %v4505_v1 }
 0x343   : > { %v2198_v48 = vsel %vm9318_vm8, %v4457_v62, %v4497_v22  ;;  %vm9319_vm12 = vmmov %vm9294_vm0  ;;  %3615 = vmatpush1.bf16.msk.msra.mxu1 %vm9329_vm5, %v3614_v34  ;;  %v3543_v44 = vpack.c.bf16 %v2202_v28, %v2201_v27  ;;  %v4506_v42 = vunpack.i.l.bf16 %v4505_v1  ;;  %vm9331_vm4 = vnez %v9330_v36 }
 0x344   : > { %v2197_v30 = vsel %vm9319_vm12, %v4456_v4, %v4496_v8  ;;  %vm9323_vm3 = vmmov %vm9294_vm0  ;;  %3618 = vmatprep.subr.msk.bf16.mxu1 %vm9316_vm13, %v3617_v60  ;;  %3541 = vmatpush1.bf16.msk.msra.mxu0 %vm9331_vm4, %v3540_v3  ;;  %v4472_v22 = vunpack.i.h.bf16 %v4470_v59  ;;  %v4471_v8 = vunpack.i.l.bf16 %v4470_v59  ;;  %vm2378_vm15 = vcmp.lt.s32.totalorder %v9131_v2, 122 }
 0x345   : > { %v2205_v9 = vsel %vm9323_vm3, %v9322_v45, %v4491_v15  ;;  %vm9325_vm14 = vmmov %vm9294_vm0  ;;  %v3620_v35 = vpack.c.bf16 %v2198_v48, %v2197_v30  ;;  %3544 = vmatprep.subr.msk.bf16.mxu0 %vm9321_vm11, %v3543_v44  ;;  %v9332_v24 = vunpack.i.h.bf16 %v7163_v40  ;;  %v9333_v46 = vunpack.i.l.bf16 %v7163_v40  ;;  %v8088_v30 = vpop.permute.xlu0 %2439 }
 0x346   : > { %v2206_v53 = vsel %vm9325_vm14, %v9324_v50, %v4492_v55  ;;  %v3549_v62 = vpack.c.bf16 %v2345_v13, %v2344_v23  ;;  %v9334_v4 = vunpack.i.l.bf16 %v7273_v16  ;;  %vm8012_vm7 = vmpackc.low %vm2377_vm10, %vm2377_vm10  ;;  %v9337_v40 = vunpack.i.h.bf16 %v7273_v16 }
 0x347   : > { %v3546_v54 = vpack.c.bf16 %v2206_v53, %v2205_v9  ;;  %v2349_v51 = vsel %vm2339_vm2, %v9332_v24, %v4462_v0  ;;  %v2348_v61 = vsel %vm2339_vm2, %v9333_v46, %v4461_v37  ;;  %3621 = vmatpush1.bf16.msk.msra.mxu1 %vm9329_vm5, %v3620_v35  ;;  %v2341_v6 = vsel %vm2339_vm2, %v4467_v56, %v4472_v22  ;;  %vm8035_vm10 = vmpackc.low %vm2379_vm1, %vm2379_vm1 }
 0x348   : > { %v2370_v55 = vsel %vm2339_vm2, %v4506_v42, %v9334_v4  ;;  %v2371_v31 = vsel %vm2339_vm2, %v4507_v29, %v9337_v40  ;;  %v2340_v26 = vsel %vm2339_vm2, %v4466_v39, %v4471_v8  ;;  %v9338_v5 = vunpack.i.l.bf16 %v7266_v47  ;;  %v4475_v39 = vpop.permute.xlu1 %4474  ;;  %vm8048_vm13 = vmpackc.low %vm2376_vm9, %vm2376_vm9 }
 0x349   : > { %v9341_v21 = vunpack.i.h.bf16 %v7266_v47  ;;  %v3626_v56 = vpack.c.bf16 %v2341_v6, %v2340_v26  ;;  %3547 = vmatpush1.bf16.msk.msra.mxu0 %vm9331_vm4, %v3546_v54  ;;  %v4477_v3 = vunpack.i.h.bf16 %v4475_v39  ;;  %v4476_v34 = vunpack.i.l.bf16 %v4475_v39  ;;  %vm3625_vm1 = vmpackc.low %vm2378_vm15, %vm2378_vm15 }
 0x34a   : > { %v2368_v52 = vsel %vm2339_vm2, %v4471_v8, %v9338_v5  ;;  %3550 = vmatprep.subr.msk.bf16.mxu0 %vm8012_vm7, %v3549_v62  ;;  %v3552_v47 = vpack.c.bf16 %v2349_v51, %v2348_v61  ;;  %v3629_v60 = vpack.c.bf16 %v2371_v31, %v2370_v55 }
 0x34b   : > { %v2369_v25 = vsel %vm2339_vm2, %v4472_v22, %v9341_v21  ;;  %v2343_v49 = vsel %vm2339_vm2, %v4477_v3, %v4507_v29  ;;  %v2347_v11 = vsel %vm2339_vm2, %v4502_v12, %v4477_v3  ;;  %v2342_v28 = vsel %vm2339_vm2, %v4476_v34, %v4506_v42 }
 0x34c   : > { %v3623_v58 = vpack.c.bf16 %v2369_v25, %v2368_v52  ;;  %v2346_v27 = vsel %vm2339_vm2, %v4501_v17, %v4476_v34  ;;  %v3632_v10 = vpack.c.bf16 %v2343_v49, %v2342_v28  ;;  %vm9344_vm2 = vcmask 785408   ;;  %v8083_v18 = vpop.permute.xlu1 %2434 }
 0x34d   : > { %v3555_v2 = vpack.c.bf16 %v2347_v11, %v2346_v27  ;;  %3553 = vmatpush1.bf16.msk.msra.mxu0 %vm8048_vm13, %v3552_v47  ;;  %vm9345_vm0 = vmmov %vm9344_vm2  ;;  %v4659_v27 = vld [vmem:[%s4865_s11 + $0x18] sm:$0xff] }
 0x34e   : > { %3624 = vmatprep.subr.msk.bf16.mxu1 %vm8035_vm10, %v3623_v58 }
 0x34f   : > { %3627 = vmatpush1.bf16.msk.msra.mxu1 %vm3625_vm1, %v3626_v56  ;;  %3556 = vmatprep.subr.msk.bf16.mxu0 %vm8012_vm7, %v3555_v2 }
 0x350   : > { %3630 = vmatprep.subr.msk.bf16.mxu1 %vm8035_vm10, %v3629_v60  ;;  %v8103_v14 = vpop.permute.xlu1 %2444  ;;  %v4658_v60 = vld [vmem:[%s4865_s11 + $0x10] sm:$0xff] }
 0x351   : > { %3559 = vmatpush1.bf16.msk.msra.mxu0 %vm8048_vm13, %v3558_v57  ;;  %v8108_v57 = vpop.permute.xlu0 %2449 }
 0x353   : > { %3633 = vmatpush1.bf16.msk.msra.mxu1 %vm3625_vm1, %v3632_v10 }
 0x354   : > { %2616 = vmatmul.mubr.bf16.vlgmr.msra.gmra.mrb[24].mxu0 %v7424_v19 }
 0x355   : > { %3561 = vmatprep.mubr.msk.bf16.mxu0 %vm9344_vm2, %v7434_v41 }
 0x356   : > { %2669 = vmatmul.mubr.bf16.vlgmr.msra.gmra.mrb[24].mxu1 %v7424_v19 }
 0x357   : > { %3635 = vmatprep.mubr.msk.bf16.mxu1 %vm9345_vm0, %v7434_v41 }
 0x35c   : > { %2626 = vmatmul.mubr.bf16.gmra.mrb[28].mxu0 %v7546_v38 }
 0x35e   : > { %2679 = vmatmul.mubr.bf16.gmra.mrb[28].mxu1 %v7546_v38 }
 0x3cf   : > { %v2564_v12 = vpop.f32.mrb[16].mxu1 }
 0x3d0   : > { %v8086_v17 = vadd.f32 %v2564_v12, %v8083_v18  ;;  %v2566_v48 = vpop.f32.mrb[17].mxu1 }
 0x3d1   : > { %v8091_v19 = vadd.f32 %v2566_v48, %v8083_v18  ;;  %v2568_v0 = vpop.f32.mrb[18].mxu1  ;;  %v4660_v48 = vld [vmem:[%s4865_s11 + $0x50] sm:$0xff] }
 0x3d2   : > { %v2723_v37 = vmin.f32 %v8086_v17, 0.0  ;;  %v8095_v41 = vadd.f32 %v2568_v0, %v8088_v30  ;;  %v2570_v33 = vpop.f32.mrb[19].mxu1  ;;  %vm2691_vm6 = vcmp.gt.f32.partialorder %v8086_v17, 0.0 }
 0x3d3   : > { %v2724_v38 = vmin.f32 %v8091_v19, 0.0  ;;  %v8099_v45 = vadd.f32 %v2570_v33, %v8088_v30  ;;  %vm2692_vm8 = vcmp.gt.f32.partialorder %v8091_v19, 0.0 }
 0x3d4   : > { %v2757_v9 = vmul.f32 1.442695, %v2723_v37  ;;  %v2731_v50 = vmin.f32 %v8095_v41, 0.0  ;;  %vm2699_vm12 = vcmp.gt.f32.partialorder %v8095_v41, 0.0 }
 0x3d5   : > { %v2759_v53 = vmul.f32 1.442695, %v2724_v38  ;;  %v2732_v43 = vmin.f32 %v8099_v45, 0.0  ;;  %vm2700_vm11 = vcmp.gt.f32.partialorder %v8099_v45, 0.0 }
 0x3d6   : > { %4584 = vpow2.f32 %v2757_v9  ;;  %v2773_v63 = vmul.f32 1.442695, %v2731_v50 }
 0x3d7   : > { %4586 = vpow2.f32 %v2759_v53  ;;  %v2775_v32 = vmul.f32 1.442695, %v2732_v43  ;;  %v2574_v1 = vpop.f32.mrb[20].mxu1 }
 0x3d8   : > { %4588 = vpow2.f32 %v2773_v63  ;;  %v8106_v20 = vadd.f32 %v2574_v1, %v8103_v14  ;;  %v2576_v44 = vpop.f32.mrb[21].mxu1 }
 0x3d9   : > { %4590 = vpow2.f32 %v2775_v32  ;;  %v8111_v13 = vadd.f32 %v2576_v44, %v8103_v14  ;;  %v2578_v23 = vpop.f32.mrb[22].mxu1 }
 0x3da   : > { %v2739_v35 = vmin.f32 %v8106_v20, 0.0  ;;  %v8115_v29 = vadd.f32 %v2578_v23, %v8108_v57  ;;  %v2580_v42 = vpop.f32.mrb[23].mxu1  ;;  %vm2707_vm3 = vcmp.gt.f32.partialorder %v8106_v20, 0.0 }
 0x3db   : > { %v2740_v36 = vmin.f32 %v8111_v13, 0.0  ;;  %v8119_v59 = vadd.f32 %v2580_v42, %v8108_v57  ;;  %vm2708_vm14 = vcmp.gt.f32.partialorder %v8111_v13, 0.0 }
 0x3dc   : > { %v2789_v54 = vmul.f32 1.442695, %v2739_v35  ;;  %v2747_v22 = vmin.f32 %v8115_v29, 0.0  ;;  %vm2715_vm5 = vcmp.gt.f32.partialorder %v8115_v29, 0.0 }
 0x3dd   : > { %v2791_v8 = vmul.f32 1.442695, %v2740_v36  ;;  %v2748_v24 = vmin.f32 %v8119_v59, 0.0  ;;  %vm2716_vm4 = vcmp.gt.f32.partialorder %v8119_v59, 0.0 }
 0x3de   : > { %4592 = vpow2.f32 %v2789_v54  ;;  %v2805_v46 = vmul.f32 1.442695, %v2747_v22 }
 0x3df   : > { %4594 = vpow2.f32 %v2791_v8  ;;  %v2807_v4 = vmul.f32 1.442695, %v2748_v24 }
 0x3e0   : > { %v4585_v40 = vpop.eup %4584  ;;  %4596 = vpow2.f32 %v2805_v46  ;;  %v4662_v46 = vld [vmem:[%s4865_s11 + $0x90] sm:$0xff] }
 0x3e1   : > { %v2511_v51 = vpop.f32.mrb[16].mxu0  ;;  %v4587_v5 = vpop.eup %4586  ;;  %v3638_v52 = vadd.f32 -1.0, %v4585_v40  ;;  %4598 = vpow2.f32 %v2807_v4 }
 0x3e2   : > { %v8124_v61 = vadd.f32 %v2511_v51, %v8083_v18  ;;  %v2513_v62 = vpop.f32.mrb[17].mxu0  ;;  %v4589_v21 = vpop.eup %4588  ;;  %v3639_v25 = vadd.f32 -1.0, %v4587_v5 }
 0x3e3   : > { %v8128_v55 = vadd.f32 %v2513_v62, %v8083_v18  ;;  %v2515_v15 = vpop.f32.mrb[18].mxu0  ;;  %v4591_v7 = vpop.eup %4590  ;;  %v2851_v58 = vsel %vm2691_vm6, %v8086_v17, %v3638_v52  ;;  %v3646_v3 = vadd.f32 -1.0, %v4589_v21 }
 0x3e4   : > { %v2721_v31 = vmin.f32 %v8124_v61, 0.0  ;;  %v8133_v6 = vadd.f32 %v2515_v15, %v8088_v30  ;;  %v2517_v26 = vpop.f32.mrb[19].mxu0  ;;  %v2883_v49 = vadd.f32 %v4658_v60, %v2851_v58  ;;  %v2852_v11 = vsel %vm2692_vm8, %v8091_v19, %v3639_v25  ;;  %v4666_v60 = vld [vmem:[%s4865_s11] sm:$0xff] }
 0x3e5   : > { %v2722_v16 = vmin.f32 %v8128_v55, 0.0  ;;  %v8143_v47 = vadd.f32 %v2517_v26, %v8088_v30  ;;  %v3647_v28 = vadd.f32 -1.0, %v4591_v7  ;;  %v2884_v2 = vadd.f32 %v4659_v27, %v2852_v11 }
 0x3e6   : > { %v2753_v56 = vmul.f32 1.442695, %v2721_v31  ;;  %v2729_v39 = vmin.f32 %v8133_v6, 0.0  ;;  %v2859_v10 = vsel %vm2699_vm12, %v8095_v41, %v3646_v3  ;;  %2915 = vst [vmem:[%s8154_s30 + $0x10] sm:$0xff] %v2883_v49  ;;  %v4661_v41 = vld [vmem:[%s4865_s11 + $0x58] sm:$0xff]  ;;  %vm2689_vm9 = vcmp.gt.f32.partialorder %v8124_v61, 0.0 }
 0x3e7   : > { %v2755_v34 = vmul.f32 1.442695, %v2722_v16  ;;  %v2891_v19 = vadd.f32 %v4660_v48, %v2859_v10  ;;  %v2860_v0 = vsel %vm2700_vm11, %v8099_v45, %v3647_v28  ;;  %v2730_v37 = vmin.f32 %v8143_v47, 0.0  ;;  %2916 = vst [vmem:[%s8154_s30 + $0x18] sm:$0xff] %v2884_v2  ;;  %v4663_v31 = vld [vmem:[%s4865_s11 + $0x98] sm:$0xff]  ;;  %v4664_v16 = vld [vmem:[%s4865_s11 + $0xd0] sm:$0xff] }
 0x3e8   : > { %4600 = vpow2.f32 %v2753_v56  ;;  %v2769_v12 = vmul.f32 1.442695, %v2729_v39  ;;  %v2892_v38 = vadd.f32 %v4661_v41, %v2860_v0  ;;  %v4593_v43 = vpop.eup %4592  ;;  %v4665_v39 = vld [vmem:[%s4865_s11 + $0xd8] sm:$0xff]  ;;  %vm2690_vm15 = vcmp.gt.f32.partialorder %v8128_v55, 0.0  ;;  %v4667_v2 = vld [vmem:[%s4865_s11 + $0x8] sm:$0xff] }
 0x3e9   : > { %4602 = vpow2.f32 %v2755_v34  ;;  %v2521_v17 = vpop.f32.mrb[20].mxu0  ;;  %2923 = vst [vmem:[%s8154_s30 + $0x50] sm:$0xff] %v2891_v19  ;;  %v2771_v45 = vmul.f32 1.442695, %v2730_v37  ;;  %v4595_v1 = vpop.eup %4594  ;;  %v3654_v44 = vadd.f32 -1.0, %v4593_v43  ;;  %vm2697_vm7 = vcmp.gt.f32.partialorder %v8133_v6, 0.0 }
 0x3ea   : > { %v2523_v33 = vpop.f32.mrb[21].mxu0  ;;  %4604 = vpow2.f32 %v2769_v12  ;;  %v8165_v9 = vadd.f32 %v2521_v17, %v8103_v14  ;;  %2924 = vst [vmem:[%s8154_s30 + $0x58] sm:$0xff] %v2892_v38  ;;  %v4597_v35 = vpop.eup %4596  ;;  %v3655_v42 = vadd.f32 -1.0, %v4595_v1  ;;  %vm2698_vm10 = vcmp.gt.f32.partialorder %v8143_v47, 0.0 }
 0x3eb   : > { %v8168_v50 = vadd.f32 %v2523_v33, %v8103_v14  ;;  %v2525_v53 = vpop.f32.mrb[22].mxu0  ;;  %4606 = vpow2.f32 %v2771_v45  ;;  %v4599_v54 = vpop.eup %4598  ;;  %v2867_v22 = vsel %vm2707_vm3, %v8106_v20, %v3654_v44  ;;  %v3662_v8 = vadd.f32 -1.0, %v4597_v35  ;;  %v4669_v33 = vld [vmem:[%s4865_s11 + $0x48] sm:$0xff] }
 0x3ec   : > { %v8173_v63 = vadd.f32 %v2525_v53, %v8108_v57  ;;  %v2527_v32 = vpop.f32.mrb[23].mxu0  ;;  %v2737_v23 = vmin.f32 %v8165_v9, 0.0  ;;  %v2899_v62 = vadd.f32 %v4662_v46, %v2867_v22  ;;  %v2868_v4 = vsel %vm2708_vm14, %v8111_v13, %v3655_v42  ;;  %v4671_v44 = vld [vmem:[%s4865_s11 + $0x88] sm:$0xff]  ;;  %v4672_v42 = vld [vmem:[%s4865_s11 + $0xc0] sm:$0xff] }
 0x3ed   : > { %v2738_v36 = vmin.f32 %v8168_v50, 0.0  ;;  %v3663_v15 = vadd.f32 -1.0, %v4599_v54  ;;  %v2900_v26 = vadd.f32 %v4663_v31, %v2868_v4  ;;  %v2875_v5 = vsel %vm2715_vm5, %v8115_v29, %v3662_v8  ;;  %v4673_v8 = vld [vmem:[%s4865_s11 + $0xc8] sm:$0xff] }
 0x3ee   : > { %v2785_v24 = vmul.f32 1.442695, %v2737_v23  ;;  %v2745_v51 = vmin.f32 %v8173_v63, 0.0  ;;  %2931 = vst [vmem:[%s8154_s30 + $0x90] sm:$0xff] %v2899_v62  ;;  %v2907_v21 = vadd.f32 %v4664_v16, %v2875_v5  ;;  %v2528_v25 = vadd.f32 %v2527_v32, %v8108_v57 }
 0x3ef   : > { %v2787_v40 = vmul.f32 1.442695, %v2738_v36  ;;  %v2876_v13 = vsel %vm2716_vm4, %v8119_v59, %v3663_v15  ;;  %2932 = vst [vmem:[%s8154_s30 + $0x98] sm:$0xff] %v2900_v26  ;;  %vm2705_vm13 = vcmp.gt.f32.partialorder %v8165_v9, 0.0  ;;  %vm2706_vm1 = vcmp.gt.f32.partialorder %v8168_v50, 0.0 }
 0x3f0   : > { %4608 = vpow2.f32 %v2785_v24  ;;  %v2801_v20 = vmul.f32 1.442695, %v2745_v51  ;;  %v2908_v29 = vadd.f32 %v4665_v39, %v2876_v13  ;;  %2939 = vst [vmem:[%s8154_s30 + $0xd0] sm:$0xff] %v2907_v21  ;;  %v2746_v3 = vmin.f32 %v2528_v25, 0.0 }
 0x3f1   : > { %4610 = vpow2.f32 %v2787_v40  ;;  %vm2713_vm2 = vcmp.gt.f32.partialorder %v8173_v63, 0.0  ;;  %vm2714_vm0 = vcmp.gt.f32.partialorder %v2528_v25, 0.0 }
 0x3f2   : > { %v4601_v52 = vpop.eup %4600  ;;  %4612 = vpow2.f32 %v2801_v20  ;;  %2940 = vst [vmem:[%s8154_s30 + $0xd8] sm:$0xff] %v2908_v29  ;;  %v2803_v27 = vmul.f32 1.442695, %v2746_v3 }
 0x3f3   : > { %v4603_v56 = vpop.eup %4602  ;;  %v3636_v7 = vadd.f32 -1.0, %v4601_v52 }
 0x3f4   : > { %v3637_v58 = vadd.f32 -1.0, %v4603_v56  ;;  %v4605_v34 = vpop.eup %4604  ;;  %4614 = vpow2.f32 %v2803_v27 }
 0x3f5   : > { %v2849_v59 = vsel %vm2689_vm9, %v8124_v61, %v3636_v7  ;;  %v3644_v28 = vadd.f32 -1.0, %v4605_v34  ;;  %v4607_v12 = vpop.eup %4606  ;;  %v4668_v61 = vld [vmem:[%s4865_s11 + $0x40] sm:$0xff] }
 0x3f6   : > { %v2881_v49 = vadd.f32 %v4666_v60, %v2849_v59  ;;  %v2850_v11 = vsel %vm2690_vm15, %v8128_v55, %v3637_v58  ;;  %v3645_v19 = vadd.f32 -1.0, %v4607_v12 }
 0x3f7   : > { %v2882_v10 = vadd.f32 %v4667_v2, %v2850_v11  ;;  %v2857_v17 = vsel %vm2697_vm7, %v8133_v6, %v3644_v28 }
 0x3f8   : > { %2913 = vst [vmem:[%s8154_s30] sm:$0xff] %v2881_v49  ;;  %v2889_v48 = vadd.f32 %v4668_v61, %v2857_v17  ;;  %v2858_v0 = vsel %vm2698_vm10, %v8143_v47, %v3645_v19  ;;  %v4670_v47 = vld [vmem:[%s4865_s11 + $0x80] sm:$0xff] }
 0x3f9   : > { %2914 = vst [vmem:[%s8154_s30 + $0x8] sm:$0xff] %v2882_v10  ;;  %v2890_v41 = vadd.f32 %v4669_v33, %v2858_v0 }
 0x3fa   : > { %v4609_v55 = vpop.eup %4608  ;;  %2921 = vst [vmem:[%s8154_s30 + $0x40] sm:$0xff] %v2889_v48 }
 0x3fb   : > { %v4611_v37 = vpop.eup %4610  ;;  %v3652_v38 = vadd.f32 -1.0, %v4609_v55  ;;  %2922 = vst [vmem:[%s8154_s30 + $0x48] sm:$0xff] %v2890_v41 }
 0x3fc   : > { %v4613_v6 = vpop.eup %4612  ;;  %v3653_v53 = vadd.f32 -1.0, %v4611_v37 }
 0x3fd   : > { %v2865_v43 = vsel %vm2705_vm13, %v8165_v9, %v3652_v38  ;;  %v3660_v45 = vadd.f32 -1.0, %v4613_v6 }
 0x3fe   : > { %v2897_v32 = vadd.f32 %v4670_v47, %v2865_v43  ;;  %v2866_v1 = vsel %vm2706_vm1, %v8168_v50, %v3653_v53  ;;  %v4615_v54 = vpop.eup %4614 }
 0x3ff   : > { %v2898_v23 = vadd.f32 %v4671_v44, %v2866_v1  ;;  %v2873_v35 = vsel %vm2713_vm2, %v8173_v63, %v3660_v45  ;;  %v3661_v9 = vadd.f32 -1.0, %v4615_v54 }
 0x400   : > { %2929 = vst [vmem:[%s8154_s30 + $0x80] sm:$0xff] %v2897_v32  ;;  %v2905_v36 = vadd.f32 %v4672_v42, %v2873_v35 }
 0x401   : > { %2930 = vst [vmem:[%s8154_s30 + $0x88] sm:$0xff] %v2898_v23  ;;  %v2874_v22 = vsel %vm2714_vm0, %v2528_v25, %v3661_v9 }
 0x402   : > { %2937 = vst [vmem:[%s8154_s30 + $0xc0] sm:$0xff] %v2905_v36  ;;  %v2906_v24 = vadd.f32 %v4673_v8, %v2874_v22 }
 0x404   : > { %2938 = vst [vmem:[%s8154_s30 + $0xc8] sm:$0xff] %v2906_v24 }
 0x427   : > { %v2617_v50 = vpop.f32.mrb[24].mxu0 }
 0x428   : > { %v8232_v46 = vadd.f32 %v2617_v50, %v8083_v18  ;;  %v2619_v63 = vpop.f32.mrb[25].mxu0 }
 0x429   : > { %v2670_v51 = vpop.f32.mrb[24].mxu1  ;;  %v8238_v15 = vadd.f32 %v2619_v63, %v8083_v18  ;;  %v2621_v31 = vpop.f32.mrb[26].mxu0 }
 0x42a   : > { %v8235_v62 = vadd.f32 %v2670_v51, %v8083_v18  ;;  %v2672_v4 = vpop.f32.mrb[25].mxu1  ;;  %v2725_v5 = vmin.f32 %v8232_v46, 0.0  ;;  %v2623_v52 = vpop.f32.mrb[27].mxu0  ;;  %v8248_v39 = vadd.f32 %v2621_v31, %v8088_v30  ;;  %vm2693_vm6 = vcmp.gt.f32.partialorder %v8232_v46, 0.0 }
 0x42b   : > { %v8241_v40 = vadd.f32 %v2672_v4, %v8083_v18  ;;  %v2674_v26 = vpop.f32.mrb[26].mxu1  ;;  %v2726_v21 = vmin.f32 %v8238_v15, 0.0  ;;  %v8254_v58 = vadd.f32 %v2623_v52, %v8088_v30  ;;  %vm2694_vm12 = vcmp.gt.f32.partialorder %v8238_v15, 0.0 }
 0x42c   : > { %v2727_v20 = vmin.f32 %v8235_v62, 0.0  ;;  %v2676_v16 = vpop.f32.mrb[27].mxu1  ;;  %v2761_v25 = vmul.f32 1.442695, %v2725_v5  ;;  %v8251_v18 = vadd.f32 %v2674_v26, %v8088_v30  ;;  %v2733_v34 = vmin.f32 %v8248_v39, 0.0 }
 0x42d   : > { %v2728_v13 = vmin.f32 %v8241_v40, 0.0  ;;  %v2763_v29 = vmul.f32 1.442695, %v2726_v21  ;;  %v8257_v3 = vadd.f32 %v2676_v16, %v8088_v30  ;;  %v2734_v60 = vmin.f32 %v8254_v58, 0.0 }
 0x42e   : > { %v2765_v56 = vmul.f32 1.442695, %v2727_v20  ;;  %4616 = vpow2.f32 %v2761_v25  ;;  %v2735_v59 = vmin.f32 %v8251_v18, 0.0  ;;  %v2777_v28 = vmul.f32 1.442695, %v2733_v34  ;;  %v4674_v20 = vld [vmem:[%s4865_s11 + $0x20] sm:$0xff] }
 0x42f   : > { %v2767_v7 = vmul.f32 1.442695, %v2728_v13  ;;  %v2627_v49 = vpop.f32.mrb[28].mxu0  ;;  %v2736_v27 = vmin.f32 %v8257_v3, 0.0  ;;  %v2779_v30 = vmul.f32 1.442695, %v2734_v60 }
 0x430   : > { %4618 = vpow2.f32 %v2765_v56  ;;  %v2629_v2 = vpop.f32.mrb[29].mxu0  ;;  %v2781_v12 = vmul.f32 1.442695, %v2735_v59  ;;  %v8264_v17 = vadd.f32 %v2627_v49, %v8103_v14  ;;  %vm2695_vm8 = vcmp.gt.f32.partialorder %v8235_v62, 0.0  ;;  %v4675_v13 = vld [vmem:[%s4865_s11 + $0x30] sm:$0xff] }
 0x431   : > { %v2680_v11 = vpop.f32.mrb[28].mxu1  ;;  %4620 = vpow2.f32 %v2763_v29  ;;  %v2631_v61 = vpop.f32.mrb[30].mxu0  ;;  %v2783_v19 = vmul.f32 1.442695, %v2736_v27  ;;  %v8270_v0 = vadd.f32 %v2629_v2, %v8103_v14  ;;  %vm2696_vm11 = vcmp.gt.f32.partialorder %v8241_v40, 0.0  ;;  %v4678_v2 = vld [vmem:[%s4865_s11 + $0x60] sm:$0xff] }
 0x432   : > { %v2682_v10 = vpop.f32.mrb[29].mxu1  ;;  %4622 = vpow2.f32 %v2767_v7  ;;  %v8267_v55 = vadd.f32 %v2680_v11, %v8103_v14  ;;  %v2633_v37 = vpop.f32.mrb[31].mxu0  ;;  %v2741_v41 = vmin.f32 %v8264_v17, 0.0  ;;  %v8283_v32 = vadd.f32 %v2631_v61, %v8108_v57  ;;  %v4676_v7 = vld [vmem:[%s4865_s11 + $0x28] sm:$0xff]  ;;  %v4677_v11 = vld [vmem:[%s4865_s11 + $0x38] sm:$0xff]  ;;  %v4679_v61 = vld [vmem:[%s4865_s11 + $0x70] sm:$0xff] }
 0x433   : > { %v2684_v48 = vpop.f32.mrb[30].mxu1  ;;  %4624 = vpow2.f32 %v2777_v28  ;;  %v8274_v38 = vadd.f32 %v2682_v10, %v8103_v14  ;;  %v2742_v43 = vmin.f32 %v8270_v0, 0.0  ;;  %v8290_v44 = vadd.f32 %v2633_v37, %v8108_v57 }
 0x434   : > { %v2686_v33 = vpop.f32.mrb[31].mxu1  ;;  %4626 = vpow2.f32 %v2781_v12  ;;  %v2743_v6 = vmin.f32 %v8267_v55, 0.0  ;;  %v2793_v53 = vmul.f32 1.442695, %v2741_v41  ;;  %v8286_v14 = vadd.f32 %v2684_v48, %v8108_v57 }
 0x435   : > { %4628 = vpow2.f32 %v2779_v30  ;;  %v2744_v47 = vmin.f32 %v8274_v38, 0.0  ;;  %v2795_v1 = vmul.f32 1.442695, %v2742_v43  ;;  %vm2701_vm3 = vcmp.gt.f32.partialorder %v8248_v39, 0.0  ;;  %v4681_v43 = vld [vmem:[%s4865_s11 + $0x78] sm:$0xff] }
 0x436   : > { %4630 = vpow2.f32 %v2783_v19  ;;  %v2797_v45 = vmul.f32 1.442695, %v2743_v6  ;;  %v2749_v42 = vmin.f32 %v8283_v32, 0.0  ;;  %vm2703_vm14 = vcmp.gt.f32.partialorder %v8251_v18, 0.0 }
 0x437   : > { %4632 = vpow2.f32 %v2793_v53  ;;  %v2799_v35 = vmul.f32 1.442695, %v2744_v47  ;;  %v2751_v9 = vmin.f32 %v8286_v14, 0.0  ;;  %v8297_v50 = vadd.f32 %v2686_v33, %v8108_v57  ;;  %v4680_v33 = vld [vmem:[%s4865_s11 + $0x68] sm:$0xff] }
 0x438   : > { %v4617_v23 = vpop.eup %4616  ;;  %4634 = vpow2.f32 %v2797_v45  ;;  %v2809_v24 = vmul.f32 1.442695, %v2749_v42  ;;  %v2750_v26 = vmin.f32 %v8290_v44, 0.0  ;;  %vm2702_vm5 = vcmp.gt.f32.partialorder %v8254_v58, 0.0 }
 0x439   : > { %v3640_v54 = vadd.f32 -1.0, %v4617_v23  ;;  %4636 = vpow2.f32 %v2795_v1  ;;  %v2813_v31 = vmul.f32 1.442695, %v2751_v9  ;;  %vm2704_vm4 = vcmp.gt.f32.partialorder %v8257_v3, 0.0 }
 0x43a   : > { %v4619_v36 = vpop.eup %4618  ;;  %4638 = vpow2.f32 %v2799_v35  ;;  %v2811_v60 = vmul.f32 1.442695, %v2750_v26  ;;  %v2752_v19 = vmin.f32 %v8297_v50, 0.0  ;;  %vm2709_vm9 = vcmp.gt.f32.partialorder %v8264_v17, 0.0  ;;  %v4682_v35 = vld [vmem:[%s4865_s11 + $0xa0] sm:$0xff] }
 0x43b   : > { %v4621_v22 = vpop.eup %4620  ;;  %v3642_v8 = vadd.f32 -1.0, %v4619_v36  ;;  %v2853_v63 = vsel %vm2693_vm6, %v8232_v46, %v3640_v54  ;;  %4640 = vpow2.f32 %v2809_v24  ;;  %vm2711_vm15 = vcmp.gt.f32.partialorder %v8267_v55, 0.0 }
 0x43c   : > { %v4623_v51 = vpop.eup %4622  ;;  %v3641_v4 = vadd.f32 -1.0, %v4621_v22  ;;  %v2885_v52 = vadd.f32 %v4674_v20, %v2853_v63  ;;  %4642 = vpow2.f32 %v2813_v31  ;;  %v2815_v47 = vmul.f32 1.442695, %v2752_v19  ;;  %v4683_v22 = vld [vmem:[%s4865_s11 + $0xb0] sm:$0xff]  ;;  %v4685_v31 = vld [vmem:[%s4865_s11 + $0xb8] sm:$0xff] }
 0x43d   : > { %v4625_v5 = vpop.eup %4624  ;;  %v2855_v16 = vsel %vm2695_vm8, %v8235_v62, %v3642_v8  ;;  %v3643_v57 = vadd.f32 -1.0, %v4623_v51  ;;  %4644 = vpow2.f32 %v2811_v60  ;;  %vm2710_vm7 = vcmp.gt.f32.partialorder %v8270_v0, 0.0  ;;  %v4684_v51 = vld [vmem:[%s4865_s11 + $0xa8] sm:$0xff]  ;;  %v3003_v19 = vld [vmem:[%s8154_s30 + $0x90] sm:$0xff] (%p4781_p5) }
 0x43e   : > { %v4627_v21 = vpop.eup %4626  ;;  %v2887_v46 = vadd.f32 %v4675_v13, %v2855_v16  ;;  %v2854_v25 = vsel %vm2694_vm12, %v8238_v15, %v3641_v4  ;;  %v3648_v56 = vadd.f32 -1.0, %v4625_v5  ;;  %2917 = vst [vmem:[%s8154_s30 + $0x20] sm:$0xff] %v2885_v52  ;;  %4646 = vpow2.f32 %v2815_v47  ;;  %v4686_v52 = vld [vmem:[%s4865_s11 + $0xe0] sm:$0xff]  ;;  %3004 = vst [vmem:[%s8381_s26 + $0x110] sm:$0xff] (%p4781_p5), %v3003_v19 }
 0x43f   : > { %v4629_v29 = vpop.eup %4628  ;;  %v2886_v34 = vadd.f32 %v4676_v7, %v2854_v25  ;;  %v2856_v62 = vsel %vm2696_vm11, %v8241_v40, %v3643_v57  ;;  %v3650_v59 = vadd.f32 -1.0, %v4627_v21  ;;  %vm2712_vm10 = vcmp.gt.f32.partialorder %v8274_v38, 0.0  ;;  %v4687_v57 = vld [vmem:[%s4865_s11 + $0xf0] sm:$0xff] }
 0x440   : > { %v4631_v49 = vpop.eup %4630  ;;  %2919 = vst [vmem:[%s8154_s30 + $0x30] sm:$0xff] %v2887_v46  ;;  %v2888_v15 = vadd.f32 %v4677_v11, %v2856_v62  ;;  %v2861_v28 = vsel %vm2701_vm3, %v8248_v39, %v3648_v56  ;;  %v3649_v27 = vadd.f32 -1.0, %v4629_v29  ;;  %vm2717_vm13 = vcmp.gt.f32.partialorder %v8283_v32, 0.0  ;;  %v4688_v46 = vld [vmem:[%s4865_s11 + $0xe8] sm:$0xff]  ;;  %v2971_v62 = vld [vmem:[%s8154_s30 + $0x10] sm:$0xff] (%p4781_p5) }
 0x441   : > { %2918 = vst [vmem:[%s8154_s30 + $0x28] sm:$0xff] %v2886_v34  ;;  %v2893_v40 = vadd.f32 %v4678_v2, %v2861_v28  ;;  %v2863_v10 = vsel %vm2703_vm14, %v8251_v18, %v3650_v59  ;;  %v3651_v12 = vadd.f32 -1.0, %v4631_v49  ;;  %v4633_v30 = vpop.eup %4632  ;;  %vm2719_vm1 = vcmp.gt.f32.partialorder %v8286_v14, 0.0  ;;  %v2973_v59 = vld [vmem:[%s8154_s30 + $0x18] sm:$0xff] (%p4781_p5)  ;;  %2972 = vst [vmem:[%s8381_s26 + $0x10] sm:$0xff] (%p4781_p5), %v2971_v62  ;;  %v2983_v28 = vld [vmem:[%s8154_s30 + $0x40] sm:$0xff] (%p4781_p5) }
 0x442   : > { %2920 = vst [vmem:[%s8154_s30 + $0x38] sm:$0xff] %v2888_v15  ;;  %v2895_v39 = vadd.f32 %v4679_v61, %v2863_v10  ;;  %v2862_v48 = vsel %vm2702_vm5, %v8254_v58, %v3649_v27  ;;  %v4635_v37 = vpop.eup %4634  ;;  %v3656_v6 = vadd.f32 -1.0, %v4633_v30  ;;  %vm2718_vm2 = vcmp.gt.f32.partialorder %v8290_v44, 0.0  ;;  %2974 = vst [vmem:[%s8381_s26 + $0x18] sm:$0xff] (%p4781_p5), %v2973_v59  ;;  %v2985_v27 = vld [vmem:[%s8154_s30 + $0x48] sm:$0xff] (%p4781_p5)  ;;  %v2987_v2 = vld [vmem:[%s8154_s30 + $0x50] sm:$0xff] (%p4781_p5) }
 0x443   : > { %2925 = vst [vmem:[%s8154_s30 + $0x60] sm:$0xff] %v2893_v40  ;;  %v2894_v41 = vadd.f32 %v4680_v33, %v2862_v48  ;;  %v2864_v18 = vsel %vm2704_vm4, %v8257_v3, %v3651_v12  ;;  %v4637_v53 = vpop.eup %4636  ;;  %v3658_v58 = vadd.f32 -1.0, %v4635_v37  ;;  %vm2720_vm0 = vcmp.gt.f32.partialorder %v8297_v50, 0.0  ;;  %2984 = vst [vmem:[%s8381_s26 + $0x80] sm:$0xff] (%p4781_p5), %v2983_v28  ;;  %v2989_v40 = vld [vmem:[%s8154_s30 + $0x58] sm:$0xff] (%p4781_p5)  ;;  %v3001_v48 = vld [vmem:[%s8154_s30 + $0x88] sm:$0xff] (%p4781_p5) }
 0x444   : > { %2927 = vst [vmem:[%s8154_s30 + $0x70] sm:$0xff] %v2895_v39  ;;  %v2896_v45 = vadd.f32 %v4681_v43, %v2864_v18  ;;  %v4639_v1 = vpop.eup %4638  ;;  %v2869_v23 = vsel %vm2709_vm9, %v8264_v17, %v3656_v6  ;;  %v3657_v3 = vadd.f32 -1.0, %v4637_v53  ;;  %2986 = vst [vmem:[%s8381_s26 + $0x88] sm:$0xff] (%p4781_p5), %v2985_v27  ;;  %v2999_v39 = vld [vmem:[%s8154_s30 + $0x80] sm:$0xff] (%p4781_p5)  ;;  %v3005_v37 = vld [vmem:[%s8154_s30 + $0x98] sm:$0xff] (%p4781_p5) }
 0x445   : > { %2926 = vst [vmem:[%s8154_s30 + $0x68] sm:$0xff] %v2894_v41  ;;  %v2901_v42 = vadd.f32 %v4682_v35, %v2869_v23  ;;  %v2871_v36 = vsel %vm2711_vm15, %v8267_v55, %v3658_v58  ;;  %v3659_v54 = vadd.f32 -1.0, %v4639_v1  ;;  %v4641_v9 = vpop.eup %4640  ;;  %v2975_v60 = vld [vmem:[%s8154_s30 + $0x20] sm:$0xff] (%p4781_p5)  ;;  %2988 = vst [vmem:[%s8381_s26 + $0x90] sm:$0xff] (%p4781_p5), %v2987_v2  ;;  %v3017_v43 = vld [vmem:[%s8154_s30 + $0xc8] sm:$0xff] (%p4781_p5) }
 0x446   : > { %2928 = vst [vmem:[%s8154_s30 + $0x78] sm:$0xff] %v2896_v45  ;;  %v2903_v17 = vadd.f32 %v4683_v22, %v2871_v36  ;;  %v2870_v8 = vsel %vm2710_vm7, %v8270_v0, %v3657_v3  ;;  %v4643_v24 = vpop.eup %4642  ;;  %v3664_v55 = vadd.f32 -1.0, %v4641_v9  ;;  %2976 = vst [vmem:[%s8381_s26 + $0x20] sm:$0xff] (%p4781_p5), %v2975_v60  ;;  %v3015_v53 = vld [vmem:[%s8154_s30 + $0xc0] sm:$0xff] (%p4781_p5)  ;;  %v3019_v45 = vld [vmem:[%s8154_s30 + $0xd0] sm:$0xff] (%p4781_p5) }
 0x447   : > { %2933 = vst [vmem:[%s8154_s30 + $0xa0] sm:$0xff] %v2901_v42  ;;  %v2902_v63 = vadd.f32 %v4684_v51, %v2870_v8  ;;  %v2872_v4 = vsel %vm2712_vm10, %v8274_v38, %v3659_v54  ;;  %v3666_v0 = vadd.f32 -1.0, %v4643_v24  ;;  %v4645_v20 = vpop.eup %4644  ;;  %v2979_v11 = vld [vmem:[%s8154_s30 + $0x30] sm:$0xff] (%p4781_p5)  ;;  %2990 = vst [vmem:[%s8381_s26 + $0x98] sm:$0xff] (%p4781_p5), %v2989_v40  ;;  %v3021_v58 = vld [vmem:[%s8154_s30 + $0xd8] sm:$0xff] (%p4781_p5) }
 0x448   : > { %2935 = vst [vmem:[%s8154_s30 + $0xb0] sm:$0xff] %v2903_v17  ;;  %v2904_v26 = vadd.f32 %v4685_v31, %v2872_v4  ;;  %v2877_v5 = vsel %vm2717_vm13, %v8283_v32, %v3664_v55  ;;  %v3665_v13 = vadd.f32 -1.0, %v4645_v20  ;;  %v4647_v56 = vpop.eup %4646  ;;  %2951 = sbr.rel (!%p4781_p5) target bundleno = 1112 (0x458), region = 67  ;;  %v2977_v49 = vld [vmem:[%s8154_s30 + $0x28] sm:$0xff] (%p4781_p5)  ;;  %2980 = vst [vmem:[%s8381_s26 + $0x30] sm:$0xff] (%p4781_p5), %v2979_v11 }
 0x449   : > { %2934 = vst [vmem:[%s8154_s30 + $0xa8] sm:$0xff] %v2902_v63  ;;  %v2909_v38 = vadd.f32 %v4686_v52, %v2877_v5  ;;  %v2879_v16 = vsel %vm2719_vm1, %v8286_v14, %v3666_v0  ;;  %v3667_v29 = vadd.f32 -1.0, %v4647_v56  ;;  %v4689_v14 = vld [vmem:[%s4865_s11 + $0xf8] sm:$0xff]  ;;  %2978 = vst [vmem:[%s8381_s26 + $0x28] sm:$0xff] (%p4781_p5), %v2977_v49 }
 0x44a   : > { %2936 = vst [vmem:[%s8154_s30 + $0xb8] sm:$0xff] %v2904_v26  ;;  %v2911_v21 = vadd.f32 %v4687_v57, %v2879_v16  ;;  %v2878_v32 = vsel %vm2718_vm2, %v8290_v44, %v3665_v13  ;;  %v2967_v44 = vld [vmem:[%s8154_s30] sm:$0xff] (%p4781_p5)  ;;  %v2981_v15 = vld [vmem:[%s8154_s30 + $0x38] sm:$0xff] (%p4781_p5)  ;;  %3000 = vst [vmem:[%s8381_s26 + $0x100] sm:$0xff] (%p4781_p5), %v2999_v39 }
 0x44b   : > { %2941 = vst [vmem:[%s8154_s30 + $0xe0] sm:$0xff] %v2909_v38  ;;  %v2910_v25 = vadd.f32 %v4688_v46, %v2878_v32  ;;  %v2880_v7 = vsel %vm2720_vm0, %v8297_v50, %v3667_v29  ;;  %v2969_v50 = vld [vmem:[%s8154_s30 + $0x8] sm:$0xff] (%p4781_p5)  ;;  %2968 = vst [vmem:[%s8381_s26] sm:$0xff] (%p4781_p5), %v2967_v44  ;;  %v2991_v10 = vld [vmem:[%s8154_s30 + $0x60] sm:$0xff] (%p4781_p5) }
 0x44c   : > { %2943 = vst [vmem:[%s8154_s30 + $0xf0] sm:$0xff] %v2911_v21  ;;  %v2912_v34 = vadd.f32 %v4689_v14, %v2880_v7  ;;  %2970 = vst [vmem:[%s8381_s26 + $0x8] sm:$0xff] (%p4781_p5), %v2969_v50  ;;  %v2993_v12 = vld [vmem:[%s8154_s30 + $0x68] sm:$0xff] (%p4781_p5)  ;;  %v2995_v30 = vld [vmem:[%s8154_s30 + $0x70] sm:$0xff] (%p4781_p5) }
 0x44d   : > { %2942 = vst [vmem:[%s8154_s30 + $0xe8] sm:$0xff] %v2910_v25  ;;  %2982 = vst [vmem:[%s8381_s26 + $0x38] sm:$0xff] (%p4781_p5), %v2981_v15  ;;  %v2997_v61 = vld [vmem:[%s8154_s30 + $0x78] sm:$0xff] (%p4781_p5) }
 0x44e   : > { %2944 = vst [vmem:[%s8154_s30 + $0xf8] sm:$0xff] %v2912_v34  ;;  %2992 = vst [vmem:[%s8381_s26 + $0xa0] sm:$0xff] (%p4781_p5), %v2991_v10  ;;  %v3007_v33 = vld [vmem:[%s8154_s30 + $0xa0] sm:$0xff] (%p4781_p5) }
 0x44f   : > { %2994 = vst [vmem:[%s8381_s26 + $0xa8] sm:$0xff] %v2993_v12  ;;  %2996 = vst [vmem:[%s8381_s26 + $0xb0] sm:$0xff] %v2995_v30  ;;  %v3011_v18 = vld [vmem:[%s8154_s30 + $0xb0] sm:$0xff] }
 0x450   : > { %2998 = vst [vmem:[%s8381_s26 + $0xb8] sm:$0xff] %v2997_v61  ;;  %3002 = vst [vmem:[%s8381_s26 + $0x108] sm:$0xff] %v3001_v48  ;;  %v3009_v41 = vld [vmem:[%s8154_s30 + $0xa8] sm:$0xff] }
 0x451   : > { %3006 = vst [vmem:[%s8381_s26 + $0x118] sm:$0xff] %v3005_v37  ;;  %3008 = vst [vmem:[%s8381_s26 + $0x120] sm:$0xff] %v3007_v33  ;;  %v3013_v6 = vld [vmem:[%s8154_s30 + $0xb8] sm:$0xff] }
 0x452   : > { %3010 = vst [vmem:[%s8381_s26 + $0x128] sm:$0xff] %v3009_v41  ;;  %3012 = vst [vmem:[%s8381_s26 + $0x130] sm:$0xff] %v3011_v18  ;;  %v3023_v47 = vld [vmem:[%s8154_s30 + $0xe0] sm:$0xff] }
 0x453   : > { %3014 = vst [vmem:[%s8381_s26 + $0x138] sm:$0xff] %v3013_v6  ;;  %3016 = vst [vmem:[%s8381_s26 + $0x180] sm:$0xff] %v3015_v53  ;;  %v3027_v23 = vld [vmem:[%s8154_s30 + $0xf0] sm:$0xff] }
 0x454   : > { %3018 = vst [vmem:[%s8381_s26 + $0x188] sm:$0xff] %v3017_v43  ;;  %3020 = vst [vmem:[%s8381_s26 + $0x190] sm:$0xff] %v3019_v45  ;;  %v3025_v1 = vld [vmem:[%s8154_s30 + $0xe8] sm:$0xff] }
 0x455   : > { %3022 = vst [vmem:[%s8381_s26 + $0x198] sm:$0xff] %v3021_v58  ;;  %3024 = vst [vmem:[%s8381_s26 + $0x1a0] sm:$0xff] %v3023_v47  ;;  %v3029_v3 = vld [vmem:[%s8154_s30 + $0xf8] sm:$0xff] }
 0x456   : > { %3026 = vst [vmem:[%s8381_s26 + $0x1a8] sm:$0xff] %v3025_v1  ;;  %3028 = vst [vmem:[%s8381_s26 + $0x1b0] sm:$0xff] %v3027_v23 }
 0x457   : > { %3030 = vst [vmem:[%s8381_s26 + $0x1b8] sm:$0xff] %v3029_v3 }
 0x458 PF: > { %p12_p10 = scmp.ge.s32.totalorder %s4768_s22, 4   ;;  %s9346_s18 = smov %s4708_s19 }
 0x459   : > { %s9347_s19 = smov %s4779_s25  ;;  %s9348_s20 = smov %s4768_s22 }
 0x45a   :  { %14 = sbr.rel (!%p12_p10) target bundleno = 2 (0x2), region = 121 }

</bundles_post_ra>
